<compile_context>
chip_gen: v7x
topology: tpu7x:2x2x1
jax: 0.10.0
libtpu: 0.0.40
codegen_flags: <defaults>
</compile_context>

<pallas_src>
import functools

import jax
import jax.numpy as jnp
from jax.experimental import pallas as pl
from jax.experimental.pallas import tpu as pltpu

dZ = 5 * 5 * 9 + 1      # 226
nodeNum = 200
stencilNum = 10

DZP = 256               # dZ padded to lane multiple
NP = 256                # nodeNum padded to lane multiple
OUT_P = 128             # padded (lane-dense) output width; real output is col 0


def dsmodel_kernel(z_ref,                        # (S, TB, DZP)   bf16  (streamed)
                   v_ref, w1_ref, b1_ref,        # (S,DZP,NP) bf16, (S,NP,NP) bf16, (S,1,NP) f32
                   w2_ref, b2_ref,               # (S,NP,NP) bf16,  (S,1,NP) f32
                   fc1w_ref, fc1b_ref,           # (NP,NP) bf16,    (1,NP) f32
                   fc2w_ref, fc2b_ref,           # (NP,NP) bf16,    (1,NP) f32
                   fc3w_ref, fc3b_ref,           # (NP,OUT_P) bf16, (1,OUT_P) f32
                   out_ref):                     # (TB, OUT_P) f32
    # Block 0: `out` is exactly zero, so the W1 dot and the residual vanish
    # (the W1 bias is pre-fused into b1 = vb + w1b).
    l1 = jnp.dot(z_ref[0], v_ref[0], preferred_element_type=jnp.float32) + b1_ref[0]
    a1 = jnp.maximum(l1, 0.0).astype(jnp.bfloat16)
    l2 = jnp.dot(a1, w2_ref[0], preferred_element_type=jnp.float32) + b2_ref[0]
    out_f32 = jnp.maximum(l2, 0.0)               # running residual state (f32)
    out_bf = out_f32.astype(jnp.bfloat16)        # bf16 shadow for the next MXU pass

    # Blocks 1..9, statically unrolled (weights are VMEM-resident; static slices
    # of the stacks are free).
    for s in range(1, stencilNum):
        l1 = (jnp.dot(z_ref[s], v_ref[s], preferred_element_type=jnp.float32)
              + jnp.dot(out_bf, w1_ref[s], preferred_element_type=jnp.float32)
              + b1_ref[s])
        a1 = jnp.maximum(l1, 0.0).astype(jnp.bfloat16)
        l2 = (jnp.dot(a1, w2_ref[s], preferred_element_type=jnp.float32)
              + b2_ref[s] + out_f32)
        out_f32 = jnp.maximum(l2, 0.0)
        out_bf = out_f32.astype(jnp.bfloat16)

    # TODO(synk): torch.isnan / torch.isinf debug prints in Block.forward are
    # side-effect-only (do not affect the output) and are omitted.

    # FC head: Linear->ReLU->Linear->ReLU->Linear->LeakyReLU(0.01).
    h = jnp.maximum(
        jnp.dot(out_bf, fc1w_ref[...], preferred_element_type=jnp.float32)
        + fc1b_ref[...], 0.0)
    h = jnp.maximum(
        jnp.dot(h.astype(jnp.bfloat16), fc2w_ref[...],
                preferred_element_type=jnp.float32) + fc2b_ref[...], 0.0)
    y = (jnp.dot(h.astype(jnp.bfloat16), fc3w_ref[...],
                 preferred_element_type=jnp.float32) + fc3b_ref[...])
    out_ref[...] = jnp.where(y >= 0.0, y, 0.01 * y)


def init_params(key):
    """Deterministic synthetic parameters (PyTorch-Linear-like uniform init)."""
    n_lin = 3 * stencilNum + 3                      # 30 block linears + 3 FC linears
    ks = iter(jax.random.split(key, n_lin))

    def lin(k, fan_in, fan_out):
        bound = 1.0 / jnp.sqrt(jnp.float32(fan_in))
        kw, kb = jax.random.split(k)
        w = jax.random.uniform(kw, (fan_in, fan_out), jnp.float32, -bound, bound)
        b = jax.random.uniform(kb, (1, fan_out), jnp.float32, -bound, bound)
        return w, b

    V, Vb, W1, W1b, W2, W2b = [], [], [], [], [], []
    for _ in range(stencilNum):
        w, b = lin(next(ks), dZ, nodeNum);      V.append(w);  Vb.append(b)
        w, b = lin(next(ks), nodeNum, nodeNum); W1.append(w); W1b.append(b)
        w, b = lin(next(ks), nodeNum, nodeNum); W2.append(w); W2b.append(b)
    params = dict(
        V=jnp.stack(V), Vb=jnp.stack(Vb),
        W1=jnp.stack(W1), W1b=jnp.stack(W1b),
        W2=jnp.stack(W2), W2b=jnp.stack(W2b),
    )
    params["fc1w"], params["fc1b"] = lin(next(ks), nodeNum, nodeNum)
    params["fc2w"], params["fc2b"] = lin(next(ks), nodeNum, nodeNum)
    params["fc3w"], params["fc3b"] = lin(next(ks), nodeNum, 1)
    return params


def _pad_to(a, shape):
    return jnp.pad(a, [(0, t - s) for s, t in zip(a.shape, shape)])


def _round_up(x, m):
    return ((x + m - 1) // m) * m


def prepare_kernel_params(p):
    """Zero-pad to (DZP, NP, OUT_P), fuse block biases, cast MXU weights to bf16."""
    S = stencilNum
    v = _pad_to(p["V"], (S, DZP, NP)).astype(jnp.bfloat16)
    w1 = _pad_to(p["W1"], (S, NP, NP)).astype(jnp.bfloat16)
    b1 = _pad_to(p["Vb"] + p["W1b"], (S, 1, NP)).astype(jnp.float32)
    w2 = _pad_to(p["W2"], (S, NP, NP)).astype(jnp.bfloat16)
    b2 = _pad_to(p["W2b"], (S, 1, NP)).astype(jnp.float32)
    fc1w = _pad_to(p["fc1w"], (NP, NP)).astype(jnp.bfloat16)
    fc1b = _pad_to(p["fc1b"], (1, NP)).astype(jnp.float32)
    fc2w = _pad_to(p["fc2w"], (NP, NP)).astype(jnp.bfloat16)
    fc2b = _pad_to(p["fc2b"], (1, NP)).astype(jnp.float32)
    fc3w = _pad_to(p["fc3w"], (NP, OUT_P)).astype(jnp.bfloat16)
    fc3b = _pad_to(p["fc3b"], (1, OUT_P)).astype(jnp.float32)
    return (v, w1, b1, w2, b2, fc1w, fc1b, fc2w, fc2b, fc3w, fc3b)


@jax.jit
def ds_model_forward(z, p):
    """z: (B, dZ, stencilNum) float32 (PyTorch layout). Returns (B, 1) float32."""
    B = z.shape[0]

    # Batch tile: big enough to amortize per-step overhead, but >= 2 tiles when
    # B > 64 so the "parallel" batch axis shards across both v7x TensorCores.
    b8 = _round_up(B, 8)
    if b8 <= 64:
        tb = b8
    else:
        tb = min(512, _round_up(b8 // 2, 8))
    b_pad = _round_up(B, tb)
    nb = b_pad // tb

    # (B, dZ, S) -> zero-pad -> (S, B_pad, DZP), bf16 for the MXU.
    # TODO(synk): produce z in (S, B, DZP) bf16 layout upstream to keep this
    # pad/transpose/cast (pure layout plumbing) out of the timed path.
    z_p = _pad_to(z, (b_pad, DZP, stencilNum))
    z_t = jnp.transpose(z_p, (2, 0, 1)).astype(jnp.bfloat16)

    kp = prepare_kernel_params(p)

    S = stencilNum
    grid_spec = pltpu.PrefetchScalarGridSpec(
        num_scalar_prefetch=0,
        grid=(nb,),
        in_specs=[
            # z: streamed per batch tile (all 10 stencil slabs at once).
            pl.BlockSpec((S, tb, DZP), lambda b: (0, b, 0)),
            # Per-stencil weight stacks: full arrays, constant index_map ->
            # VMEM-resident, fetched once, never re-streamed per batch tile.
            pl.BlockSpec((S, DZP, NP), lambda b: (0, 0, 0)),       # V stack
            pl.BlockSpec((S, NP, NP), lambda b: (0, 0, 0)),        # W1 stack
            pl.BlockSpec((S, 1, NP), lambda b: (0, 0, 0)),         # vb+w1b
            pl.BlockSpec((S, NP, NP), lambda b: (0, 0, 0)),        # W2 stack
            pl.BlockSpec((S, 1, NP), lambda b: (0, 0, 0)),         # w2b
            # FC head weights: constant index_map, VMEM-resident.
            pl.BlockSpec((NP, NP), lambda b: (0, 0)),              # fc1w
            pl.BlockSpec((1, NP), lambda b: (0, 0)),               # fc1b
            pl.BlockSpec((NP, NP), lambda b: (0, 0)),              # fc2w
            pl.BlockSpec((1, NP), lambda b: (0, 0)),               # fc2b
            pl.BlockSpec((NP, OUT_P), lambda b: (0, 0)),           # fc3w
            pl.BlockSpec((1, OUT_P), lambda b: (0, 0)),            # fc3b
        ],
        out_specs=pl.BlockSpec((tb, OUT_P), lambda b: (b, 0)),
    )

    # VMEM budget @ tb=512: weights ~4 MiB (<=8 MiB if double-buffered) +
    # z 2x2.5 MiB + out 2x0.25 MiB + live f32 values ~3 MiB  ->  well under
    # 32 MiB on every generation (v7x included, 64 MiB physical per TC).
    y = pl.pallas_call(
        dsmodel_kernel,
        out_shape=jax.ShapeDtypeStruct((b_pad, OUT_P), jnp.float32),
        grid_spec=grid_spec,
        compiler_params=pltpu.CompilerParams(
            dimension_semantics=("parallel",),
            vmem_limit_bytes=32 << 20),
    )(z_t, *kp)

    return y[:B, :1]


def ds_model_reference(z, p):
    """Pure-JAX reference mirroring the kernel math (bf16 MXU operands, f32 accum).

    Versus true f32 PyTorch semantics the bf16 operands give ~1e-3-level
    relative error over the 10-block residual chain; the test tolerance below
    (2e-3 abs/rel vs this matched reference) makes that explicit.
    """
    B = z.shape[0]
    bf = lambda a: a.astype(jnp.bfloat16)
    f32dot = functools.partial(jnp.dot, preferred_element_type=jnp.float32)
    out = jnp.zeros((B, nodeNum), jnp.float32)
    for i in range(stencilNum):
        zi = z[:, :, i]
        l1 = (f32dot(bf(zi), bf(p["V"][i])) + p["Vb"][i]
              + f32dot(bf(out), bf(p["W1"][i])) + p["W1b"][i])
        a1 = jnp.maximum(l1, 0.0)
        l2 = f32dot(bf(a1), bf(p["W2"][i])) + p["W2b"][i] + out
        out = jnp.maximum(l2, 0.0)
    h = jnp.maximum(f32dot(bf(out), bf(p["fc1w"])) + p["fc1b"], 0.0)
    h = jnp.maximum(f32dot(bf(h), bf(p["fc2w"])) + p["fc2b"], 0.0)
    y = f32dot(bf(h), bf(p["fc3w"])) + p["fc3b"]
    return jnp.where(y >= 0.0, y, 0.01 * y)


if __name__ == "__main__":
    key = jax.random.PRNGKey(0)
    kp_, kz1, kz2 = jax.random.split(key, 3)
    params = init_params(kp_)

    for B, kz in ((8, kz1), (12, kz2)):          # 12 exercises the batch-padding path
        z = jax.random.normal(kz, (B, dZ, stencilNum), jnp.float32)
        out = jax.block_until_ready(ds_model_forward(z, params))
        ref = jax.block_until_ready(ds_model_reference(z, params))
        assert out.shape == (B, 1), out.shape
        err = jnp.max(jnp.abs(out - ref))
        assert bool(jnp.allclose(out, ref, atol=2e-3, rtol=2e-3)), \
            f"B={B}: max abs err {err}"

    print("KERNEL_OK")
</pallas_src>

<mosaic_0001>
module attributes {stable_mosaic.version = 11 : i64} {
  func.func @dsmodel_kernel(%arg0: i32, %arg1: memref<10x8x256xbf16, #tpu.memory_space<vmem>>, %arg2: memref<10x256x256xbf16, #tpu.memory_space<vmem>>, %arg3: memref<10x256x256xbf16, #tpu.memory_space<vmem>>, %arg4: memref<10x1x256xf32, #tpu.memory_space<vmem>>, %arg5: memref<10x256x256xbf16, #tpu.memory_space<vmem>>, %arg6: memref<10x1x256xf32, #tpu.memory_space<vmem>>, %arg7: memref<256x256xbf16, #tpu.memory_space<vmem>>, %arg8: memref<1x256xf32, #tpu.memory_space<vmem>>, %arg9: memref<256x256xbf16, #tpu.memory_space<vmem>>, %arg10: memref<1x256xf32, #tpu.memory_space<vmem>>, %arg11: memref<256x128xbf16, #tpu.memory_space<vmem>>, %arg12: memref<1x128xf32, #tpu.memory_space<vmem>>, %arg13: memref<8x128xf32, #tpu.memory_space<vmem>>) attributes {dimension_semantics = [#tpu.dimension_semantics<parallel>], iteration_bounds = array<i64: 1>, scalar_prefetch = 0 : i64, scratch_operands = 0 : i64, tpu.core_type = #tpu.core_type<tc>, window_params = [{transform_indices = @transform_0, window_bounds = array<i64: 10, 8, 256>}, {pipeline_mode = #tpu.pipeline_mode<synchronous>, transform_indices = @transform_1, window_bounds = array<i64: 10, 256, 256>}, {pipeline_mode = #tpu.pipeline_mode<synchronous>, transform_indices = @transform_2, window_bounds = array<i64: 10, 256, 256>}, {pipeline_mode = #tpu.pipeline_mode<synchronous>, transform_indices = @transform_3, window_bounds = array<i64: 10, 1, 256>}, {pipeline_mode = #tpu.pipeline_mode<synchronous>, transform_indices = @transform_4, window_bounds = array<i64: 10, 256, 256>}, {pipeline_mode = #tpu.pipeline_mode<synchronous>, transform_indices = @transform_5, window_bounds = array<i64: 10, 1, 256>}, {pipeline_mode = #tpu.pipeline_mode<synchronous>, transform_indices = @transform_6, window_bounds = array<i64: 256, 256>}, {pipeline_mode = #tpu.pipeline_mode<synchronous>, transform_indices = @transform_7, window_bounds = array<i64: 1, 256>}, {pipeline_mode = #tpu.pipeline_mode<synchronous>, transform_indices = @transform_8, window_bounds = array<i64: 256, 256>}, {pipeline_mode = #tpu.pipeline_mode<synchronous>, transform_indices = @transform_9, window_bounds = array<i64: 1, 256>}, {pipeline_mode = #tpu.pipeline_mode<synchronous>, transform_indices = @transform_10, window_bounds = array<i64: 256, 128>}, {pipeline_mode = #tpu.pipeline_mode<synchronous>, transform_indices = @transform_11, window_bounds = array<i64: 1, 128>}, {transform_indices = @transform_12, window_bounds = array<i64: 8, 128>}]} {
    %c0 = arith.constant 0 : index
    %c0_0 = arith.constant 0 : index
    %c0_1 = arith.constant 0 : index
    %0 = vector.load %arg1[%c0, %c0_0, %c0_1] : memref<10x8x256xbf16, #tpu.memory_space<vmem>>, vector<1x8x256xbf16>
    %1 = vector.shape_cast %0 : vector<1x8x256xbf16> to vector<8x256xbf16>
    %c0_2 = arith.constant 0 : index
    %c0_3 = arith.constant 0 : index
    %c0_4 = arith.constant 0 : index
    %2 = vector.load %arg2[%c0_2, %c0_3, %c0_4] : memref<10x256x256xbf16, #tpu.memory_space<vmem>>, vector<1x256x256xbf16>
    %3 = vector.shape_cast %2 : vector<1x256x256xbf16> to vector<256x256xbf16>
    %cst = arith.constant dense<0.000000e+00> : vector<8x256xf32>
    %4 = tpu.matmul %1, %3, %cst {dimension_numbers = #tpu.dot_dimension_numbers<[1], [0], [0], [1], [0, 0, 1, 1], [], []>} : vector<8x256xbf16>, vector<256x256xbf16>, vector<8x256xf32> -> vector<8x256xf32>
    %c0_5 = arith.constant 0 : index
    %c0_6 = arith.constant 0 : index
    %c0_7 = arith.constant 0 : index
    %5 = vector.load %arg4[%c0_5, %c0_6, %c0_7] : memref<10x1x256xf32, #tpu.memory_space<vmem>>, vector<1x1x256xf32>
    %6 = vector.shape_cast %5 : vector<1x1x256xf32> to vector<1x256xf32>
    %7 = vector.broadcast %6 : vector<1x256xf32> to vector<8x256xf32>
    %8 = arith.addf %4, %7 : vector<8x256xf32>
    %cst_8 = arith.constant 0.000000e+00 : f32
    %9 = vector.broadcast %cst_8 : f32 to vector<8x256xf32>
    %10 = arith.maximumf %8, %9 : vector<8x256xf32>
    %11 = arith.truncf %10 : vector<8x256xf32> to vector<8x256xbf16>
    %c0_9 = arith.constant 0 : index
    %c0_10 = arith.constant 0 : index
    %c0_11 = arith.constant 0 : index
    %12 = vector.load %arg5[%c0_9, %c0_10, %c0_11] : memref<10x256x256xbf16, #tpu.memory_space<vmem>>, vector<1x256x256xbf16>
    %13 = vector.shape_cast %12 : vector<1x256x256xbf16> to vector<256x256xbf16>
    %cst_12 = arith.constant dense<0.000000e+00> : vector<8x256xf32>
    %14 = tpu.matmul %11, %13, %cst_12 {dimension_numbers = #tpu.dot_dimension_numbers<[1], [0], [0], [1], [0, 0, 1, 1], [], []>} : vector<8x256xbf16>, vector<256x256xbf16>, vector<8x256xf32> -> vector<8x256xf32>
    %c0_13 = arith.constant 0 : index
    %c0_14 = arith.constant 0 : index
    %c0_15 = arith.constant 0 : index
    %15 = vector.load %arg6[%c0_13, %c0_14, %c0_15] : memref<10x1x256xf32, #tpu.memory_space<vmem>>, vector<1x1x256xf32>
    %16 = vector.shape_cast %15 : vector<1x1x256xf32> to vector<1x256xf32>
    %17 = vector.broadcast %16 : vector<1x256xf32> to vector<8x256xf32>
    %18 = arith.addf %14, %17 : vector<8x256xf32>
    %cst_16 = arith.constant 0.000000e+00 : f32
    %19 = vector.broadcast %cst_16 : f32 to vector<8x256xf32>
    %20 = arith.maximumf %18, %19 : vector<8x256xf32>
    %21 = arith.truncf %20 : vector<8x256xf32> to vector<8x256xbf16>
    %c1 = arith.constant 1 : index
    %c0_17 = arith.constant 0 : index
    %c0_18 = arith.constant 0 : index
    %22 = vector.load %arg1[%c1, %c0_17, %c0_18] : memref<10x8x256xbf16, #tpu.memory_space<vmem>>, vector<1x8x256xbf16>
    %23 = vector.shape_cast %22 : vector<1x8x256xbf16> to vector<8x256xbf16>
    %c1_19 = arith.constant 1 : index
    %c0_20 = arith.constant 0 : index
    %c0_21 = arith.constant 0 : index
    %24 = vector.load %arg2[%c1_19, %c0_20, %c0_21] : memref<10x256x256xbf16, #tpu.memory_space<vmem>>, vector<1x256x256xbf16>
    %25 = vector.shape_cast %24 : vector<1x256x256xbf16> to vector<256x256xbf16>
    %cst_22 = arith.constant dense<0.000000e+00> : vector<8x256xf32>
    %26 = tpu.matmul %23, %25, %cst_22 {dimension_numbers = #tpu.dot_dimension_numbers<[1], [0], [0], [1], [0, 0, 1, 1], [], []>} : vector<8x256xbf16>, vector<256x256xbf16>, vector<8x256xf32> -> vector<8x256xf32>
    %c1_23 = arith.constant 1 : index
    %c0_24 = arith.constant 0 : index
    %c0_25 = arith.constant 0 : index
    %27 = vector.load %arg3[%c1_23, %c0_24, %c0_25] : memref<10x256x256xbf16, #tpu.memory_space<vmem>>, vector<1x256x256xbf16>
    %28 = vector.shape_cast %27 : vector<1x256x256xbf16> to vector<256x256xbf16>
    %cst_26 = arith.constant dense<0.000000e+00> : vector<8x256xf32>
    %29 = tpu.matmul %21, %28, %cst_26 {dimension_numbers = #tpu.dot_dimension_numbers<[1], [0], [0], [1], [0, 0, 1, 1], [], []>} : vector<8x256xbf16>, vector<256x256xbf16>, vector<8x256xf32> -> vector<8x256xf32>
    %30 = arith.addf %26, %29 : vector<8x256xf32>
    %c1_27 = arith.constant 1 : index
    %c0_28 = arith.constant 0 : index
    %c0_29 = arith.constant 0 : index
    %31 = vector.load %arg4[%c1_27, %c0_28, %c0_29] : memref<10x1x256xf32, #tpu.memory_space<vmem>>, vector<1x1x256xf32>
    %32 = vector.shape_cast %31 : vector<1x1x256xf32> to vector<1x256xf32>
    %33 = vector.broadcast %32 : vector<1x256xf32> to vector<8x256xf32>
    %34 = arith.addf %30, %33 : vector<8x256xf32>
    %cst_30 = arith.constant 0.000000e+00 : f32
    %35 = vector.broadcast %cst_30 : f32 to vector<8x256xf32>
    %36 = arith.maximumf %34, %35 : vector<8x256xf32>
    %37 = arith.truncf %36 : vector<8x256xf32> to vector<8x256xbf16>
    %c1_31 = arith.constant 1 : index
    %c0_32 = arith.constant 0 : index
    %c0_33 = arith.constant 0 : index
    %38 = vector.load %arg5[%c1_31, %c0_32, %c0_33] : memref<10x256x256xbf16, #tpu.memory_space<vmem>>, vector<1x256x256xbf16>
    %39 = vector.shape_cast %38 : vector<1x256x256xbf16> to vector<256x256xbf16>
    %cst_34 = arith.constant dense<0.000000e+00> : vector<8x256xf32>
    %40 = tpu.matmul %37, %39, %cst_34 {dimension_numbers = #tpu.dot_dimension_numbers<[1], [0], [0], [1], [0, 0, 1, 1], [], []>} : vector<8x256xbf16>, vector<256x256xbf16>, vector<8x256xf32> -> vector<8x256xf32>
    %c1_35 = arith.constant 1 : index
    %c0_36 = arith.constant 0 : index
    %c0_37 = arith.constant 0 : index
    %41 = vector.load %arg6[%c1_35, %c0_36, %c0_37] : memref<10x1x256xf32, #tpu.memory_space<vmem>>, vector<1x1x256xf32>
    %42 = vector.shape_cast %41 : vector<1x1x256xf32> to vector<1x256xf32>
    %43 = vector.broadcast %42 : vector<1x256xf32> to vector<8x256xf32>
    %44 = arith.addf %40, %43 : vector<8x256xf32>
    %45 = arith.addf %44, %20 : vector<8x256xf32>
    %cst_38 = arith.constant 0.000000e+00 : f32
    %46 = vector.broadcast %cst_38 : f32 to vector<8x256xf32>
    %47 = arith.maximumf %45, %46 : vector<8x256xf32>
    %48 = arith.truncf %47 : vector<8x256xf32> to vector<8x256xbf16>
    %c2 = arith.constant 2 : index
    %c0_39 = arith.constant 0 : index
    %c0_40 = arith.constant 0 : index
    %49 = vector.load %arg1[%c2, %c0_39, %c0_40] : memref<10x8x256xbf16, #tpu.memory_space<vmem>>, vector<1x8x256xbf16>
    %50 = vector.shape_cast %49 : vector<1x8x256xbf16> to vector<8x256xbf16>
    %c2_41 = arith.constant 2 : index
    %c0_42 = arith.constant 0 : index
    %c0_43 = arith.constant 0 : index
    %51 = vector.load %arg2[%c2_41, %c0_42, %c0_43] : memref<10x256x256xbf16, #tpu.memory_space<vmem>>, vector<1x256x256xbf16>
    %52 = vector.shape_cast %51 : vector<1x256x256xbf16> to vector<256x256xbf16>
    %cst_44 = arith.constant dense<0.000000e+00> : vector<8x256xf32>
    %53 = tpu.matmul %50, %52, %cst_44 {dimension_numbers = #tpu.dot_dimension_numbers<[1], [0], [0], [1], [0, 0, 1, 1], [], []>} : vector<8x256xbf16>, vector<256x256xbf16>, vector<8x256xf32> -> vector<8x256xf32>
    %c2_45 = arith.constant 2 : index
    %c0_46 = arith.constant 0 : index
    %c0_47 = arith.constant 0 : index
    %54 = vector.load %arg3[%c2_45, %c0_46, %c0_47] : memref<10x256x256xbf16, #tpu.memory_space<vmem>>, vector<1x256x256xbf16>
    %55 = vector.shape_cast %54 : vector<1x256x256xbf16> to vector<256x256xbf16>
    %cst_48 = arith.constant dense<0.000000e+00> : vector<8x256xf32>
    %56 = tpu.matmul %48, %55, %cst_48 {dimension_numbers = #tpu.dot_dimension_numbers<[1], [0], [0], [1], [0, 0, 1, 1], [], []>} : vector<8x256xbf16>, vector<256x256xbf16>, vector<8x256xf32> -> vector<8x256xf32>
    %57 = arith.addf %53, %56 : vector<8x256xf32>
    %c2_49 = arith.constant 2 : index
    %c0_50 = arith.constant 0 : index
    %c0_51 = arith.constant 0 : index
    %58 = vector.load %arg4[%c2_49, %c0_50, %c0_51] : memref<10x1x256xf32, #tpu.memory_space<vmem>>, vector<1x1x256xf32>
    %59 = vector.shape_cast %58 : vector<1x1x256xf32> to vector<1x256xf32>
    %60 = vector.broadcast %59 : vector<1x256xf32> to vector<8x256xf32>
    %61 = arith.addf %57, %60 : vector<8x256xf32>
    %cst_52 = arith.constant 0.000000e+00 : f32
    %62 = vector.broadcast %cst_52 : f32 to vector<8x256xf32>
    %63 = arith.maximumf %61, %62 : vector<8x256xf32>
    %64 = arith.truncf %63 : vector<8x256xf32> to vector<8x256xbf16>
    %c2_53 = arith.constant 2 : index
    %c0_54 = arith.constant 0 : index
    %c0_55 = arith.constant 0 : index
    %65 = vector.load %arg5[%c2_53, %c0_54, %c0_55] : memref<10x256x256xbf16, #tpu.memory_space<vmem>>, vector<1x256x256xbf16>
    %66 = vector.shape_cast %65 : vector<1x256x256xbf16> to vector<256x256xbf16>
    %cst_56 = arith.constant dense<0.000000e+00> : vector<8x256xf32>
    %67 = tpu.matmul %64, %66, %cst_56 {dimension_numbers = #tpu.dot_dimension_numbers<[1], [0], [0], [1], [0, 0, 1, 1], [], []>} : vector<8x256xbf16>, vector<256x256xbf16>, vector<8x256xf32> -> vector<8x256xf32>
    %c2_57 = arith.constant 2 : index
    %c0_58 = arith.constant 0 : index
    %c0_59 = arith.constant 0 : index
    %68 = vector.load %arg6[%c2_57, %c0_58, %c0_59] : memref<10x1x256xf32, #tpu.memory_space<vmem>>, vector<1x1x256xf32>
    %69 = vector.shape_cast %68 : vector<1x1x256xf32> to vector<1x256xf32>
    %70 = vector.broadcast %69 : vector<1x256xf32> to vector<8x256xf32>
    %71 = arith.addf %67, %70 : vector<8x256xf32>
    %72 = arith.addf %71, %47 : vector<8x256xf32>
    %cst_60 = arith.constant 0.000000e+00 : f32
    %73 = vector.broadcast %cst_60 : f32 to vector<8x256xf32>
    %74 = arith.maximumf %72, %73 : vector<8x256xf32>
    %75 = arith.truncf %74 : vector<8x256xf32> to vector<8x256xbf16>
    %c3 = arith.constant 3 : index
    %c0_61 = arith.constant 0 : index
    %c0_62 = arith.constant 0 : index
    %76 = vector.load %arg1[%c3, %c0_61, %c0_62] : memref<10x8x256xbf16, #tpu.memory_space<vmem>>, vector<1x8x256xbf16>
    %77 = vector.shape_cast %76 : vector<1x8x256xbf16> to vector<8x256xbf16>
    %c3_63 = arith.constant 3 : index
    %c0_64 = arith.constant 0 : index
    %c0_65 = arith.constant 0 : index
    %78 = vector.load %arg2[%c3_63, %c0_64, %c0_65] : memref<10x256x256xbf16, #tpu.memory_space<vmem>>, vector<1x256x256xbf16>
    %79 = vector.shape_cast %78 : vector<1x256x256xbf16> to vector<256x256xbf16>
    %cst_66 = arith.constant dense<0.000000e+00> : vector<8x256xf32>
    %80 = tpu.matmul %77, %79, %cst_66 {dimension_numbers = #tpu.dot_dimension_numbers<[1], [0], [0], [1], [0, 0, 1, 1], [], []>} : vector<8x256xbf16>, vector<256x256xbf16>, vector<8x256xf32> -> vector<8x256xf32>
    %c3_67 = arith.constant 3 : index
    %c0_68 = arith.constant 0 : index
    %c0_69 = arith.constant 0 : index
    %81 = vector.load %arg3[%c3_67, %c0_68, %c0_69] : memref<10x256x256xbf16, #tpu.memory_space<vmem>>, vector<1x256x256xbf16>
    %82 = vector.shape_cast %81 : vector<1x256x256xbf16> to vector<256x256xbf16>
    %cst_70 = arith.constant dense<0.000000e+00> : vector<8x256xf32>
    %83 = tpu.matmul %75, %82, %cst_70 {dimension_numbers = #tpu.dot_dimension_numbers<[1], [0], [0], [1], [0, 0, 1, 1], [], []>} : vector<8x256xbf16>, vector<256x256xbf16>, vector<8x256xf32> -> vector<8x256xf32>
    %84 = arith.addf %80, %83 : vector<8x256xf32>
    %c3_71 = arith.constant 3 : index
    %c0_72 = arith.constant 0 : index
    %c0_73 = arith.constant 0 : index
    %85 = vector.load %arg4[%c3_71, %c0_72, %c0_73] : memref<10x1x256xf32, #tpu.memory_space<vmem>>, vector<1x1x256xf32>
    %86 = vector.shape_cast %85 : vector<1x1x256xf32> to vector<1x256xf32>
    %87 = vector.broadcast %86 : vector<1x256xf32> to vector<8x256xf32>
    %88 = arith.addf %84, %87 : vector<8x256xf32>
    %cst_74 = arith.constant 0.000000e+00 : f32
    %89 = vector.broadcast %cst_74 : f32 to vector<8x256xf32>
    %90 = arith.maximumf %88, %89 : vector<8x256xf32>
    %91 = arith.truncf %90 : vector<8x256xf32> to vector<8x256xbf16>
    %c3_75 = arith.constant 3 : index
    %c0_76 = arith.constant 0 : index
    %c0_77 = arith.constant 0 : index
    %92 = vector.load %arg5[%c3_75, %c0_76, %c0_77] : memref<10x256x256xbf16, #tpu.memory_space<vmem>>, vector<1x256x256xbf16>
    %93 = vector.shape_cast %92 : vector<1x256x256xbf16> to vector<256x256xbf16>
    %cst_78 = arith.constant dense<0.000000e+00> : vector<8x256xf32>
    %94 = tpu.matmul %91, %93, %cst_78 {dimension_numbers = #tpu.dot_dimension_numbers<[1], [0], [0], [1], [0, 0, 1, 1], [], []>} : vector<8x256xbf16>, vector<256x256xbf16>, vector<8x256xf32> -> vector<8x256xf32>
    %c3_79 = arith.constant 3 : index
    %c0_80 = arith.constant 0 : index
    %c0_81 = arith.constant 0 : index
    %95 = vector.load %arg6[%c3_79, %c0_80, %c0_81] : memref<10x1x256xf32, #tpu.memory_space<vmem>>, vector<1x1x256xf32>
    %96 = vector.shape_cast %95 : vector<1x1x256xf32> to vector<1x256xf32>
    %97 = vector.broadcast %96 : vector<1x256xf32> to vector<8x256xf32>
    %98 = arith.addf %94, %97 : vector<8x256xf32>
    %99 = arith.addf %98, %74 : vector<8x256xf32>
    %cst_82 = arith.constant 0.000000e+00 : f32
    %100 = vector.broadcast %cst_82 : f32 to vector<8x256xf32>
    %101 = arith.maximumf %99, %100 : vector<8x256xf32>
    %102 = arith.truncf %101 : vector<8x256xf32> to vector<8x256xbf16>
    %c4 = arith.constant 4 : index
    %c0_83 = arith.constant 0 : index
    %c0_84 = arith.constant 0 : index
    %103 = vector.load %arg1[%c4, %c0_83, %c0_84] : memref<10x8x256xbf16, #tpu.memory_space<vmem>>, vector<1x8x256xbf16>
    %104 = vector.shape_cast %103 : vector<1x8x256xbf16> to vector<8x256xbf16>
    %c4_85 = arith.constant 4 : index
    %c0_86 = arith.constant 0 : index
    %c0_87 = arith.constant 0 : index
    %105 = vector.load %arg2[%c4_85, %c0_86, %c0_87] : memref<10x256x256xbf16, #tpu.memory_space<vmem>>, vector<1x256x256xbf16>
    %106 = vector.shape_cast %105 : vector<1x256x256xbf16> to vector<256x256xbf16>
    %cst_88 = arith.constant dense<0.000000e+00> : vector<8x256xf32>
    %107 = tpu.matmul %104, %106, %cst_88 {dimension_numbers = #tpu.dot_dimension_numbers<[1], [0], [0], [1], [0, 0, 1, 1], [], []>} : vector<8x256xbf16>, vector<256x256xbf16>, vector<8x256xf32> -> vector<8x256xf32>
    %c4_89 = arith.constant 4 : index
    %c0_90 = arith.constant 0 : index
    %c0_91 = arith.constant 0 : index
    %108 = vector.load %arg3[%c4_89, %c0_90, %c0_91] : memref<10x256x256xbf16, #tpu.memory_space<vmem>>, vector<1x256x256xbf16>
    %109 = vector.shape_cast %108 : vector<1x256x256xbf16> to vector<256x256xbf16>
    %cst_92 = arith.constant dense<0.000000e+00> : vector<8x256xf32>
    %110 = tpu.matmul %102, %109, %cst_92 {dimension_numbers = #tpu.dot_dimension_numbers<[1], [0], [0], [1], [0, 0, 1, 1], [], []>} : vector<8x256xbf16>, vector<256x256xbf16>, vector<8x256xf32> -> vector<8x256xf32>
    %111 = arith.addf %107, %110 : vector<8x256xf32>
    %c4_93 = arith.constant 4 : index
    %c0_94 = arith.constant 0 : index
    %c0_95 = arith.constant 0 : index
    %112 = vector.load %arg4[%c4_93, %c0_94, %c0_95] : memref<10x1x256xf32, #tpu.memory_space<vmem>>, vector<1x1x256xf32>
    %113 = vector.shape_cast %112 : vector<1x1x256xf32> to vector<1x256xf32>
    %114 = vector.broadcast %113 : vector<1x256xf32> to vector<8x256xf32>
    %115 = arith.addf %111, %114 : vector<8x256xf32>
    %cst_96 = arith.constant 0.000000e+00 : f32
    %116 = vector.broadcast %cst_96 : f32 to vector<8x256xf32>
    %117 = arith.maximumf %115, %116 : vector<8x256xf32>
    %118 = arith.truncf %117 : vector<8x256xf32> to vector<8x256xbf16>
    %c4_97 = arith.constant 4 : index
    %c0_98 = arith.constant 0 : index
    %c0_99 = arith.constant 0 : index
    %119 = vector.load %arg5[%c4_97, %c0_98, %c0_99] : memref<10x256x256xbf16, #tpu.memory_space<vmem>>, vector<1x256x256xbf16>
    %120 = vector.shape_cast %119 : vector<1x256x256xbf16> to vector<256x256xbf16>
    %cst_100 = arith.constant dense<0.000000e+00> : vector<8x256xf32>
    %121 = tpu.matmul %118, %120, %cst_100 {dimension_numbers = #tpu.dot_dimension_numbers<[1], [0], [0], [1], [0, 0, 1, 1], [], []>} : vector<8x256xbf16>, vector<256x256xbf16>, vector<8x256xf32> -> vector<8x256xf32>
    %c4_101 = arith.constant 4 : index
    %c0_102 = arith.constant 0 : index
    %c0_103 = arith.constant 0 : index
    %122 = vector.load %arg6[%c4_101, %c0_102, %c0_103] : memref<10x1x256xf32, #tpu.memory_space<vmem>>, vector<1x1x256xf32>
    %123 = vector.shape_cast %122 : vector<1x1x256xf32> to vector<1x256xf32>
    %124 = vector.broadcast %123 : vector<1x256xf32> to vector<8x256xf32>
    %125 = arith.addf %121, %124 : vector<8x256xf32>
    %126 = arith.addf %125, %101 : vector<8x256xf32>
    %cst_104 = arith.constant 0.000000e+00 : f32
    %127 = vector.broadcast %cst_104 : f32 to vector<8x256xf32>
    %128 = arith.maximumf %126, %127 : vector<8x256xf32>
    %129 = arith.truncf %128 : vector<8x256xf32> to vector<8x256xbf16>
    %c5 = arith.constant 5 : index
    %c0_105 = arith.constant 0 : index
    %c0_106 = arith.constant 0 : index
    %130 = vector.load %arg1[%c5, %c0_105, %c0_106] : memref<10x8x256xbf16, #tpu.memory_space<vmem>>, vector<1x8x256xbf16>
    %131 = vector.shape_cast %130 : vector<1x8x256xbf16> to vector<8x256xbf16>
    %c5_107 = arith.constant 5 : index
    %c0_108 = arith.constant 0 : index
    %c0_109 = arith.constant 0 : index
    %132 = vector.load %arg2[%c5_107, %c0_108, %c0_109] : memref<10x256x256xbf16, #tpu.memory_space<vmem>>, vector<1x256x256xbf16>
    %133 = vector.shape_cast %132 : vector<1x256x256xbf16> to vector<256x256xbf16>
    %cst_110 = arith.constant dense<0.000000e+00> : vector<8x256xf32>
    %134 = tpu.matmul %131, %133, %cst_110 {dimension_numbers = #tpu.dot_dimension_numbers<[1], [0], [0], [1], [0, 0, 1, 1], [], []>} : vector<8x256xbf16>, vector<256x256xbf16>, vector<8x256xf32> -> vector<8x256xf32>
    %c5_111 = arith.constant 5 : index
    %c0_112 = arith.constant 0 : index
    %c0_113 = arith.constant 0 : index
    %135 = vector.load %arg3[%c5_111, %c0_112, %c0_113] : memref<10x256x256xbf16, #tpu.memory_space<vmem>>, vector<1x256x256xbf16>
    %136 = vector.shape_cast %135 : vector<1x256x256xbf16> to vector<256x256xbf16>
    %cst_114 = arith.constant dense<0.000000e+00> : vector<8x256xf32>
    %137 = tpu.matmul %129, %136, %cst_114 {dimension_numbers = #tpu.dot_dimension_numbers<[1], [0], [0], [1], [0, 0, 1, 1], [], []>} : vector<8x256xbf16>, vector<256x256xbf16>, vector<8x256xf32> -> vector<8x256xf32>
    %138 = arith.addf %134, %137 : vector<8x256xf32>
    %c5_115 = arith.constant 5 : index
    %c0_116 = arith.constant 0 : index
    %c0_117 = arith.constant 0 : index
    %139 = vector.load %arg4[%c5_115, %c0_116, %c0_117] : memref<10x1x256xf32, #tpu.memory_space<vmem>>, vector<1x1x256xf32>
    %140 = vector.shape_cast %139 : vector<1x1x256xf32> to vector<1x256xf32>
    %141 = vector.broadcast %140 : vector<1x256xf32> to vector<8x256xf32>
    %142 = arith.addf %138, %141 : vector<8x256xf32>
    %cst_118 = arith.constant 0.000000e+00 : f32
    %143 = vector.broadcast %cst_118 : f32 to vector<8x256xf32>
    %144 = arith.maximumf %142, %143 : vector<8x256xf32>
    %145 = arith.truncf %144 : vector<8x256xf32> to vector<8x256xbf16>
    %c5_119 = arith.constant 5 : index
    %c0_120 = arith.constant 0 : index
    %c0_121 = arith.constant 0 : index
    %146 = vector.load %arg5[%c5_119, %c0_120, %c0_121] : memref<10x256x256xbf16, #tpu.memory_space<vmem>>, vector<1x256x256xbf16>
    %147 = vector.shape_cast %146 : vector<1x256x256xbf16> to vector<256x256xbf16>
    %cst_122 = arith.constant dense<0.000000e+00> : vector<8x256xf32>
    %148 = tpu.matmul %145, %147, %cst_122 {dimension_numbers = #tpu.dot_dimension_numbers<[1], [0], [0], [1], [0, 0, 1, 1], [], []>} : vector<8x256xbf16>, vector<256x256xbf16>, vector<8x256xf32> -> vector<8x256xf32>
    %c5_123 = arith.constant 5 : index
    %c0_124 = arith.constant 0 : index
    %c0_125 = arith.constant 0 : index
    %149 = vector.load %arg6[%c5_123, %c0_124, %c0_125] : memref<10x1x256xf32, #tpu.memory_space<vmem>>, vector<1x1x256xf32>
    %150 = vector.shape_cast %149 : vector<1x1x256xf32> to vector<1x256xf32>
    %151 = vector.broadcast %150 : vector<1x256xf32> to vector<8x256xf32>
    %152 = arith.addf %148, %151 : vector<8x256xf32>
    %153 = arith.addf %152, %128 : vector<8x256xf32>
    %cst_126 = arith.constant 0.000000e+00 : f32
    %154 = vector.broadcast %cst_126 : f32 to vector<8x256xf32>
    %155 = arith.maximumf %153, %154 : vector<8x256xf32>
    %156 = arith.truncf %155 : vector<8x256xf32> to vector<8x256xbf16>
    %c6 = arith.constant 6 : index
    %c0_127 = arith.constant 0 : index
    %c0_128 = arith.constant 0 : index
    %157 = vector.load %arg1[%c6, %c0_127, %c0_128] : memref<10x8x256xbf16, #tpu.memory_space<vmem>>, vector<1x8x256xbf16>
    %158 = vector.shape_cast %157 : vector<1x8x256xbf16> to vector<8x256xbf16>
    %c6_129 = arith.constant 6 : index
    %c0_130 = arith.constant 0 : index
    %c0_131 = arith.constant 0 : index
    %159 = vector.load %arg2[%c6_129, %c0_130, %c0_131] : memref<10x256x256xbf16, #tpu.memory_space<vmem>>, vector<1x256x256xbf16>
    %160 = vector.shape_cast %159 : vector<1x256x256xbf16> to vector<256x256xbf16>
    %cst_132 = arith.constant dense<0.000000e+00> : vector<8x256xf32>
    %161 = tpu.matmul %158, %160, %cst_132 {dimension_numbers = #tpu.dot_dimension_numbers<[1], [0], [0], [1], [0, 0, 1, 1], [], []>} : vector<8x256xbf16>, vector<256x256xbf16>, vector<8x256xf32> -> vector<8x256xf32>
    %c6_133 = arith.constant 6 : index
    %c0_134 = arith.constant 0 : index
    %c0_135 = arith.constant 0 : index
    %162 = vector.load %arg3[%c6_133, %c0_134, %c0_135] : memref<10x256x256xbf16, #tpu.memory_space<vmem>>, vector<1x256x256xbf16>
    %163 = vector.shape_cast %162 : vector<1x256x256xbf16> to vector<256x256xbf16>
    %cst_136 = arith.constant dense<0.000000e+00> : vector<8x256xf32>
    %164 = tpu.matmul %156, %163, %cst_136 {dimension_numbers = #tpu.dot_dimension_numbers<[1], [0], [0], [1], [0, 0, 1, 1], [], []>} : vector<8x256xbf16>, vector<256x256xbf16>, vector<8x256xf32> -> vector<8x256xf32>
    %165 = arith.addf %161, %164 : vector<8x256xf32>
    %c6_137 = arith.constant 6 : index
    %c0_138 = arith.constant 0 : index
    %c0_139 = arith.constant 0 : index
    %166 = vector.load %arg4[%c6_137, %c0_138, %c0_139] : memref<10x1x256xf32, #tpu.memory_space<vmem>>, vector<1x1x256xf32>
    %167 = vector.shape_cast %166 : vector<1x1x256xf32> to vector<1x256xf32>
    %168 = vector.broadcast %167 : vector<1x256xf32> to vector<8x256xf32>
    %169 = arith.addf %165, %168 : vector<8x256xf32>
    %cst_140 = arith.constant 0.000000e+00 : f32
    %170 = vector.broadcast %cst_140 : f32 to vector<8x256xf32>
    %171 = arith.maximumf %169, %170 : vector<8x256xf32>
    %172 = arith.truncf %171 : vector<8x256xf32> to vector<8x256xbf16>
    %c6_141 = arith.constant 6 : index
    %c0_142 = arith.constant 0 : index
    %c0_143 = arith.constant 0 : index
    %173 = vector.load %arg5[%c6_141, %c0_142, %c0_143] : memref<10x256x256xbf16, #tpu.memory_space<vmem>>, vector<1x256x256xbf16>
    %174 = vector.shape_cast %173 : vector<1x256x256xbf16> to vector<256x256xbf16>
    %cst_144 = arith.constant dense<0.000000e+00> : vector<8x256xf32>
    %175 = tpu.matmul %172, %174, %cst_144 {dimension_numbers = #tpu.dot_dimension_numbers<[1], [0], [0], [1], [0, 0, 1, 1], [], []>} : vector<8x256xbf16>, vector<256x256xbf16>, vector<8x256xf32> -> vector<8x256xf32>
    %c6_145 = arith.constant 6 : index
    %c0_146 = arith.constant 0 : index
    %c0_147 = arith.constant 0 : index
    %176 = vector.load %arg6[%c6_145, %c0_146, %c0_147] : memref<10x1x256xf32, #tpu.memory_space<vmem>>, vector<1x1x256xf32>
    %177 = vector.shape_cast %176 : vector<1x1x256xf32> to vector<1x256xf32>
    %178 = vector.broadcast %177 : vector<1x256xf32> to vector<8x256xf32>
    %179 = arith.addf %175, %178 : vector<8x256xf32>
    %180 = arith.addf %179, %155 : vector<8x256xf32>
    %cst_148 = arith.constant 0.000000e+00 : f32
    %181 = vector.broadcast %cst_148 : f32 to vector<8x256xf32>
    %182 = arith.maximumf %180, %181 : vector<8x256xf32>
    %183 = arith.truncf %182 : vector<8x256xf32> to vector<8x256xbf16>
    %c7 = arith.constant 7 : index
    %c0_149 = arith.constant 0 : index
    %c0_150 = arith.constant 0 : index
    %184 = vector.load %arg1[%c7, %c0_149, %c0_150] : memref<10x8x256xbf16, #tpu.memory_space<vmem>>, vector<1x8x256xbf16>
    %185 = vector.shape_cast %184 : vector<1x8x256xbf16> to vector<8x256xbf16>
    %c7_151 = arith.constant 7 : index
    %c0_152 = arith.constant 0 : index
    %c0_153 = arith.constant 0 : index
    %186 = vector.load %arg2[%c7_151, %c0_152, %c0_153] : memref<10x256x256xbf16, #tpu.memory_space<vmem>>, vector<1x256x256xbf16>
    %187 = vector.shape_cast %186 : vector<1x256x256xbf16> to vector<256x256xbf16>
    %cst_154 = arith.constant dense<0.000000e+00> : vector<8x256xf32>
    %188 = tpu.matmul %185, %187, %cst_154 {dimension_numbers = #tpu.dot_dimension_numbers<[1], [0], [0], [1], [0, 0, 1, 1], [], []>} : vector<8x256xbf16>, vector<256x256xbf16>, vector<8x256xf32> -> vector<8x256xf32>
    %c7_155 = arith.constant 7 : index
    %c0_156 = arith.constant 0 : index
    %c0_157 = arith.constant 0 : index
    %189 = vector.load %arg3[%c7_155, %c0_156, %c0_157] : memref<10x256x256xbf16, #tpu.memory_space<vmem>>, vector<1x256x256xbf16>
    %190 = vector.shape_cast %189 : vector<1x256x256xbf16> to vector<256x256xbf16>
    %cst_158 = arith.constant dense<0.000000e+00> : vector<8x256xf32>
    %191 = tpu.matmul %183, %190, %cst_158 {dimension_numbers = #tpu.dot_dimension_numbers<[1], [0], [0], [1], [0, 0, 1, 1], [], []>} : vector<8x256xbf16>, vector<256x256xbf16>, vector<8x256xf32> -> vector<8x256xf32>
    %192 = arith.addf %188, %191 : vector<8x256xf32>
    %c7_159 = arith.constant 7 : index
    %c0_160 = arith.constant 0 : index
    %c0_161 = arith.constant 0 : index
    %193 = vector.load %arg4[%c7_159, %c0_160, %c0_161] : memref<10x1x256xf32, #tpu.memory_space<vmem>>, vector<1x1x256xf32>
    %194 = vector.shape_cast %193 : vector<1x1x256xf32> to vector<1x256xf32>
    %195 = vector.broadcast %194 : vector<1x256xf32> to vector<8x256xf32>
    %196 = arith.addf %192, %195 : vector<8x256xf32>
    %cst_162 = arith.constant 0.000000e+00 : f32
    %197 = vector.broadcast %cst_162 : f32 to vector<8x256xf32>
    %198 = arith.maximumf %196, %197 : vector<8x256xf32>
    %199 = arith.truncf %198 : vector<8x256xf32> to vector<8x256xbf16>
    %c7_163 = arith.constant 7 : index
    %c0_164 = arith.constant 0 : index
    %c0_165 = arith.constant 0 : index
    %200 = vector.load %arg5[%c7_163, %c0_164, %c0_165] : memref<10x256x256xbf16, #tpu.memory_space<vmem>>, vector<1x256x256xbf16>
    %201 = vector.shape_cast %200 : vector<1x256x256xbf16> to vector<256x256xbf16>
    %cst_166 = arith.constant dense<0.000000e+00> : vector<8x256xf32>
    %202 = tpu.matmul %199, %201, %cst_166 {dimension_numbers = #tpu.dot_dimension_numbers<[1], [0], [0], [1], [0, 0, 1, 1], [], []>} : vector<8x256xbf16>, vector<256x256xbf16>, vector<8x256xf32> -> vector<8x256xf32>
    %c7_167 = arith.constant 7 : index
    %c0_168 = arith.constant 0 : index
    %c0_169 = arith.constant 0 : index
    %203 = vector.load %arg6[%c7_167, %c0_168, %c0_169] : memref<10x1x256xf32, #tpu.memory_space<vmem>>, vector<1x1x256xf32>
    %204 = vector.shape_cast %203 : vector<1x1x256xf32> to vector<1x256xf32>
    %205 = vector.broadcast %204 : vector<1x256xf32> to vector<8x256xf32>
    %206 = arith.addf %202, %205 : vector<8x256xf32>
    %207 = arith.addf %206, %182 : vector<8x256xf32>
    %cst_170 = arith.constant 0.000000e+00 : f32
    %208 = vector.broadcast %cst_170 : f32 to vector<8x256xf32>
    %209 = arith.maximumf %207, %208 : vector<8x256xf32>
    %210 = arith.truncf %209 : vector<8x256xf32> to vector<8x256xbf16>
    %c8 = arith.constant 8 : index
    %c0_171 = arith.constant 0 : index
    %c0_172 = arith.constant 0 : index
    %211 = vector.load %arg1[%c8, %c0_171, %c0_172] : memref<10x8x256xbf16, #tpu.memory_space<vmem>>, vector<1x8x256xbf16>
    %212 = vector.shape_cast %211 : vector<1x8x256xbf16> to vector<8x256xbf16>
    %c8_173 = arith.constant 8 : index
    %c0_174 = arith.constant 0 : index
    %c0_175 = arith.constant 0 : index
    %213 = vector.load %arg2[%c8_173, %c0_174, %c0_175] : memref<10x256x256xbf16, #tpu.memory_space<vmem>>, vector<1x256x256xbf16>
    %214 = vector.shape_cast %213 : vector<1x256x256xbf16> to vector<256x256xbf16>
    %cst_176 = arith.constant dense<0.000000e+00> : vector<8x256xf32>
    %215 = tpu.matmul %212, %214, %cst_176 {dimension_numbers = #tpu.dot_dimension_numbers<[1], [0], [0], [1], [0, 0, 1, 1], [], []>} : vector<8x256xbf16>, vector<256x256xbf16>, vector<8x256xf32> -> vector<8x256xf32>
    %c8_177 = arith.constant 8 : index
    %c0_178 = arith.constant 0 : index
    %c0_179 = arith.constant 0 : index
    %216 = vector.load %arg3[%c8_177, %c0_178, %c0_179] : memref<10x256x256xbf16, #tpu.memory_space<vmem>>, vector<1x256x256xbf16>
    %217 = vector.shape_cast %216 : vector<1x256x256xbf16> to vector<256x256xbf16>
    %cst_180 = arith.constant dense<0.000000e+00> : vector<8x256xf32>
    %218 = tpu.matmul %210, %217, %cst_180 {dimension_numbers = #tpu.dot_dimension_numbers<[1], [0], [0], [1], [0, 0, 1, 1], [], []>} : vector<8x256xbf16>, vector<256x256xbf16>, vector<8x256xf32> -> vector<8x256xf32>
    %219 = arith.addf %215, %218 : vector<8x256xf32>
    %c8_181 = arith.constant 8 : index
    %c0_182 = arith.constant 0 : index
    %c0_183 = arith.constant 0 : index
    %220 = vector.load %arg4[%c8_181, %c0_182, %c0_183] : memref<10x1x256xf32, #tpu.memory_space<vmem>>, vector<1x1x256xf32>
    %221 = vector.shape_cast %220 : vector<1x1x256xf32> to vector<1x256xf32>
    %222 = vector.broadcast %221 : vector<1x256xf32> to vector<8x256xf32>
    %223 = arith.addf %219, %222 : vector<8x256xf32>
    %cst_184 = arith.constant 0.000000e+00 : f32
    %224 = vector.broadcast %cst_184 : f32 to vector<8x256xf32>
    %225 = arith.maximumf %223, %224 : vector<8x256xf32>
    %226 = arith.truncf %225 : vector<8x256xf32> to vector<8x256xbf16>
    %c8_185 = arith.constant 8 : index
    %c0_186 = arith.constant 0 : index
    %c0_187 = arith.constant 0 : index
    %227 = vector.load %arg5[%c8_185, %c0_186, %c0_187] : memref<10x256x256xbf16, #tpu.memory_space<vmem>>, vector<1x256x256xbf16>
    %228 = vector.shape_cast %227 : vector<1x256x256xbf16> to vector<256x256xbf16>
    %cst_188 = arith.constant dense<0.000000e+00> : vector<8x256xf32>
    %229 = tpu.matmul %226, %228, %cst_188 {dimension_numbers = #tpu.dot_dimension_numbers<[1], [0], [0], [1], [0, 0, 1, 1], [], []>} : vector<8x256xbf16>, vector<256x256xbf16>, vector<8x256xf32> -> vector<8x256xf32>
    %c8_189 = arith.constant 8 : index
    %c0_190 = arith.constant 0 : index
    %c0_191 = arith.constant 0 : index
    %230 = vector.load %arg6[%c8_189, %c0_190, %c0_191] : memref<10x1x256xf32, #tpu.memory_space<vmem>>, vector<1x1x256xf32>
    %231 = vector.shape_cast %230 : vector<1x1x256xf32> to vector<1x256xf32>
    %232 = vector.broadcast %231 : vector<1x256xf32> to vector<8x256xf32>
    %233 = arith.addf %229, %232 : vector<8x256xf32>
    %234 = arith.addf %233, %209 : vector<8x256xf32>
    %cst_192 = arith.constant 0.000000e+00 : f32
    %235 = vector.broadcast %cst_192 : f32 to vector<8x256xf32>
    %236 = arith.maximumf %234, %235 : vector<8x256xf32>
    %237 = arith.truncf %236 : vector<8x256xf32> to vector<8x256xbf16>
    %c9 = arith.constant 9 : index
    %c0_193 = arith.constant 0 : index
    %c0_194 = arith.constant 0 : index
    %238 = vector.load %arg1[%c9, %c0_193, %c0_194] : memref<10x8x256xbf16, #tpu.memory_space<vmem>>, vector<1x8x256xbf16>
    %239 = vector.shape_cast %238 : vector<1x8x256xbf16> to vector<8x256xbf16>
    %c9_195 = arith.constant 9 : index
    %c0_196 = arith.constant 0 : index
    %c0_197 = arith.constant 0 : index
    %240 = vector.load %arg2[%c9_195, %c0_196, %c0_197] : memref<10x256x256xbf16, #tpu.memory_space<vmem>>, vector<1x256x256xbf16>
    %241 = vector.shape_cast %240 : vector<1x256x256xbf16> to vector<256x256xbf16>
    %cst_198 = arith.constant dense<0.000000e+00> : vector<8x256xf32>
    %242 = tpu.matmul %239, %241, %cst_198 {dimension_numbers = #tpu.dot_dimension_numbers<[1], [0], [0], [1], [0, 0, 1, 1], [], []>} : vector<8x256xbf16>, vector<256x256xbf16>, vector<8x256xf32> -> vector<8x256xf32>
    %c9_199 = arith.constant 9 : index
    %c0_200 = arith.constant 0 : index
    %c0_201 = arith.constant 0 : index
    %243 = vector.load %arg3[%c9_199, %c0_200, %c0_201] : memref<10x256x256xbf16, #tpu.memory_space<vmem>>, vector<1x256x256xbf16>
    %244 = vector.shape_cast %243 : vector<1x256x256xbf16> to vector<256x256xbf16>
    %cst_202 = arith.constant dense<0.000000e+00> : vector<8x256xf32>
    %245 = tpu.matmul %237, %244, %cst_202 {dimension_numbers = #tpu.dot_dimension_numbers<[1], [0], [0], [1], [0, 0, 1, 1], [], []>} : vector<8x256xbf16>, vector<256x256xbf16>, vector<8x256xf32> -> vector<8x256xf32>
    %246 = arith.addf %242, %245 : vector<8x256xf32>
    %c9_203 = arith.constant 9 : index
    %c0_204 = arith.constant 0 : index
    %c0_205 = arith.constant 0 : index
    %247 = vector.load %arg4[%c9_203, %c0_204, %c0_205] : memref<10x1x256xf32, #tpu.memory_space<vmem>>, vector<1x1x256xf32>
    %248 = vector.shape_cast %247 : vector<1x1x256xf32> to vector<1x256xf32>
    %249 = vector.broadcast %248 : vector<1x256xf32> to vector<8x256xf32>
    %250 = arith.addf %246, %249 : vector<8x256xf32>
    %cst_206 = arith.constant 0.000000e+00 : f32
    %251 = vector.broadcast %cst_206 : f32 to vector<8x256xf32>
    %252 = arith.maximumf %250, %251 : vector<8x256xf32>
    %253 = arith.truncf %252 : vector<8x256xf32> to vector<8x256xbf16>
    %c9_207 = arith.constant 9 : index
    %c0_208 = arith.constant 0 : index
    %c0_209 = arith.constant 0 : index
    %254 = vector.load %arg5[%c9_207, %c0_208, %c0_209] : memref<10x256x256xbf16, #tpu.memory_space<vmem>>, vector<1x256x256xbf16>
    %255 = vector.shape_cast %254 : vector<1x256x256xbf16> to vector<256x256xbf16>
    %cst_210 = arith.constant dense<0.000000e+00> : vector<8x256xf32>
    %256 = tpu.matmul %253, %255, %cst_210 {dimension_numbers = #tpu.dot_dimension_numbers<[1], [0], [0], [1], [0, 0, 1, 1], [], []>} : vector<8x256xbf16>, vector<256x256xbf16>, vector<8x256xf32> -> vector<8x256xf32>
    %c9_211 = arith.constant 9 : index
    %c0_212 = arith.constant 0 : index
    %c0_213 = arith.constant 0 : index
    %257 = vector.load %arg6[%c9_211, %c0_212, %c0_213] : memref<10x1x256xf32, #tpu.memory_space<vmem>>, vector<1x1x256xf32>
    %258 = vector.shape_cast %257 : vector<1x1x256xf32> to vector<1x256xf32>
    %259 = vector.broadcast %258 : vector<1x256xf32> to vector<8x256xf32>
    %260 = arith.addf %256, %259 : vector<8x256xf32>
    %261 = arith.addf %260, %236 : vector<8x256xf32>
    %cst_214 = arith.constant 0.000000e+00 : f32
    %262 = vector.broadcast %cst_214 : f32 to vector<8x256xf32>
    %263 = arith.maximumf %261, %262 : vector<8x256xf32>
    %264 = arith.truncf %263 : vector<8x256xf32> to vector<8x256xbf16>
    %c0_215 = arith.constant 0 : index
    %c0_216 = arith.constant 0 : index
    %265 = vector.load %arg7[%c0_215, %c0_216] : memref<256x256xbf16, #tpu.memory_space<vmem>>, vector<256x256xbf16>
    %cst_217 = arith.constant dense<0.000000e+00> : vector<8x256xf32>
    %266 = tpu.matmul %264, %265, %cst_217 {dimension_numbers = #tpu.dot_dimension_numbers<[1], [0], [0], [1], [0, 0, 1, 1], [], []>} : vector<8x256xbf16>, vector<256x256xbf16>, vector<8x256xf32> -> vector<8x256xf32>
    %c0_218 = arith.constant 0 : index
    %c0_219 = arith.constant 0 : index
    %267 = vector.load %arg8[%c0_218, %c0_219] : memref<1x256xf32, #tpu.memory_space<vmem>>, vector<1x256xf32>
    %268 = vector.broadcast %267 : vector<1x256xf32> to vector<8x256xf32>
    %269 = arith.addf %266, %268 : vector<8x256xf32>
    %cst_220 = arith.constant 0.000000e+00 : f32
    %270 = vector.broadcast %cst_220 : f32 to vector<8x256xf32>
    %271 = arith.maximumf %269, %270 : vector<8x256xf32>
    %272 = arith.truncf %271 : vector<8x256xf32> to vector<8x256xbf16>
    %c0_221 = arith.constant 0 : index
    %c0_222 = arith.constant 0 : index
    %273 = vector.load %arg9[%c0_221, %c0_222] : memref<256x256xbf16, #tpu.memory_space<vmem>>, vector<256x256xbf16>
    %cst_223 = arith.constant dense<0.000000e+00> : vector<8x256xf32>
    %274 = tpu.matmul %272, %273, %cst_223 {dimension_numbers = #tpu.dot_dimension_numbers<[1], [0], [0], [1], [0, 0, 1, 1], [], []>} : vector<8x256xbf16>, vector<256x256xbf16>, vector<8x256xf32> -> vector<8x256xf32>
    %c0_224 = arith.constant 0 : index
    %c0_225 = arith.constant 0 : index
    %275 = vector.load %arg10[%c0_224, %c0_225] : memref<1x256xf32, #tpu.memory_space<vmem>>, vector<1x256xf32>
    %276 = vector.broadcast %275 : vector<1x256xf32> to vector<8x256xf32>
    %277 = arith.addf %274, %276 : vector<8x256xf32>
    %cst_226 = arith.constant 0.000000e+00 : f32
    %278 = vector.broadcast %cst_226 : f32 to vector<8x256xf32>
    %279 = arith.maximumf %277, %278 : vector<8x256xf32>
    %280 = arith.truncf %279 : vector<8x256xf32> to vector<8x256xbf16>
    %c0_227 = arith.constant 0 : index
    %c0_228 = arith.constant 0 : index
    %281 = vector.load %arg11[%c0_227, %c0_228] : memref<256x128xbf16, #tpu.memory_space<vmem>>, vector<256x128xbf16>
    %cst_229 = arith.constant dense<0.000000e+00> : vector<8x128xf32>
    %282 = tpu.matmul %280, %281, %cst_229 {dimension_numbers = #tpu.dot_dimension_numbers<[1], [0], [0], [1], [0, 0, 1, 1], [], []>} : vector<8x256xbf16>, vector<256x128xbf16>, vector<8x128xf32> -> vector<8x128xf32>
    %c0_230 = arith.constant 0 : index
    %c0_231 = arith.constant 0 : index
    %283 = vector.load %arg12[%c0_230, %c0_231] : memref<1x128xf32, #tpu.memory_space<vmem>>, vector<1x128xf32>
    %284 = vector.broadcast %283 : vector<1x128xf32> to vector<8x128xf32>
    %285 = arith.addf %282, %284 : vector<8x128xf32>
    %cst_232 = arith.constant 0.000000e+00 : f32
    %286 = vector.broadcast %cst_232 : f32 to vector<8x128xf32>
    %287 = arith.cmpf oge, %285, %286 : vector<8x128xf32>
    %cst_233 = arith.constant 0.00999999977 : f32
    %288 = vector.broadcast %cst_233 : f32 to vector<8x128xf32>
    %289 = arith.mulf %288, %285 : vector<8x128xf32>
    %290 = arith.select %287, %285, %289 : vector<8x128xi1>, vector<8x128xf32>
    %c0_234 = arith.constant 0 : index
    %c0_235 = arith.constant 0 : index
    %291 = vector.load %arg13[%c0_234, %c0_235] : memref<8x128xf32, #tpu.memory_space<vmem>>, vector<8x128xf32>
    tpu.vector_store %arg13[%c0_234, %c0_235], %290 {strides = array<i32>} : memref<8x128xf32, #tpu.memory_space<vmem>>, vector<8x128xf32>,
    return
  }
  func.func @transform_0(%arg0: i32) -> (i32, i32, i32) {
    %c0_i32 = arith.constant 0 : i32
    %c0_i32_0 = arith.constant 0 : i32
    %c0_i32_1 = arith.constant 0 : i32
    return %c0_i32, %arg0, %c0_i32_0 : i32, i32, i32
  }
  func.func @transform_1(%arg0: i32) -> (i32, i32, i32) {
    %c0_i32 = arith.constant 0 : i32
    %c0_i32_0 = arith.constant 0 : i32
    %c0_i32_1 = arith.constant 0 : i32
    %c0_i32_2 = arith.constant 0 : i32
    return %c0_i32, %c0_i32_0, %c0_i32_1 : i32, i32, i32
  }
  func.func @transform_2(%arg0: i32) -> (i32, i32, i32) {
    %c0_i32 = arith.constant 0 : i32
    %c0_i32_0 = arith.constant 0 : i32
    %c0_i32_1 = arith.constant 0 : i32
    %c0_i32_2 = arith.constant 0 : i32
    return %c0_i32, %c0_i32_0, %c0_i32_1 : i32, i32, i32
  }
  func.func @transform_3(%arg0: i32) -> (i32, i32, i32) {
    %c0_i32 = arith.constant 0 : i32
    %c0_i32_0 = arith.constant 0 : i32
    %c0_i32_1 = arith.constant 0 : i32
    %c0_i32_2 = arith.constant 0 : i32
    return %c0_i32, %c0_i32_0, %c0_i32_1 : i32, i32, i32
  }
  func.func @transform_4(%arg0: i32) -> (i32, i32, i32) {
    %c0_i32 = arith.constant 0 : i32
    %c0_i32_0 = arith.constant 0 : i32
    %c0_i32_1 = arith.constant 0 : i32
    %c0_i32_2 = arith.constant 0 : i32
    return %c0_i32, %c0_i32_0, %c0_i32_1 : i32, i32, i32
  }
  func.func @transform_5(%arg0: i32) -> (i32, i32, i32) {
    %c0_i32 = arith.constant 0 : i32
    %c0_i32_0 = arith.constant 0 : i32
    %c0_i32_1 = arith.constant 0 : i32
    %c0_i32_2 = arith.constant 0 : i32
    return %c0_i32, %c0_i32_0, %c0_i32_1 : i32, i32, i32
  }
  func.func @transform_6(%arg0: i32) -> (i32, i32) {
    %c0_i32 = arith.constant 0 : i32
    %c0_i32_0 = arith.constant 0 : i32
    %c0_i32_1 = arith.constant 0 : i32
    return %c0_i32, %c0_i32_0 : i32, i32
  }
  func.func @transform_7(%arg0: i32) -> (i32, i32) {
    %c0_i32 = arith.constant 0 : i32
    %c0_i32_0 = arith.constant 0 : i32
    %c0_i32_1 = arith.constant 0 : i32
    return %c0_i32, %c0_i32_0 : i32, i32
  }
  func.func @transform_8(%arg0: i32) -> (i32, i32) {
    %c0_i32 = arith.constant 0 : i32
    %c0_i32_0 = arith.constant 0 : i32
    %c0_i32_1 = arith.constant 0 : i32
    return %c0_i32, %c0_i32_0 : i32, i32
  }
  func.func @transform_9(%arg0: i32) -> (i32, i32) {
    %c0_i32 = arith.constant 0 : i32
    %c0_i32_0 = arith.constant 0 : i32
    %c0_i32_1 = arith.constant 0 : i32
    return %c0_i32, %c0_i32_0 : i32, i32
  }
  func.func @transform_10(%arg0: i32) -> (i32, i32) {
    %c0_i32 = arith.constant 0 : i32
    %c0_i32_0 = arith.constant 0 : i32
    %c0_i32_1 = arith.constant 0 : i32
    return %c0_i32, %c0_i32_0 : i32, i32
  }
  func.func @transform_11(%arg0: i32) -> (i32, i32) {
    %c0_i32 = arith.constant 0 : i32
    %c0_i32_0 = arith.constant 0 : i32
    %c0_i32_1 = arith.constant 0 : i32
    return %c0_i32, %c0_i32_0 : i32, i32
  }
  func.func @transform_12(%arg0: i32) -> (i32, i32) {
    %c0_i32 = arith.constant 0 : i32
    %c0_i32_0 = arith.constant 0 : i32
    return %arg0, %c0_i32 : i32, i32
  }
}

</mosaic_0001>

<bundles_post_ra>
// kernel: ds_model_forward.1
= control target key start
LH: loop header
LB: loop body
LE: loop exit
PB: predicated region body
PF: predicated region fallthrough
CT: control target
= control target key end

     0   :  { %s14825_s1 = inlined_call_operand.vmem [shape: bf16[10,256,256], index: 1, kind: input, shape index: {}]   ;;  %s14826_s0 = inlined_call_operand.vmem [shape: bf16[10,8,256], index: 0, kind: input, shape index: {}]   ;;  %s14827_s4 = inlined_call_operand.vmem [shape: bf16[10,256,256], index: 4, kind: input, shape index: {}]   ;;  %s14828_s2 = inlined_call_operand.vmem [shape: bf16[10,256,256], index: 2, kind: input, shape index: {}]   ;;  %s14829_s3 = inlined_call_operand.vmem [shape: f32[10,1,256], index: 3, kind: input, shape index: {}]   ;;  %s14830_s5 = inlined_call_operand.vmem [shape: f32[10,1,256], index: 5, kind: input, shape index: {}]   ;;  %s14831_s6 = inlined_call_operand.vmem [shape: bf16[256,256], index: 6, kind: input, shape index: {}]   ;;  %s14832_s8 = inlined_call_operand.vmem [shape: bf16[256,256], index: 8, kind: input, shape index: {}]   ;;  %s14833_s10 = inlined_call_operand.vmem [shape: bf16[256,128], index: 10, kind: input, shape index: {}]   ;;  %s14834_s7 = inlined_call_operand.vmem [shape: f32[1,256], index: 7, kind: input, shape index: {}]   ;;  %s14835_s9 = inlined_call_operand.vmem [shape: f32[1,256], index: 9, kind: input, shape index: {}]   ;;  %s14836_s11 = inlined_call_operand.vmem [shape: f32[1,128], index: 11, kind: input, shape index: {}]   ;;  %s14837_s12 = inlined_call_operand.vmem [shape: f32[8,128], index: 12, kind: output, shape index: {}]  }
   0x1   :  { %v9912_v0 = vld [vmem:[%s14825_s1 + $0x4] ss:$8 sps:$4 sm:$0xff]   ;;  %v9914_v1 = vld [vmem:[%s14825_s1] ss:$8 sps:$4 sm:$0xff]   ;;  %v9915_v2 = vld [vmem:[%s14825_s1 + $0x14] ss:$8 sps:$4 sm:$0xff]  }
   0x2   :  { %254 = vmatprep.subr.bf16.mxu0 %v9912_v0  ;;  %v9917_v3 = vld [vmem:[%s14825_s1 + $0x10] ss:$8 sps:$4 sm:$0xff]   ;;  %v9918_v4 = vld [vmem:[%s14825_s1 + $0x24] ss:$8 sps:$4 sm:$0xff]   ;;  %v9920_v5 = vld [vmem:[%s14825_s1 + $0x20] ss:$8 sps:$4 sm:$0xff]  }
   0x3   :  { %255 = vmatpush1.bf16.msra.mxu0 %v9914_v1  ;;  %v9921_v6 = vld [vmem:[%s14825_s1 + $0x34] ss:$8 sps:$4 sm:$0xff]   ;;  %v9923_v7 = vld [vmem:[%s14825_s1 + $0x30] ss:$8 sps:$4 sm:$0xff]   ;;  %v9924_v8 = vld [vmem:[%s14825_s1 + $0x44] ss:$8 sps:$4 sm:$0xff]  }
   0x4   :  { %256 = vmatprep.subr.bf16.mxu0 %v9915_v2  ;;  %v9926_v9 = vld [vmem:[%s14825_s1 + $0x40] ss:$8 sps:$4 sm:$0xff]   ;;  %v9927_v10 = vld [vmem:[%s14825_s1 + $0x54] ss:$8 sps:$4 sm:$0xff]   ;;  %v9929_v11 = vld [vmem:[%s14825_s1 + $0x50] ss:$8 sps:$4 sm:$0xff]  }
   0x5   :  { %v9930_v12 = vld [vmem:[%s14825_s1 + $0x64] ss:$8 sps:$4 sm:$0xff]   ;;  %v9932_v13 = vld [vmem:[%s14825_s1 + $0x60] ss:$8 sps:$4 sm:$0xff]   ;;  %v9965_v18 = vld [vmem:[%s14827_s4 + $0x14] ss:$8 sps:$4 sm:$0xff]  }
   0x6   :  { %v11546_v14 = vld [vmem:[%s14826_s0] sm:$0xff]  ;;  %v9933_v19 = vld [vmem:[%s14825_s1 + $0x74] ss:$8 sps:$4 sm:$0xff]   ;;  %v9935_v20 = vld [vmem:[%s14825_s1 + $0x70] ss:$8 sps:$4 sm:$0xff]  }
   0x7   :  { %257 = vmatpush1.bf16.msra.mxu0 %v9917_v3  ;;  %v7971_v15 = vcombine.high %v11546_v14, %v11546_v14  ;;  %v9962_v16 = vld [vmem:[%s14827_s4 + $0x4] ss:$8 sps:$4 sm:$0xff]   ;;  %v9964_v17 = vld [vmem:[%s14827_s4] ss:$8 sps:$4 sm:$0xff]   ;;  %v9967_v21 = vld [vmem:[%s14827_s4 + $0x10] ss:$8 sps:$4 sm:$0xff]   ;;  %v7970_v57 = vcombine.low %v11546_v14, %v11546_v14 }
   0x8   :  { %258 = vmatprep.subr.bf16.mxu0 %v9918_v4  ;;  %503 = vmatprep.subr.bf16.mxu1 %v9962_v16  ;;  %v9968_v22 = vld [vmem:[%s14827_s4 + $0x24] ss:$8 sps:$4 sm:$0xff]   ;;  %v9938_v24 = vld [vmem:[%s14825_s1 + $0x80] ss:$8 sps:$4 sm:$0xff]   ;;  %v9971_v26 = vld [vmem:[%s14827_s4 + $0x34] ss:$8 sps:$4 sm:$0xff]  }
   0x9   :  { %286 = vmatprep.mubr.bf16.mxu0 %v7971_v15  ;;  %504 = vmatpush1.bf16.msra.mxu1 %v9964_v17  ;;  %v9936_v23 = vld [vmem:[%s14825_s1 + $0x84] ss:$8 sps:$4 sm:$0xff]   ;;  %v9970_v25 = vld [vmem:[%s14827_s4 + $0x20] ss:$8 sps:$4 sm:$0xff]   ;;  %v9939_v27 = vld [vmem:[%s14825_s1 + $0x94] ss:$8 sps:$4 sm:$0xff]  }
   0xa   :  { %505 = vmatprep.subr.bf16.mxu1 %v9965_v18  ;;  %v9941_v28 = vld [vmem:[%s14825_s1 + $0x90] ss:$8 sps:$4 sm:$0xff]   ;;  %v9974_v30 = vld [vmem:[%s14827_s4 + $0x44] ss:$8 sps:$4 sm:$0xff]   ;;  %v9944_v32 = vld [vmem:[%s14825_s1 + $0xa0] ss:$8 sps:$4 sm:$0xff]  }
   0xb   :  { %259 = vmatpush1.bf16.msra.mxu0 %v9920_v5  ;;  %v9973_v29 = vld [vmem:[%s14827_s4 + $0x30] ss:$8 sps:$4 sm:$0xff]   ;;  %v9942_v31 = vld [vmem:[%s14825_s1 + $0xa4] ss:$8 sps:$4 sm:$0xff]   ;;  %v9976_v33 = vld [vmem:[%s14827_s4 + $0x40] ss:$8 sps:$4 sm:$0xff]  }
   0xc   :  { %260 = vmatprep.subr.bf16.mxu0 %v9921_v6  ;;  %v9977_v34 = vld [vmem:[%s14827_s4 + $0x54] ss:$8 sps:$4 sm:$0xff]   ;;  %v9979_v36 = vld [vmem:[%s14827_s4 + $0x50] ss:$8 sps:$4 sm:$0xff]   ;;  %v9980_v38 = vld [vmem:[%s14827_s4 + $0x64] ss:$8 sps:$4 sm:$0xff]  }
   0xd   :  { %506 = vmatpush1.bf16.msra.mxu1 %v9967_v21  ;;  %v9945_v35 = vld [vmem:[%s14825_s1 + $0xb4] ss:$8 sps:$4 sm:$0xff]   ;;  %v9947_v37 = vld [vmem:[%s14825_s1 + $0xb0] ss:$8 sps:$4 sm:$0xff]   ;;  %v9948_v39 = vld [vmem:[%s14825_s1 + $0xc4] ss:$8 sps:$4 sm:$0xff]  }
   0xe   :  { %507 = vmatprep.subr.bf16.mxu1 %v9968_v22  ;;  %v9982_v40 = vld [vmem:[%s14827_s4 + $0x60] ss:$8 sps:$4 sm:$0xff]   ;;  %v9983_v42 = vld [vmem:[%s14827_s4 + $0x74] ss:$8 sps:$4 sm:$0xff]   ;;  %v9985_v44 = vld [vmem:[%s14827_s4 + $0x70] ss:$8 sps:$4 sm:$0xff]  }
   0xf   :  { %261 = vmatpush1.bf16.msra.mxu0 %v9923_v7  ;;  %v9950_v41 = vld [vmem:[%s14825_s1 + $0xc0] ss:$8 sps:$4 sm:$0xff]   ;;  %v9951_v43 = vld [vmem:[%s14825_s1 + $0xd4] ss:$8 sps:$4 sm:$0xff]   ;;  %v9953_v45 = vld [vmem:[%s14825_s1 + $0xd0] ss:$8 sps:$4 sm:$0xff]  }
  0x10   :  { %262 = vmatprep.subr.bf16.mxu0 %v9924_v8  ;;  %v9986_v46 = vld [vmem:[%s14827_s4 + $0x84] ss:$8 sps:$4 sm:$0xff]   ;;  %v9988_v48 = vld [vmem:[%s14827_s4 + $0x80] ss:$8 sps:$4 sm:$0xff]   ;;  %v9989_v50 = vld [vmem:[%s14827_s4 + $0x94] ss:$8 sps:$4 sm:$0xff]  }
  0x11   :  { %508 = vmatpush1.bf16.msra.mxu1 %v9970_v25  ;;  %v9954_v47 = vld [vmem:[%s14825_s1 + $0xe4] ss:$8 sps:$4 sm:$0xff]   ;;  %v9956_v49 = vld [vmem:[%s14825_s1 + $0xe0] ss:$8 sps:$4 sm:$0xff]   ;;  %v9957_v51 = vld [vmem:[%s14825_s1 + $0xf4] ss:$8 sps:$4 sm:$0xff]  }
  0x12   :  { %509 = vmatprep.subr.bf16.mxu1 %v9971_v26  ;;  %v9991_v52 = vld [vmem:[%s14827_s4 + $0x90] ss:$8 sps:$4 sm:$0xff]   ;;  %v9992_v54 = vld [vmem:[%s14827_s4 + $0xa4] ss:$8 sps:$4 sm:$0xff]   ;;  %v9994_v55 = vld [vmem:[%s14827_s4 + $0xa0] ss:$8 sps:$4 sm:$0xff]  }
  0x13   :  { %263 = vmatpush1.bf16.msra.mxu0 %v9926_v9  ;;  %v9959_v53 = vld [vmem:[%s14825_s1 + $0xf0] ss:$8 sps:$4 sm:$0xff]   ;;  %v9995_v56 = vld [vmem:[%s14827_s4 + $0xb4] ss:$8 sps:$4 sm:$0xff]   ;;  %v9998_v59 = vld [vmem:[%s14827_s4 + $0xc4] ss:$8 sps:$4 sm:$0xff]  }
  0x14   :  { %264 = vmatprep.subr.bf16.mxu0 %v9927_v10  ;;  %v9997_v58 = vld [vmem:[%s14827_s4 + $0xb0] ss:$8 sps:$4 sm:$0xff]   ;;  %v10000_v60 = vld [vmem:[%s14827_s4 + $0xc0] ss:$8 sps:$4 sm:$0xff]   ;;  %v10001_v61 = vld [vmem:[%s14827_s4 + $0xd4] ss:$8 sps:$4 sm:$0xff]  }
  0x15   :  { %510 = vmatpush1.bf16.msra.mxu1 %v9973_v29  ;;  %v10003_v62 = vld [vmem:[%s14827_s4 + $0xd0] ss:$8 sps:$4 sm:$0xff]   ;;  %v10004_v63 = vld [vmem:[%s14827_s4 + $0xe4] ss:$8 sps:$4 sm:$0xff]   ;;  %v10006_v0 = vld [vmem:[%s14827_s4 + $0xe0] ss:$8 sps:$4 sm:$0xff]  }
  0x16   :  { %511 = vmatprep.subr.bf16.mxu1 %v9974_v30  ;;  %v10007_v1 = vld [vmem:[%s14827_s4 + $0xf4] ss:$8 sps:$4 sm:$0xff]   ;;  %v10009_v2 = vld [vmem:[%s14827_s4 + $0xf0] ss:$8 sps:$4 sm:$0xff]   ;;  %v10012_v3 = vld [vmem:[%s14825_s1 + $0x104] ss:$8 sps:$4 sm:$0xff]  }
  0x17   :  { %265 = vmatpush1.bf16.msra.mxu0 %v9929_v11  ;;  %v10013_v4 = vld [vmem:[%s14828_s2 + $0x100] ss:$8 sps:$4 sm:$0xff]   ;;  %v10015_v5 = vld [vmem:[%s14828_s2 + $0x104] ss:$8 sps:$4 sm:$0xff]   ;;  %v10021_v6 = vld [vmem:[%s14828_s2 + $0x114] ss:$8 sps:$4 sm:$0xff]  }
  0x18   :  { %266 = vmatprep.subr.bf16.mxu0 %v9930_v12  ;;  %v10019_v7 = vld [vmem:[%s14828_s2 + $0x110] ss:$8 sps:$4 sm:$0xff]   ;;  %v10027_v8 = vld [vmem:[%s14828_s2 + $0x124] ss:$8 sps:$4 sm:$0xff]   ;;  %v10025_v9 = vld [vmem:[%s14828_s2 + $0x120] ss:$8 sps:$4 sm:$0xff]  }
  0x19   :  { %512 = vmatpush1.bf16.msra.mxu1 %v9976_v33  ;;  %v10033_v10 = vld [vmem:[%s14828_s2 + $0x134] ss:$8 sps:$4 sm:$0xff]   ;;  %v10031_v11 = vld [vmem:[%s14828_s2 + $0x130] ss:$8 sps:$4 sm:$0xff]   ;;  %v10039_v12 = vld [vmem:[%s14828_s2 + $0x144] ss:$8 sps:$4 sm:$0xff]  }
  0x1a   :  { %513 = vmatprep.subr.bf16.mxu1 %v9977_v34  ;;  %v10045_v14 = vld [vmem:[%s14828_s2 + $0x154] ss:$8 sps:$4 sm:$0xff]   ;;  %v10043_v15 = vld [vmem:[%s14828_s2 + $0x150] ss:$8 sps:$4 sm:$0xff]   ;;  %v10051_v16 = vld [vmem:[%s14828_s2 + $0x164] ss:$8 sps:$4 sm:$0xff]  }
  0x1b   :  { %267 = vmatpush1.bf16.msra.mxu0 %v9932_v13  ;;  %v10037_v13 = vld [vmem:[%s14828_s2 + $0x140] ss:$8 sps:$4 sm:$0xff]   ;;  %v10057_v18 = vld [vmem:[%s14828_s2 + $0x174] ss:$8 sps:$4 sm:$0xff]  }
  0x1c   :  { %268 = vmatprep.subr.bf16.mxu0 %v9933_v19  ;;  %v10049_v17 = vld [vmem:[%s14828_s2 + $0x160] ss:$8 sps:$4 sm:$0xff]   ;;  %v10055_v19 = vld [vmem:[%s14828_s2 + $0x170] ss:$8 sps:$4 sm:$0xff]   ;;  %v10069_v22 = vld [vmem:[%s14828_s2 + $0x194] ss:$8 sps:$4 sm:$0xff]  }
  0x1d   :  { %514 = vmatpush1.bf16.msra.mxu1 %v9979_v36  ;;  %v10061_v21 = vld [vmem:[%s14828_s2 + $0x180] ss:$8 sps:$4 sm:$0xff]   ;;  %v10081_v26 = vld [vmem:[%s14828_s2 + $0x1b4] ss:$8 sps:$4 sm:$0xff]  }
  0x1e   :  { %515 = vmatprep.subr.bf16.mxu1 %v9980_v38  ;;  %v10073_v25 = vld [vmem:[%s14828_s2 + $0x1a0] ss:$8 sps:$4 sm:$0xff]   ;;  %v10093_v30 = vld [vmem:[%s14828_s2 + $0x1d4] ss:$8 sps:$4 sm:$0xff]  }
  0x1f   :  { %269 = vmatpush1.bf16.msra.mxu0 %v9935_v20  ;;  %v10063_v20 = vld [vmem:[%s14828_s2 + $0x184] ss:$8 sps:$4 sm:$0xff]   ;;  %v10085_v29 = vld [vmem:[%s14828_s2 + $0x1c0] ss:$8 sps:$4 sm:$0xff]  }
  0x20   :  { %270 = vmatprep.subr.bf16.mxu0 %v9936_v23  ;;  %v10067_v23 = vld [vmem:[%s14828_s2 + $0x190] ss:$8 sps:$4 sm:$0xff]   ;;  %v75_v34 = vld [vmem:[%s14829_s3] sm:$0x3] }
  0x21   :  { %516 = vmatpush1.bf16.msra.mxu1 %v9982_v40 }
  0x22   :  { %517 = vmatprep.subr.bf16.mxu1 %v9983_v42 }
  0x23   :  { %271 = vmatpush1.bf16.msra.mxu0 %v9938_v24  ;;  %v10075_v24 = vld [vmem:[%s14828_s2 + $0x1a4] ss:$8 sps:$4 sm:$0xff]  }
  0x24   :  { %272 = vmatprep.subr.bf16.mxu0 %v9939_v27  ;;  %v10079_v27 = vld [vmem:[%s14828_s2 + $0x1b0] ss:$8 sps:$4 sm:$0xff]  }
  0x25   :  { %518 = vmatpush1.bf16.msra.mxu1 %v9985_v44 }
  0x26   :  { %519 = vmatprep.subr.bf16.mxu1 %v9986_v46 }
  0x27   :  { %273 = vmatpush1.bf16.msra.mxu0 %v9941_v28  ;;  %v10087_v28 = vld [vmem:[%s14828_s2 + $0x1c4] ss:$8 sps:$4 sm:$0xff]  }
  0x28   :  { %274 = vmatprep.subr.bf16.mxu0 %v9942_v31  ;;  %v10091_v31 = vld [vmem:[%s14828_s2 + $0x1d0] ss:$8 sps:$4 sm:$0xff]  }
  0x29   :  { %520 = vmatpush1.bf16.msra.mxu1 %v9988_v48  ;;  %v10018_v48 = vld [vmem:[%s14825_s1 + $0x114] ss:$8 sps:$4 sm:$0xff]  }
  0x2a   :  { %521 = vmatprep.subr.bf16.mxu1 %v9989_v50 }
  0x2b   :  { %275 = vmatpush1.bf16.msra.mxu0 %v9944_v32  ;;  %v77_v32 = vlaneseq }
  0x2c   :  { %276 = vmatprep.subr.bf16.mxu0 %v9945_v35 }
  0x2d   :  { %522 = vmatpush1.bf16.msra.mxu1 %v9991_v52  ;;  %v78_v33 = vshrl.u32 %v77_v32, 7  ;;  %v10024_v52 = vld [vmem:[%s14825_s1 + $0x124] ss:$8 sps:$4 sm:$0xff]  }
  0x2e   :  { %523 = vmatprep.subr.bf16.mxu1 %v9992_v54  ;;  %v10030_v54 = vld [vmem:[%s14825_s1 + $0x134] ss:$8 sps:$4 sm:$0xff]  }
  0x2f   :  { %277 = vmatpush1.bf16.msra.mxu0 %v9947_v37  ;;  %v11792_v35 = vsub.s32 0, %v78_v33  ;;  %v11794_v36 = vsub.s32 1, %v78_v33 }
  0x30   :  { %278 = vmatprep.subr.bf16.mxu0 %v9948_v39 }
  0x31   :  { %524 = vmatpush1.bf16.msra.mxu1 %v9994_v55  ;;  %v80_v37 = vrot.slane %v75_v34, %v11792_v35  ;;  %v84_v38 = vrot.slane %v75_v34, %v11794_v36  ;;  %v10028_v55 = vld [vmem:[%s14825_s1 + $0x130] ss:$8 sps:$4 sm:$0xff]  }
  0x32   :  { %525 = vmatprep.subr.bf16.mxu1 %v9995_v56  ;;  %v10036_v56 = vld [vmem:[%s14825_s1 + $0x144] ss:$8 sps:$4 sm:$0xff]  }
  0x33   :  { %279 = vmatpush1.bf16.msra.mxu0 %v9950_v41 }
  0x34   :  { %280 = vmatprep.subr.bf16.mxu0 %v9951_v43 }
  0x35   :  { %526 = vmatpush1.bf16.msra.mxu1 %v9997_v58  ;;  %v10042_v58 = vld [vmem:[%s14825_s1 + $0x154] ss:$8 sps:$4 sm:$0xff]  }
  0x36   :  { %527 = vmatprep.subr.bf16.mxu1 %v9998_v59  ;;  %v10040_v59 = vld [vmem:[%s14825_s1 + $0x150] ss:$8 sps:$4 sm:$0xff]  }
  0x37   :  { %281 = vmatpush1.bf16.msra.mxu0 %v9953_v45 }
  0x38   :  { %282 = vmatprep.subr.bf16.mxu0 %v9954_v47  ;;  %v10010_v47 = vld [vmem:[%s14825_s1 + $0x100] ss:$8 sps:$4 sm:$0xff]  }
  0x39   :  { %528 = vmatpush1.bf16.msra.mxu1 %v10000_v60  ;;  %v10048_v60 = vld [vmem:[%s14825_s1 + $0x164] ss:$8 sps:$4 sm:$0xff]  }
  0x3a   :  { %529 = vmatprep.subr.bf16.mxu1 %v10001_v61  ;;  %v10046_v61 = vld [vmem:[%s14825_s1 + $0x160] ss:$8 sps:$4 sm:$0xff]  }
  0x3b   :  { %283 = vmatpush1.bf16.msra.mxu0 %v9956_v49 }
  0x3c   :  { %284 = vmatprep.subr.bf16.mxu0 %v9957_v51  ;;  %v10016_v51 = vld [vmem:[%s14825_s1 + $0x110] ss:$8 sps:$4 sm:$0xff]  }
  0x3d   :  { %530 = vmatpush1.bf16.msra.mxu1 %v10003_v62  ;;  %v10054_v62 = vld [vmem:[%s14825_s1 + $0x174] ss:$8 sps:$4 sm:$0xff]  }
  0x3e   :  { %531 = vmatprep.subr.bf16.mxu1 %v10004_v63  ;;  %v10052_v63 = vld [vmem:[%s14825_s1 + $0x170] ss:$8 sps:$4 sm:$0xff]  }
  0x3f   :  { %285 = vmatpush1.bf16.msra.mxu0 %v9959_v53  ;;  %v10022_v53 = vld [vmem:[%s14825_s1 + $0x120] ss:$8 sps:$4 sm:$0xff]  }
  0x40   :  { %776 = vmatprep.subr.bf16.mxu0 %v10015_v5  ;;  %v10070_v5 = vld [vmem:[%s14825_s1 + $0x1a0] ss:$8 sps:$4 sm:$0xff]  }
  0x41   :  { %532 = vmatpush1.bf16.msra.mxu1 %v10006_v0  ;;  %v10060_v0 = vld [vmem:[%s14825_s1 + $0x184] ss:$8 sps:$4 sm:$0xff]  }
  0x42   :  { %287 = vmatmul.mubr.bf16.vlgmr.msra.gmra.mrb[0].mxu0 %v7970_v57  ;;  %533 = vmatprep.subr.bf16.mxu1 %v10007_v1  ;;  %v10034_v57 = vld [vmem:[%s14825_s1 + $0x140] ss:$8 sps:$4 sm:$0xff]  }
  0x43   :  { %777 = vmatpush1.bf16.msra.mxu0 %v10013_v4  ;;  %v10058_v1 = vld [vmem:[%s14825_s1 + $0x180] ss:$8 sps:$4 sm:$0xff]   ;;  %v10072_v4 = vld [vmem:[%s14825_s1 + $0x1a4] ss:$8 sps:$4 sm:$0xff]  }
  0x44   :  { %778 = vmatprep.subr.bf16.mxu0 %v10021_v6  ;;  %v10078_v6 = vld [vmem:[%s14825_s1 + $0x1b4] ss:$8 sps:$4 sm:$0xff]  }
  0x45   :  { %534 = vmatpush1.bf16.msra.mxu1 %v10009_v2  ;;  %v10066_v2 = vld [vmem:[%s14825_s1 + $0x194] ss:$8 sps:$4 sm:$0xff]  }
  0x46   :  { %984 = vmatprep.subr.bf16.mxu1 %v10012_v3  ;;  %v10064_v3 = vld [vmem:[%s14825_s1 + $0x190] ss:$8 sps:$4 sm:$0xff]  }
  0x47   :  { %779 = vmatpush1.bf16.msra.mxu0 %v10019_v7  ;;  %v10076_v7 = vld [vmem:[%s14825_s1 + $0x1b0] ss:$8 sps:$4 sm:$0xff]  }
  0x48   :  { %780 = vmatprep.subr.bf16.mxu0 %v10027_v8  ;;  %v10084_v8 = vld [vmem:[%s14825_s1 + $0x1c4] ss:$8 sps:$4 sm:$0xff]  }
  0x4b   :  { %781 = vmatpush1.bf16.msra.mxu0 %v10025_v9  ;;  %v10082_v9 = vld [vmem:[%s14825_s1 + $0x1c0] ss:$8 sps:$4 sm:$0xff]  }
  0x4c   :  { %782 = vmatprep.subr.bf16.mxu0 %v10033_v10  ;;  %v10090_v10 = vld [vmem:[%s14825_s1 + $0x1d4] ss:$8 sps:$4 sm:$0xff]  }
  0x4f   :  { %783 = vmatpush1.bf16.msra.mxu0 %v10031_v11  ;;  %v10088_v11 = vld [vmem:[%s14825_s1 + $0x1d0] ss:$8 sps:$4 sm:$0xff]  }
  0x50   :  { %784 = vmatprep.subr.bf16.mxu0 %v10039_v12  ;;  %v10096_v12 = vld [vmem:[%s14825_s1 + $0x1e4] ss:$8 sps:$4 sm:$0xff]  }
  0x53   :  { %785 = vmatpush1.bf16.msra.mxu0 %v10037_v13  ;;  %v10094_v13 = vld [vmem:[%s14825_s1 + $0x1e0] ss:$8 sps:$4 sm:$0xff]  }
  0x54   :  { %786 = vmatprep.subr.bf16.mxu0 %v10045_v14  ;;  %v10099_v14 = vld [vmem:[%s14828_s2 + $0x1e4] ss:$8 sps:$4 sm:$0xff]  }
  0x57   :  { %787 = vmatpush1.bf16.msra.mxu0 %v10043_v15  ;;  %v10097_v15 = vld [vmem:[%s14828_s2 + $0x1e0] ss:$8 sps:$4 sm:$0xff]  }
  0x58   :  { %788 = vmatprep.subr.bf16.mxu0 %v10051_v16  ;;  %v10102_v16 = vld [vmem:[%s14825_s1 + $0x1f4] ss:$8 sps:$4 sm:$0xff]  }
  0x5b   :  { %789 = vmatpush1.bf16.msra.mxu0 %v10049_v17  ;;  %v10100_v17 = vld [vmem:[%s14825_s1 + $0x1f0] ss:$8 sps:$4 sm:$0xff]  }
  0x5c   :  { %790 = vmatprep.subr.bf16.mxu0 %v10057_v18  ;;  %v8036_v18 = vld [vmem:[%s14826_s0 + $0x8] sm:$0xff] }
  0x5f   :  { %791 = vmatpush1.bf16.msra.mxu0 %v10055_v19  ;;  %v10105_v19 = vld [vmem:[%s14828_s2 + $0x1f4] ss:$8 sps:$4 sm:$0xff]  }
  0x60   :  { %792 = vmatprep.subr.bf16.mxu0 %v10063_v20  ;;  %v8134_v20 = vcombine.high %v8036_v18, %v8036_v18 }
  0x63   :  { %793 = vmatpush1.bf16.msra.mxu0 %v10061_v21  ;;  %v10103_v21 = vld [vmem:[%s14828_s2 + $0x1f0] ss:$8 sps:$4 sm:$0xff]  }
  0x64   :  { %794 = vmatprep.subr.bf16.mxu0 %v10069_v22  ;;  %v8133_v22 = vcombine.low %v8036_v18, %v8036_v18  ;;  %v10179_v18 = vld [vmem:[%s14828_s2 + $0x234] ss:$8 sps:$4 sm:$0xff]  }
  0x67   :  { %795 = vmatpush1.bf16.msra.mxu0 %v10067_v23  ;;  %v10110_v23 = vld [vmem:[%s14827_s4 + $0x104] ss:$8 sps:$4 sm:$0xff]  }
  0x68   :  { %796 = vmatprep.subr.bf16.mxu0 %v10075_v24  ;;  %v331_v24 = vld [vmem:[%s14830_s5] sm:$0x3] }
  0x6b   :  { %797 = vmatpush1.bf16.msra.mxu0 %v10073_v25  ;;  %v336_v25 = vrot.slane %v331_v24, %v11792_v35 }
  0x6c   :  { %798 = vmatprep.subr.bf16.mxu0 %v10081_v26  ;;  %v340_v26 = vrot.slane %v331_v24, %v11794_v36  ;;  %v10197_v24 = vld [vmem:[%s14828_s2 + $0x264] ss:$8 sps:$4 sm:$0xff]  }
  0x6f   :  { %799 = vmatpush1.bf16.msra.mxu0 %v10079_v27 }
  0x70   :  { %800 = vmatprep.subr.bf16.mxu0 %v10087_v28 }
  0x73   :  { %801 = vmatpush1.bf16.msra.mxu0 %v10085_v29 }
  0x74   :  { %802 = vmatprep.subr.bf16.mxu0 %v10093_v30 }
  0x77   :  { %803 = vmatpush1.bf16.msra.mxu0 %v10091_v31 }
  0x78   :  { %804 = vmatprep.subr.bf16.mxu0 %v10099_v14  ;;  %v10167_v14 = vld [vmem:[%s14828_s2 + $0x214] ss:$8 sps:$4 sm:$0xff]  }
  0x7b   :  { %805 = vmatpush1.bf16.msra.mxu0 %v10097_v15  ;;  %v10171_v15 = vld [vmem:[%s14828_s2 + $0x220] ss:$8 sps:$4 sm:$0xff]  }
  0x7c   :  { %806 = vmatprep.subr.bf16.mxu0 %v10105_v19  ;;  %v10183_v19 = vld [vmem:[%s14828_s2 + $0x240] ss:$8 sps:$4 sm:$0xff]  }
  0x7f   :  { %807 = vmatpush1.bf16.msra.mxu0 %v10103_v21  ;;  %v10189_v21 = vld [vmem:[%s14828_s2 + $0x250] ss:$8 sps:$4 sm:$0xff]  }
  0x80   :  { %1250 = vmatprep.subr.bf16.mxu0 %v10110_v23  ;;  %v10195_v23 = vld [vmem:[%s14828_s2 + $0x260] ss:$8 sps:$4 sm:$0xff]  }
 0x115   :  { %v288_v39 = vpop.f32.mrb[0].mxu0 }
 0x116   :  { %v289_v40 = vadd.f32 %v288_v39, %v80_v37  ;;  %v290_v41 = vpop.f32.mrb[1].mxu0 }
 0x117   :  { %v291_v42 = vadd.f32 %v290_v41, %v84_v38  ;;  %v292_v43 = vpop.f32.mrb[2].mxu0  ;;  %v10108_v38 = vld [vmem:[%s14827_s4 + $0x100] ss:$8 sps:$4 sm:$0xff]   ;;  %v10111_v41 = vld [vmem:[%s14827_s4 + $0x110] ss:$8 sps:$4 sm:$0xff]  }
 0x118   :  { %v295_v44 = vmax.f32 %v289_v40, 0.0  ;;  %v293_v45 = vpop.f32.mrb[3].mxu0  ;;  %v10113_v40 = vld [vmem:[%s14827_s4 + $0x114] ss:$8 sps:$4 sm:$0xff]   ;;  %v10114_v43 = vld [vmem:[%s14827_s4 + $0x120] ss:$8 sps:$4 sm:$0xff]  }
 0x119   :  { %v296_v46 = vmax.f32 %v291_v42, 0.0  ;;  %v10116_v42 = vld [vmem:[%s14827_s4 + $0x124] ss:$8 sps:$4 sm:$0xff]   ;;  %v10117_v45 = vld [vmem:[%s14827_s4 + $0x130] ss:$8 sps:$4 sm:$0xff]  }
 0x11a   :  { %v297_v50 = vpack.c.bf16 %v295_v44, %v295_v44  ;;  %v10119_v44 = vld [vmem:[%s14827_s4 + $0x134] ss:$8 sps:$4 sm:$0xff]  }
 0x11b   :  { %v298_v49 = vpack.c.bf16 %v296_v46, %v296_v46  ;;  %v10122_v46 = vld [vmem:[%s14827_s4 + $0x144] ss:$8 sps:$4 sm:$0xff]  }
 0x11d   :  { %535 = vmatprep.mubr.bf16.mxu1 %v298_v49  ;;  %v10123_v49 = vld [vmem:[%s14827_s4 + $0x150] ss:$8 sps:$4 sm:$0xff]  }
 0x11e   :  { %536 = vmatmul.mubr.bf16.vlgmr.msra.gmra.mrb[0].mxu1 %v297_v50  ;;  %v10128_v50 = vld [vmem:[%s14827_s4 + $0x164] ss:$8 sps:$4 sm:$0xff]  }
 0x11f   :  { %985 = vmatpush1.bf16.msra.mxu1 %v10010_v47  ;;  %1016 = vmatprep.mubr.bf16.mxu1 %v8134_v20  ;;  %v10120_v47 = vld [vmem:[%s14827_s4 + $0x140] ss:$8 sps:$4 sm:$0xff]   ;;  %v10185_v20 = vld [vmem:[%s14828_s2 + $0x244] ss:$8 sps:$4 sm:$0xff]  }
 0x120   :  { %986 = vmatprep.subr.bf16.mxu1 %v10018_v48  ;;  %v10125_v48 = vld [vmem:[%s14827_s4 + $0x154] ss:$8 sps:$4 sm:$0xff]  }
 0x123   :  { %987 = vmatpush1.bf16.msra.mxu1 %v10016_v51  ;;  %v10126_v51 = vld [vmem:[%s14827_s4 + $0x160] ss:$8 sps:$4 sm:$0xff]  }
 0x124   :  { %988 = vmatprep.subr.bf16.mxu1 %v10024_v52  ;;  %v10131_v52 = vld [vmem:[%s14827_s4 + $0x174] ss:$8 sps:$4 sm:$0xff]  }
 0x127   :  { %989 = vmatpush1.bf16.msra.mxu1 %v10022_v53  ;;  %v10129_v53 = vld [vmem:[%s14827_s4 + $0x170] ss:$8 sps:$4 sm:$0xff]  }
 0x128   :  { %990 = vmatprep.subr.bf16.mxu1 %v10030_v54  ;;  %v10134_v54 = vld [vmem:[%s14827_s4 + $0x184] ss:$8 sps:$4 sm:$0xff]  }
 0x12b   :  { %991 = vmatpush1.bf16.msra.mxu1 %v10028_v55  ;;  %v10132_v55 = vld [vmem:[%s14827_s4 + $0x180] ss:$8 sps:$4 sm:$0xff]  }
 0x12c   :  { %992 = vmatprep.subr.bf16.mxu1 %v10036_v56  ;;  %v10137_v56 = vld [vmem:[%s14827_s4 + $0x194] ss:$8 sps:$4 sm:$0xff]  }
 0x12f   :  { %993 = vmatpush1.bf16.msra.mxu1 %v10034_v57  ;;  %v10135_v57 = vld [vmem:[%s14827_s4 + $0x190] ss:$8 sps:$4 sm:$0xff]  }
 0x130   :  { %994 = vmatprep.subr.bf16.mxu1 %v10042_v58  ;;  %v10140_v58 = vld [vmem:[%s14827_s4 + $0x1a4] ss:$8 sps:$4 sm:$0xff]  }
 0x133   :  { %995 = vmatpush1.bf16.msra.mxu1 %v10040_v59  ;;  %v10138_v59 = vld [vmem:[%s14827_s4 + $0x1a0] ss:$8 sps:$4 sm:$0xff]  }
 0x134   :  { %996 = vmatprep.subr.bf16.mxu1 %v10048_v60  ;;  %v10143_v60 = vld [vmem:[%s14827_s4 + $0x1b4] ss:$8 sps:$4 sm:$0xff]  }
 0x137   :  { %997 = vmatpush1.bf16.msra.mxu1 %v10046_v61  ;;  %v10141_v61 = vld [vmem:[%s14827_s4 + $0x1b0] ss:$8 sps:$4 sm:$0xff]  }
 0x138   :  { %998 = vmatprep.subr.bf16.mxu1 %v10054_v62  ;;  %v10146_v62 = vld [vmem:[%s14827_s4 + $0x1c4] ss:$8 sps:$4 sm:$0xff]  }
 0x13b   :  { %999 = vmatpush1.bf16.msra.mxu1 %v10052_v63  ;;  %v10144_v63 = vld [vmem:[%s14827_s4 + $0x1c0] ss:$8 sps:$4 sm:$0xff]  }
 0x13c   :  { %1000 = vmatprep.subr.bf16.mxu1 %v10060_v0  ;;  %v10149_v0 = vld [vmem:[%s14827_s4 + $0x1d4] ss:$8 sps:$4 sm:$0xff]  }
 0x13f   :  { %1001 = vmatpush1.bf16.msra.mxu1 %v10058_v1  ;;  %v10147_v1 = vld [vmem:[%s14827_s4 + $0x1d0] ss:$8 sps:$4 sm:$0xff]  }
 0x140   :  { %1002 = vmatprep.subr.bf16.mxu1 %v10066_v2 }
 0x143   :  { %1003 = vmatpush1.bf16.msra.mxu1 %v10064_v3 }
 0x144   :  { %1004 = vmatprep.subr.bf16.mxu1 %v10072_v4 }
 0x147   :  { %1005 = vmatpush1.bf16.msra.mxu1 %v10070_v5 }
 0x148   :  { %1006 = vmatprep.subr.bf16.mxu1 %v10078_v6  ;;  %v10152_v6 = vld [vmem:[%s14827_s4 + $0x1e4] ss:$8 sps:$4 sm:$0xff]  }
 0x14b   :  { %1007 = vmatpush1.bf16.msra.mxu1 %v10076_v7  ;;  %v10150_v7 = vld [vmem:[%s14827_s4 + $0x1e0] ss:$8 sps:$4 sm:$0xff]  }
 0x14c   :  { %1008 = vmatprep.subr.bf16.mxu1 %v10084_v8  ;;  %v10155_v8 = vld [vmem:[%s14827_s4 + $0x1f4] ss:$8 sps:$4 sm:$0xff]  }
 0x14f   :  { %1009 = vmatpush1.bf16.msra.mxu1 %v10082_v9  ;;  %v10153_v9 = vld [vmem:[%s14827_s4 + $0x1f0] ss:$8 sps:$4 sm:$0xff]  }
 0x150   :  { %1010 = vmatprep.subr.bf16.mxu1 %v10090_v10  ;;  %v10158_v10 = vld [vmem:[%s14825_s1 + $0x204] ss:$8 sps:$4 sm:$0xff]  }
 0x153   :  { %1011 = vmatpush1.bf16.msra.mxu1 %v10088_v11  ;;  %v10159_v11 = vld [vmem:[%s14828_s2 + $0x200] ss:$8 sps:$4 sm:$0xff]  }
 0x154   :  { %1012 = vmatprep.subr.bf16.mxu1 %v10096_v12  ;;  %v10161_v12 = vld [vmem:[%s14828_s2 + $0x204] ss:$8 sps:$4 sm:$0xff]  }
 0x157   :  { %1013 = vmatpush1.bf16.msra.mxu1 %v10094_v13  ;;  %v10165_v13 = vld [vmem:[%s14828_s2 + $0x210] ss:$8 sps:$4 sm:$0xff]  }
 0x158   :  { %1014 = vmatprep.subr.bf16.mxu1 %v10102_v16  ;;  %v10173_v16 = vld [vmem:[%s14828_s2 + $0x224] ss:$8 sps:$4 sm:$0xff]  }
 0x15b   :  { %1015 = vmatpush1.bf16.msra.mxu1 %v10100_v17  ;;  %v10177_v17 = vld [vmem:[%s14828_s2 + $0x230] ss:$8 sps:$4 sm:$0xff]  }
 0x15c   :  { %1525 = vmatprep.subr.bf16.mxu1 %v10161_v12  ;;  %v10210_v12 = vld [vmem:[%s14825_s1 + $0x290] ss:$8 sps:$4 sm:$0xff]  }
 0x15e   :  { %1017 = vmatmul.mubr.bf16.vlgmr.msra.gmra.mrb[4].mxu1 %v8133_v22  ;;  %v10191_v22 = vld [vmem:[%s14828_s2 + $0x254] ss:$8 sps:$4 sm:$0xff]  }
 0x15f   :  { %1526 = vmatpush1.bf16.msra.mxu1 %v10159_v11  ;;  %v10212_v11 = vld [vmem:[%s14825_s1 + $0x294] ss:$8 sps:$4 sm:$0xff]  }
 0x160   :  { %1527 = vmatprep.subr.bf16.mxu1 %v10167_v14  ;;  %v10216_v14 = vld [vmem:[%s14825_s1 + $0x2a0] ss:$8 sps:$4 sm:$0xff]  }
 0x163   :  { %1528 = vmatpush1.bf16.msra.mxu1 %v10165_v13  ;;  %v10218_v13 = vld [vmem:[%s14825_s1 + $0x2a4] ss:$8 sps:$4 sm:$0xff]  }
 0x164   :  { %1529 = vmatprep.subr.bf16.mxu1 %v10173_v16  ;;  %v10222_v16 = vld [vmem:[%s14825_s1 + $0x2b0] ss:$8 sps:$4 sm:$0xff]  }
 0x167   :  { %1530 = vmatpush1.bf16.msra.mxu1 %v10171_v15  ;;  %v10224_v15 = vld [vmem:[%s14825_s1 + $0x2b4] ss:$8 sps:$4 sm:$0xff]  }
 0x168   :  { %1531 = vmatprep.subr.bf16.mxu1 %v10179_v18  ;;  %v10228_v18 = vld [vmem:[%s14825_s1 + $0x2c0] ss:$8 sps:$4 sm:$0xff]  }
 0x16b   :  { %1532 = vmatpush1.bf16.msra.mxu1 %v10177_v17  ;;  %v10230_v17 = vld [vmem:[%s14825_s1 + $0x2c4] ss:$8 sps:$4 sm:$0xff]  }
 0x16c   :  { %1533 = vmatprep.subr.bf16.mxu1 %v10185_v20  ;;  %v10234_v20 = vld [vmem:[%s14825_s1 + $0x2d0] ss:$8 sps:$4 sm:$0xff]  }
 0x16f   :  { %1534 = vmatpush1.bf16.msra.mxu1 %v10183_v19  ;;  %v10236_v19 = vld [vmem:[%s14825_s1 + $0x2d4] ss:$8 sps:$4 sm:$0xff]  }
 0x170   :  { %1535 = vmatprep.subr.bf16.mxu1 %v10191_v22  ;;  %v10240_v22 = vld [vmem:[%s14825_s1 + $0x2e0] ss:$8 sps:$4 sm:$0xff]  }
 0x173   :  { %1536 = vmatpush1.bf16.msra.mxu1 %v10189_v21  ;;  %v10242_v21 = vld [vmem:[%s14825_s1 + $0x2e4] ss:$8 sps:$4 sm:$0xff]  }
 0x174   :  { %1537 = vmatprep.subr.bf16.mxu1 %v10197_v24  ;;  %v10243_v24 = vld [vmem:[%s14828_s2 + $0x2e0] ss:$8 sps:$4 sm:$0xff]  }
 0x177   :  { %1538 = vmatpush1.bf16.msra.mxu1 %v10195_v23  ;;  %v10245_v23 = vld [vmem:[%s14828_s2 + $0x2e4] ss:$8 sps:$4 sm:$0xff]  }
 0x1f1   :  { %v537_v27 = vpop.f32.mrb[0].mxu1 }
 0x1f2   :  { %v538_v28 = vadd.f32 %v537_v27, %v336_v25  ;;  %v539_v29 = vpop.f32.mrb[1].mxu1  ;;  %v10201_v25 = vld [vmem:[%s14828_s2 + $0x270] ss:$8 sps:$4 sm:$0xff]   ;;  %v10207_v27 = vld [vmem:[%s14828_s2 + $0x280] ss:$8 sps:$4 sm:$0xff]  }
 0x1f3   :  { %v540_v30 = vadd.f32 %v539_v29, %v340_v26  ;;  %v541_v31 = vpop.f32.mrb[2].mxu1  ;;  %v10203_v26 = vld [vmem:[%s14828_s2 + $0x274] ss:$8 sps:$4 sm:$0xff]   ;;  %v10213_v29 = vld [vmem:[%s14828_s2 + $0x290] ss:$8 sps:$4 sm:$0xff]  }
 0x1f4   :  { %v11914_v32 = vmax.f32 %v538_v28, 0.0  ;;  %v542_v33 = vpop.f32.mrb[3].mxu1  ;;  %1539 = vmatprep.subr.bf16.mxu1 %v10203_v26  ;;  %v10209_v28 = vld [vmem:[%s14828_s2 + $0x284] ss:$8 sps:$4 sm:$0xff]   ;;  %v10219_v31 = vld [vmem:[%s14828_s2 + $0x2a0] ss:$8 sps:$4 sm:$0xff]  }
 0x1f5   :  { %v11916_v34 = vmax.f32 %v540_v30, 0.0  ;;  %1540 = vmatpush1.bf16.msra.mxu1 %v10201_v25  ;;  %v10215_v30 = vld [vmem:[%s14828_s2 + $0x294] ss:$8 sps:$4 sm:$0xff]   ;;  %v10221_v33 = vld [vmem:[%s14828_s2 + $0x2a4] ss:$8 sps:$4 sm:$0xff]  }
 0x1f6   :  { %v546_v39 = vpack.c.bf16 %v11914_v32, %v11914_v32  ;;  %1541 = vmatprep.subr.bf16.mxu1 %v10209_v28  ;;  %v10248_v25 = vld [vmem:[%s14825_s1 + $0x2f4] ss:$8 sps:$4 sm:$0xff]   ;;  %v10246_v26 = vld [vmem:[%s14825_s1 + $0x2f0] ss:$8 sps:$4 sm:$0xff]  }
 0x1f7   :  { %v547_v37 = vpack.c.bf16 %v11916_v34, %v11916_v34  ;;  %v10251_v28 = vld [vmem:[%s14828_s2 + $0x2f4] ss:$8 sps:$4 sm:$0xff]  }
 0x1f9   :  { %808 = vmatprep.mubr.bf16.mxu0 %v547_v37  ;;  %1542 = vmatpush1.bf16.msra.mxu1 %v10207_v27  ;;  %v10225_v37 = vld [vmem:[%s14828_s2 + $0x2b0] ss:$8 sps:$4 sm:$0xff]  }
 0x1fa   :  { %809 = vmatmul.mubr.bf16.vlgmr.msra.gmra.mrb[4].mxu0 %v546_v39  ;;  %1543 = vmatprep.subr.bf16.mxu1 %v10215_v30  ;;  %v10231_v39 = vld [vmem:[%s14828_s2 + $0x2c0] ss:$8 sps:$4 sm:$0xff]   ;;  %v8233_v27 = vld [vmem:[%s14826_s0 + $0x10] sm:$0xff] }
 0x1fb   :  { %1251 = vmatpush1.bf16.msra.mxu0 %v10108_v38  ;;  %v10227_v38 = vld [vmem:[%s14828_s2 + $0x2b4] ss:$8 sps:$4 sm:$0xff]   ;;  %v10249_v30 = vld [vmem:[%s14828_s2 + $0x2f0] ss:$8 sps:$4 sm:$0xff]  }
 0x1fc   :  { %1252 = vmatprep.subr.bf16.mxu0 %v10113_v40  ;;  %v10233_v40 = vld [vmem:[%s14828_s2 + $0x2c4] ss:$8 sps:$4 sm:$0xff]  }
 0x1fd   :  { %1544 = vmatpush1.bf16.msra.mxu1 %v10213_v29  ;;  %v8331_v29 = vcombine.high %v8233_v27, %v8233_v27 }
 0x1fe   :  { %1545 = vmatprep.subr.bf16.mxu1 %v10221_v33  ;;  %v10256_v33 = vld [vmem:[%s14827_s4 + $0x204] ss:$8 sps:$4 sm:$0xff]  }
 0x1ff   :  { %1253 = vmatpush1.bf16.msra.mxu0 %v10111_v41  ;;  %v10237_v41 = vld [vmem:[%s14828_s2 + $0x2d0] ss:$8 sps:$4 sm:$0xff]  }
 0x200   :  { %1254 = vmatprep.subr.bf16.mxu0 %v10116_v42  ;;  %v10239_v42 = vld [vmem:[%s14828_s2 + $0x2d4] ss:$8 sps:$4 sm:$0xff]  }
 0x201   :  { %1546 = vmatpush1.bf16.msra.mxu1 %v10219_v31  ;;  %v8330_v31 = vcombine.low %v8233_v27, %v8233_v27  ;;  %v10319_v27 = vld [vmem:[%s14828_s2 + $0x324] ss:$8 sps:$4 sm:$0xff]  }
 0x202   :  { %1547 = vmatprep.subr.bf16.mxu1 %v10227_v38 }
 0x203   :  { %1255 = vmatpush1.bf16.msra.mxu0 %v10114_v43  ;;  %v8167_v43 = vld [vmem:[%s14829_s3 + $0x2] sm:$0x3] }
 0x204   :  { %1256 = vmatprep.subr.bf16.mxu0 %v10119_v44  ;;  %v1031_v44 = vrot.slane %v8167_v43, %v11792_v35 }
 0x205   :  { %1548 = vmatpush1.bf16.msra.mxu1 %v10225_v37  ;;  %v8200_v37 = vld [vmem:[%s14830_s5 + $0x2] sm:$0x3] }
 0x206   :  { %1549 = vmatprep.subr.bf16.mxu1 %v10233_v40  ;;  %v1083_v38 = vrot.slane %v8200_v37, %v11792_v35 }
 0x207   :  { %1257 = vmatpush1.bf16.msra.mxu0 %v10117_v45 }
 0x208   :  { %1258 = vmatprep.subr.bf16.mxu0 %v10122_v46  ;;  %v1035_v46 = vrot.slane %v8167_v43, %v11794_v36 }
 0x209   :  { %1550 = vmatpush1.bf16.msra.mxu1 %v10231_v39  ;;  %v1087_v39 = vrot.slane %v8200_v37, %v11794_v36  ;;  %v10337_v37 = vld [vmem:[%s14828_s2 + $0x354] ss:$8 sps:$4 sm:$0xff]  }
 0x20a   :  { %1551 = vmatprep.subr.bf16.mxu1 %v10239_v42 }
 0x20b   :  { %1259 = vmatpush1.bf16.msra.mxu0 %v10120_v47 }
 0x20c   :  { %1260 = vmatprep.subr.bf16.mxu0 %v10125_v48 }
 0x20d   :  { %1552 = vmatpush1.bf16.msra.mxu1 %v10237_v41 }
 0x20e   :  { %1553 = vmatprep.subr.bf16.mxu1 %v10245_v23  ;;  %v10307_v23 = vld [vmem:[%s14828_s2 + $0x304] ss:$8 sps:$4 sm:$0xff]  }
 0x20f   :  { %1261 = vmatpush1.bf16.msra.mxu0 %v10123_v49 }
 0x210   :  { %1262 = vmatprep.subr.bf16.mxu0 %v10128_v50 }
 0x211   :  { %1554 = vmatpush1.bf16.msra.mxu1 %v10243_v24  ;;  %v10311_v24 = vld [vmem:[%s14828_s2 + $0x310] ss:$8 sps:$4 sm:$0xff]  }
 0x212   :  { %1555 = vmatprep.subr.bf16.mxu1 %v10251_v28  ;;  %v10323_v28 = vld [vmem:[%s14828_s2 + $0x330] ss:$8 sps:$4 sm:$0xff]  }
 0x213   :  { %1263 = vmatpush1.bf16.msra.mxu0 %v10126_v51 }
 0x214   :  { %1264 = vmatprep.subr.bf16.mxu0 %v10131_v52 }
 0x215   :  { %1556 = vmatpush1.bf16.msra.mxu1 %v10249_v30  ;;  %v10329_v30 = vld [vmem:[%s14828_s2 + $0x340] ss:$8 sps:$4 sm:$0xff]  }
 0x216   :  { %1999 = vmatprep.subr.bf16.mxu1 %v10256_v33  ;;  %v10335_v33 = vld [vmem:[%s14828_s2 + $0x350] ss:$8 sps:$4 sm:$0xff]  }
 0x217   :  { %1265 = vmatpush1.bf16.msra.mxu0 %v10129_v53 }
 0x218   :  { %1266 = vmatprep.subr.bf16.mxu0 %v10134_v54 }
 0x21b   :  { %1267 = vmatpush1.bf16.msra.mxu0 %v10132_v55 }
 0x21c   :  { %1268 = vmatprep.subr.bf16.mxu0 %v10137_v56 }
 0x21f   :  { %1269 = vmatpush1.bf16.msra.mxu0 %v10135_v57  ;;  %v10156_v57 = vld [vmem:[%s14825_s1 + $0x200] ss:$8 sps:$4 sm:$0xff]  }
 0x220   :  { %1270 = vmatprep.subr.bf16.mxu0 %v10140_v58 }
 0x223   :  { %1271 = vmatpush1.bf16.msra.mxu0 %v10138_v59  ;;  %v10164_v59 = vld [vmem:[%s14825_s1 + $0x214] ss:$8 sps:$4 sm:$0xff]  }
 0x224   :  { %1272 = vmatprep.subr.bf16.mxu0 %v10143_v60  ;;  %v10162_v60 = vld [vmem:[%s14825_s1 + $0x210] ss:$8 sps:$4 sm:$0xff]  }
 0x227   :  { %1273 = vmatpush1.bf16.msra.mxu0 %v10141_v61  ;;  %v10170_v61 = vld [vmem:[%s14825_s1 + $0x224] ss:$8 sps:$4 sm:$0xff]  }
 0x228   :  { %1274 = vmatprep.subr.bf16.mxu0 %v10146_v62  ;;  %v10168_v62 = vld [vmem:[%s14825_s1 + $0x220] ss:$8 sps:$4 sm:$0xff]  }
 0x22b   :  { %1275 = vmatpush1.bf16.msra.mxu0 %v10144_v63  ;;  %v10176_v63 = vld [vmem:[%s14825_s1 + $0x234] ss:$8 sps:$4 sm:$0xff]  }
 0x22c   :  { %1276 = vmatprep.subr.bf16.mxu0 %v10149_v0  ;;  %v10174_v0 = vld [vmem:[%s14825_s1 + $0x230] ss:$8 sps:$4 sm:$0xff]  }
 0x22f   :  { %1277 = vmatpush1.bf16.msra.mxu0 %v10147_v1  ;;  %v10182_v1 = vld [vmem:[%s14825_s1 + $0x244] ss:$8 sps:$4 sm:$0xff]  }
 0x230   :  { %1278 = vmatprep.subr.bf16.mxu0 %v10152_v6  ;;  %v10192_v6 = vld [vmem:[%s14825_s1 + $0x260] ss:$8 sps:$4 sm:$0xff]  }
 0x231   :  { %v12003_v2 = vpop.f32.mrb[4].mxu1 }
 0x232   :  { %v12005_v3 = vpop.f32.mrb[5].mxu1 }
 0x233   :  { %v1022_v4 = vpop.f32.mrb[6].mxu1  ;;  %1279 = vmatpush1.bf16.msra.mxu0 %v10150_v7  ;;  %v10200_v7 = vld [vmem:[%s14825_s1 + $0x274] ss:$8 sps:$4 sm:$0xff]  }
 0x234   :  { %v1023_v5 = vpop.f32.mrb[7].mxu1  ;;  %1280 = vmatprep.subr.bf16.mxu0 %v10155_v8  ;;  %v10186_v4 = vld [vmem:[%s14825_s1 + $0x250] ss:$8 sps:$4 sm:$0xff]  }
 0x235   :  { %v10194_v5 = vld [vmem:[%s14825_s1 + $0x264] ss:$8 sps:$4 sm:$0xff]   ;;  %v10198_v8 = vld [vmem:[%s14825_s1 + $0x270] ss:$8 sps:$4 sm:$0xff]  }
 0x237   :  { %1281 = vmatpush1.bf16.msra.mxu0 %v10153_v9  ;;  %v10206_v9 = vld [vmem:[%s14825_s1 + $0x284] ss:$8 sps:$4 sm:$0xff]  }
 0x238   :  { %1733 = vmatprep.subr.bf16.mxu0 %v10158_v10  ;;  %v10204_v10 = vld [vmem:[%s14825_s1 + $0x280] ss:$8 sps:$4 sm:$0xff]  }
 0x2cd   :  { %v810_v45 = vpop.f32.mrb[4].mxu0 }
 0x2ce   :  { %v1019_v47 = vadd.f32 %v12003_v2, %v810_v45  ;;  %v812_v48 = vpop.f32.mrb[5].mxu0  ;;  %v10180_v2 = vld [vmem:[%s14825_s1 + $0x240] ss:$8 sps:$4 sm:$0xff]  }
 0x2cf   :  { %v1021_v49 = vadd.f32 %v12005_v3, %v812_v48  ;;  %v814_v50 = vpop.f32.mrb[6].mxu0  ;;  %v10188_v3 = vld [vmem:[%s14825_s1 + $0x254] ss:$8 sps:$4 sm:$0xff]  }
 0x2d0   :  { %v1038_v51 = vadd.f32 %v1031_v44, %v1019_v47  ;;  %v815_v52 = vpop.f32.mrb[7].mxu0 }
 0x2d1   :  { %v1039_v53 = vadd.f32 %v1035_v46, %v1021_v49 }
 0x2d2   :  { %v1040_v54 = vmax.f32 %v1038_v51, 0.0  ;;  %v10254_v51 = vld [vmem:[%s14827_s4 + $0x200] ss:$8 sps:$4 sm:$0xff]  }
 0x2d3   :  { %v1041_v55 = vmax.f32 %v1039_v53, 0.0  ;;  %v10262_v53 = vld [vmem:[%s14827_s4 + $0x224] ss:$8 sps:$4 sm:$0xff]  }
 0x2d4   :  { %v1042_v58 = vpack.c.bf16 %v1040_v54, %v1040_v54  ;;  %v10260_v54 = vld [vmem:[%s14827_s4 + $0x220] ss:$8 sps:$4 sm:$0xff]  }
 0x2d5   :  { %v1043_v56 = vpack.c.bf16 %v1041_v55, %v1041_v55  ;;  %v10265_v55 = vld [vmem:[%s14827_s4 + $0x234] ss:$8 sps:$4 sm:$0xff]  }
 0x2d7   :  { %1282 = vmatprep.mubr.bf16.mxu0 %v1043_v56  ;;  %v10263_v56 = vld [vmem:[%s14827_s4 + $0x230] ss:$8 sps:$4 sm:$0xff]  }
 0x2d8   :  { %1283 = vmatmul.mubr.bf16.vlgmr.msra.gmra.mrb[8].mxu0 %v1042_v58  ;;  %v10266_v58 = vld [vmem:[%s14827_s4 + $0x240] ss:$8 sps:$4 sm:$0xff]  }
 0x2d9   :  { %1734 = vmatpush1.bf16.msra.mxu0 %v10156_v57  ;;  %1765 = vmatprep.mubr.bf16.mxu0 %v8331_v29  ;;  %v10268_v57 = vld [vmem:[%s14827_s4 + $0x244] ss:$8 sps:$4 sm:$0xff]   ;;  %v10325_v29 = vld [vmem:[%s14828_s2 + $0x334] ss:$8 sps:$4 sm:$0xff]  }
 0x2da   :  { %1735 = vmatprep.subr.bf16.mxu0 %v10164_v59  ;;  %v10271_v59 = vld [vmem:[%s14827_s4 + $0x254] ss:$8 sps:$4 sm:$0xff]  }
 0x2dd   :  { %1736 = vmatpush1.bf16.msra.mxu0 %v10162_v60  ;;  %v10269_v60 = vld [vmem:[%s14827_s4 + $0x250] ss:$8 sps:$4 sm:$0xff]  }
 0x2de   :  { %1737 = vmatprep.subr.bf16.mxu0 %v10170_v61  ;;  %v10274_v61 = vld [vmem:[%s14827_s4 + $0x264] ss:$8 sps:$4 sm:$0xff]  }
 0x2e1   :  { %1738 = vmatpush1.bf16.msra.mxu0 %v10168_v62  ;;  %v10272_v62 = vld [vmem:[%s14827_s4 + $0x260] ss:$8 sps:$4 sm:$0xff]  }
 0x2e2   :  { %1739 = vmatprep.subr.bf16.mxu0 %v10176_v63  ;;  %v10277_v63 = vld [vmem:[%s14827_s4 + $0x274] ss:$8 sps:$4 sm:$0xff]  }
 0x2e5   :  { %1740 = vmatpush1.bf16.msra.mxu0 %v10174_v0  ;;  %v10275_v0 = vld [vmem:[%s14827_s4 + $0x270] ss:$8 sps:$4 sm:$0xff]  }
 0x2e6   :  { %1741 = vmatprep.subr.bf16.mxu0 %v10182_v1  ;;  %v10280_v1 = vld [vmem:[%s14827_s4 + $0x284] ss:$8 sps:$4 sm:$0xff]  }
 0x2e9   :  { %1742 = vmatpush1.bf16.msra.mxu0 %v10180_v2  ;;  %v10278_v2 = vld [vmem:[%s14827_s4 + $0x280] ss:$8 sps:$4 sm:$0xff]  }
 0x2ea   :  { %1743 = vmatprep.subr.bf16.mxu0 %v10188_v3  ;;  %v10283_v3 = vld [vmem:[%s14827_s4 + $0x294] ss:$8 sps:$4 sm:$0xff]  }
 0x2ed   :  { %1744 = vmatpush1.bf16.msra.mxu0 %v10186_v4  ;;  %v10281_v4 = vld [vmem:[%s14827_s4 + $0x290] ss:$8 sps:$4 sm:$0xff]  }
 0x2ee   :  { %1745 = vmatprep.subr.bf16.mxu0 %v10194_v5  ;;  %v10286_v5 = vld [vmem:[%s14827_s4 + $0x2a4] ss:$8 sps:$4 sm:$0xff]  }
 0x2f1   :  { %1746 = vmatpush1.bf16.msra.mxu0 %v10192_v6  ;;  %v10284_v6 = vld [vmem:[%s14827_s4 + $0x2a0] ss:$8 sps:$4 sm:$0xff]  }
 0x2f2   :  { %1747 = vmatprep.subr.bf16.mxu0 %v10200_v7  ;;  %v10289_v7 = vld [vmem:[%s14827_s4 + $0x2b4] ss:$8 sps:$4 sm:$0xff]  }
 0x2f5   :  { %1748 = vmatpush1.bf16.msra.mxu0 %v10198_v8  ;;  %v10287_v8 = vld [vmem:[%s14827_s4 + $0x2b0] ss:$8 sps:$4 sm:$0xff]  }
 0x2f6   :  { %1749 = vmatprep.subr.bf16.mxu0 %v10206_v9  ;;  %v10292_v9 = vld [vmem:[%s14827_s4 + $0x2c4] ss:$8 sps:$4 sm:$0xff]  }
 0x2f9   :  { %1750 = vmatpush1.bf16.msra.mxu0 %v10204_v10  ;;  %v10290_v10 = vld [vmem:[%s14827_s4 + $0x2c0] ss:$8 sps:$4 sm:$0xff]  }
 0x2fa   :  { %1751 = vmatprep.subr.bf16.mxu0 %v10212_v11  ;;  %v10295_v11 = vld [vmem:[%s14827_s4 + $0x2d4] ss:$8 sps:$4 sm:$0xff]  }
 0x2fd   :  { %1752 = vmatpush1.bf16.msra.mxu0 %v10210_v12  ;;  %v10293_v12 = vld [vmem:[%s14827_s4 + $0x2d0] ss:$8 sps:$4 sm:$0xff]  }
 0x2fe   :  { %1753 = vmatprep.subr.bf16.mxu0 %v10218_v13 }
 0x301   :  { %1754 = vmatpush1.bf16.msra.mxu0 %v10216_v14 }
 0x302   :  { %1755 = vmatprep.subr.bf16.mxu0 %v10224_v15 }
 0x305   :  { %1756 = vmatpush1.bf16.msra.mxu0 %v10222_v16 }
 0x306   :  { %1757 = vmatprep.subr.bf16.mxu0 %v10230_v17  ;;  %v10298_v17 = vld [vmem:[%s14827_s4 + $0x2e4] ss:$8 sps:$4 sm:$0xff]  }
 0x309   :  { %1758 = vmatpush1.bf16.msra.mxu0 %v10228_v18  ;;  %v10296_v18 = vld [vmem:[%s14827_s4 + $0x2e0] ss:$8 sps:$4 sm:$0xff]  }
 0x30a   :  { %1759 = vmatprep.subr.bf16.mxu0 %v10236_v19  ;;  %v10301_v19 = vld [vmem:[%s14827_s4 + $0x2f4] ss:$8 sps:$4 sm:$0xff]  }
 0x30d   :  { %1760 = vmatpush1.bf16.msra.mxu0 %v10234_v20  ;;  %v10299_v20 = vld [vmem:[%s14827_s4 + $0x2f0] ss:$8 sps:$4 sm:$0xff]  }
 0x30e   :  { %1761 = vmatprep.subr.bf16.mxu0 %v10242_v21  ;;  %v10304_v21 = vld [vmem:[%s14825_s1 + $0x304] ss:$8 sps:$4 sm:$0xff]  }
 0x311   :  { %1762 = vmatpush1.bf16.msra.mxu0 %v10240_v22  ;;  %v10305_v22 = vld [vmem:[%s14828_s2 + $0x300] ss:$8 sps:$4 sm:$0xff]  }
 0x312   :  { %1763 = vmatprep.subr.bf16.mxu0 %v10248_v25  ;;  %v10313_v25 = vld [vmem:[%s14828_s2 + $0x314] ss:$8 sps:$4 sm:$0xff]  }
 0x315   :  { %1764 = vmatpush1.bf16.msra.mxu0 %v10246_v26  ;;  %v10317_v26 = vld [vmem:[%s14828_s2 + $0x320] ss:$8 sps:$4 sm:$0xff]  }
 0x316   :  { %2274 = vmatprep.subr.bf16.mxu0 %v10307_v23  ;;  %v10356_v23 = vld [vmem:[%s14825_s1 + $0x390] ss:$8 sps:$4 sm:$0xff]  }
 0x318   :  { %1766 = vmatmul.mubr.bf16.vlgmr.msra.gmra.mrb[12].mxu0 %v8330_v31  ;;  %v10331_v31 = vld [vmem:[%s14828_s2 + $0x344] ss:$8 sps:$4 sm:$0xff]  }
 0x319   :  { %2275 = vmatpush1.bf16.msra.mxu0 %v10305_v22  ;;  %v10358_v22 = vld [vmem:[%s14825_s1 + $0x394] ss:$8 sps:$4 sm:$0xff]  }
 0x31a   :  { %2276 = vmatprep.subr.bf16.mxu0 %v10313_v25  ;;  %v10362_v25 = vld [vmem:[%s14825_s1 + $0x3a0] ss:$8 sps:$4 sm:$0xff]  }
 0x31d   :  { %2277 = vmatpush1.bf16.msra.mxu0 %v10311_v24  ;;  %v10364_v24 = vld [vmem:[%s14825_s1 + $0x3a4] ss:$8 sps:$4 sm:$0xff]  }
 0x31e   :  { %2278 = vmatprep.subr.bf16.mxu0 %v10319_v27  ;;  %v10368_v27 = vld [vmem:[%s14825_s1 + $0x3b0] ss:$8 sps:$4 sm:$0xff]  }
 0x321   :  { %2279 = vmatpush1.bf16.msra.mxu0 %v10317_v26  ;;  %v10370_v26 = vld [vmem:[%s14825_s1 + $0x3b4] ss:$8 sps:$4 sm:$0xff]  }
 0x322   :  { %2280 = vmatprep.subr.bf16.mxu0 %v10325_v29  ;;  %v10374_v29 = vld [vmem:[%s14825_s1 + $0x3c0] ss:$8 sps:$4 sm:$0xff]  }
 0x325   :  { %2281 = vmatpush1.bf16.msra.mxu0 %v10323_v28  ;;  %v10376_v28 = vld [vmem:[%s14825_s1 + $0x3c4] ss:$8 sps:$4 sm:$0xff]  }
 0x326   :  { %2282 = vmatprep.subr.bf16.mxu0 %v10331_v31  ;;  %v10380_v31 = vld [vmem:[%s14825_s1 + $0x3d0] ss:$8 sps:$4 sm:$0xff]  }
 0x329   :  { %2283 = vmatpush1.bf16.msra.mxu0 %v10329_v30  ;;  %v10382_v30 = vld [vmem:[%s14825_s1 + $0x3d4] ss:$8 sps:$4 sm:$0xff]  }
 0x32a   :  { %2284 = vmatprep.subr.bf16.mxu0 %v10337_v37  ;;  %v10386_v37 = vld [vmem:[%s14825_s1 + $0x3e0] ss:$8 sps:$4 sm:$0xff]  }
 0x32d   :  { %2285 = vmatpush1.bf16.msra.mxu0 %v10335_v33  ;;  %v10388_v33 = vld [vmem:[%s14825_s1 + $0x3e4] ss:$8 sps:$4 sm:$0xff]  }
 0x3ab   :  { %v1284_v40 = vpop.f32.mrb[8].mxu0 }
 0x3ac   :  { %v1285_v41 = vadd.f32 %v1284_v40, %v1083_v38  ;;  %v1286_v42 = vpop.f32.mrb[9].mxu0  ;;  %v10341_v38 = vld [vmem:[%s14828_s2 + $0x360] ss:$8 sps:$4 sm:$0xff]   ;;  %v10347_v40 = vld [vmem:[%s14828_s2 + $0x370] ss:$8 sps:$4 sm:$0xff]  }
 0x3ad   :  { %v1287_v43 = vadd.f32 %v1286_v42, %v1087_v39  ;;  %v1288_v44 = vpop.f32.mrb[10].mxu0  ;;  %v10343_v39 = vld [vmem:[%s14828_s2 + $0x364] ss:$8 sps:$4 sm:$0xff]   ;;  %v10353_v42 = vld [vmem:[%s14828_s2 + $0x380] ss:$8 sps:$4 sm:$0xff]  }
 0x3ae   :  { %v1291_v45 = vadd.f32 %v1285_v41, %v11914_v32  ;;  %v1289_v46 = vpop.f32.mrb[11].mxu0  ;;  %v10259_v32 = vld [vmem:[%s14827_s4 + $0x214] ss:$8 sps:$4 sm:$0xff]   ;;  %2286 = vmatprep.subr.bf16.mxu0 %v10343_v39  ;;  %v10359_v44 = vld [vmem:[%s14828_s2 + $0x390] ss:$8 sps:$4 sm:$0xff]  }
 0x3af   :  { %v1292_v47 = vadd.f32 %v1287_v43, %v11916_v34  ;;  %v10257_v34 = vld [vmem:[%s14827_s4 + $0x210] ss:$8 sps:$4 sm:$0xff]   ;;  %2287 = vmatpush1.bf16.msra.mxu0 %v10341_v38  ;;  %v10349_v41 = vld [vmem:[%s14828_s2 + $0x374] ss:$8 sps:$4 sm:$0xff]   ;;  %v10355_v43 = vld [vmem:[%s14828_s2 + $0x384] ss:$8 sps:$4 sm:$0xff]  }
 0x3b0   :  { %v12231_v48 = vmax.f32 %v1291_v45, 0.0  ;;  %2288 = vmatprep.subr.bf16.mxu0 %v10349_v41  ;;  %v10361_v45 = vld [vmem:[%s14828_s2 + $0x394] ss:$8 sps:$4 sm:$0xff]   ;;  %v10365_v46 = vld [vmem:[%s14828_s2 + $0x3a0] ss:$8 sps:$4 sm:$0xff]  }
 0x3b1   :  { %v12233_v49 = vmax.f32 %v1292_v47, 0.0  ;;  %v10367_v47 = vld [vmem:[%s14828_s2 + $0x3a4] ss:$8 sps:$4 sm:$0xff]   ;;  %v10389_v39 = vld [vmem:[%s14828_s2 + $0x3e0] ss:$8 sps:$4 sm:$0xff]  }
 0x3b2   :  { %v1295_v52 = vpack.c.bf16 %v12231_v48, %v12231_v48  ;;  %v10391_v38 = vld [vmem:[%s14828_s2 + $0x3e4] ss:$8 sps:$4 sm:$0xff]   ;;  %v10392_v41 = vld [vmem:[%s14825_s1 + $0x3f0] ss:$8 sps:$4 sm:$0xff]  }
 0x3b3   :  { %v1296_v50 = vpack.c.bf16 %v12233_v49, %v12233_v49  ;;  %2289 = vmatpush1.bf16.msra.mxu0 %v10347_v40  ;;  %v10394_v40 = vld [vmem:[%s14825_s1 + $0x3f4] ss:$8 sps:$4 sm:$0xff]  }
 0x3b4   :  { %2290 = vmatprep.subr.bf16.mxu0 %v10355_v43  ;;  %v10397_v43 = vld [vmem:[%s14828_s2 + $0x3f4] ss:$8 sps:$4 sm:$0xff]  }
 0x3b5   :  { %1557 = vmatprep.mubr.bf16.mxu1 %v1296_v50  ;;  %v10371_v50 = vld [vmem:[%s14828_s2 + $0x3b0] ss:$8 sps:$4 sm:$0xff]  }
 0x3b6   :  { %1558 = vmatmul.mubr.bf16.vlgmr.msra.gmra.mrb[8].mxu1 %v1295_v52  ;;  %v10377_v52 = vld [vmem:[%s14828_s2 + $0x3c0] ss:$8 sps:$4 sm:$0xff]  }
 0x3b7   :  { %2000 = vmatpush1.bf16.msra.mxu1 %v10254_v51  ;;  %2291 = vmatpush1.bf16.msra.mxu0 %v10353_v42  ;;  %v10373_v51 = vld [vmem:[%s14828_s2 + $0x3b4] ss:$8 sps:$4 sm:$0xff]  }
 0x3b8   :  { %2001 = vmatprep.subr.bf16.mxu1 %v10259_v32  ;;  %2292 = vmatprep.subr.bf16.mxu0 %v10361_v45  ;;  %v10379_v32 = vld [vmem:[%s14828_s2 + $0x3c4] ss:$8 sps:$4 sm:$0xff]   ;;  %v8430_v42 = vld [vmem:[%s14826_s0 + $0x18] sm:$0xff] }
 0x3b9   :  { %v10395_v45 = vld [vmem:[%s14828_s2 + $0x3f0] ss:$8 sps:$4 sm:$0xff]  }
 0x3bb   :  { %2002 = vmatpush1.bf16.msra.mxu1 %v10257_v34  ;;  %2293 = vmatpush1.bf16.msra.mxu0 %v10359_v44  ;;  %v10383_v34 = vld [vmem:[%s14828_s2 + $0x3d0] ss:$8 sps:$4 sm:$0xff]   ;;  %v8528_v44 = vcombine.high %v8430_v42, %v8430_v42 }
 0x3bc   :  { %2003 = vmatprep.subr.bf16.mxu1 %v10262_v53  ;;  %2294 = vmatprep.subr.bf16.mxu0 %v10367_v47  ;;  %v10385_v53 = vld [vmem:[%s14828_s2 + $0x3d4] ss:$8 sps:$4 sm:$0xff]   ;;  %v10402_v47 = vld [vmem:[%s14827_s4 + $0x304] ss:$8 sps:$4 sm:$0xff]  }
 0x3bf   :  { %2004 = vmatpush1.bf16.msra.mxu1 %v10260_v54  ;;  %2295 = vmatpush1.bf16.msra.mxu0 %v10365_v46  ;;  %v8364_v54 = vld [vmem:[%s14829_s3 + $0x4] sm:$0x3]  ;;  %v8527_v46 = vcombine.low %v8430_v42, %v8430_v42 }
 0x3c0   :  { %2005 = vmatprep.subr.bf16.mxu1 %v10265_v55  ;;  %2296 = vmatprep.subr.bf16.mxu0 %v10373_v51  ;;  %v1780_v55 = vrot.slane %v8364_v54, %v11792_v35  ;;  %v10465_v42 = vld [vmem:[%s14828_s2 + $0x424] ss:$8 sps:$4 sm:$0xff]  }
 0x3c3   :  { %2006 = vmatpush1.bf16.msra.mxu1 %v10263_v56  ;;  %2297 = vmatpush1.bf16.msra.mxu0 %v10371_v50  ;;  %v8397_v50 = vld [vmem:[%s14830_s5 + $0x4] sm:$0x3] }
 0x3c4   :  { %2007 = vmatprep.subr.bf16.mxu1 %v10268_v57  ;;  %2298 = vmatprep.subr.bf16.mxu0 %v10379_v32  ;;  %v1784_v57 = vrot.slane %v8364_v54, %v11794_v36  ;;  %v1832_v51 = vrot.slane %v8397_v50, %v11792_v35 }
 0x3c7   :  { %2008 = vmatpush1.bf16.msra.mxu1 %v10266_v58  ;;  %2299 = vmatpush1.bf16.msra.mxu0 %v10377_v52  ;;  %v1836_v52 = vrot.slane %v8397_v50, %v11794_v36  ;;  %v10483_v50 = vld [vmem:[%s14828_s2 + $0x454] ss:$8 sps:$4 sm:$0xff]  }
 0x3c8   :  { %2009 = vmatprep.subr.bf16.mxu1 %v10271_v59  ;;  %2300 = vmatprep.subr.bf16.mxu0 %v10385_v53 }
 0x3cb   :  { %2010 = vmatpush1.bf16.msra.mxu1 %v10269_v60  ;;  %2301 = vmatpush1.bf16.msra.mxu0 %v10383_v34 }
 0x3cc   :  { %2011 = vmatprep.subr.bf16.mxu1 %v10274_v61  ;;  %2302 = vmatprep.subr.bf16.mxu0 %v10391_v38  ;;  %v10453_v38 = vld [vmem:[%s14828_s2 + $0x404] ss:$8 sps:$4 sm:$0xff]  }
 0x3cf   :  { %2012 = vmatpush1.bf16.msra.mxu1 %v10272_v62  ;;  %2303 = vmatpush1.bf16.msra.mxu0 %v10389_v39  ;;  %v10457_v39 = vld [vmem:[%s14828_s2 + $0x410] ss:$8 sps:$4 sm:$0xff]  }
 0x3d0   :  { %2013 = vmatprep.subr.bf16.mxu1 %v10277_v63  ;;  %2304 = vmatprep.subr.bf16.mxu0 %v10397_v43  ;;  %v10469_v43 = vld [vmem:[%s14828_s2 + $0x430] ss:$8 sps:$4 sm:$0xff]  }
 0x3d3   :  { %2014 = vmatpush1.bf16.msra.mxu1 %v10275_v0  ;;  %2305 = vmatpush1.bf16.msra.mxu0 %v10395_v45  ;;  %v10475_v45 = vld [vmem:[%s14828_s2 + $0x440] ss:$8 sps:$4 sm:$0xff]  }
 0x3d4   :  { %2015 = vmatprep.subr.bf16.mxu1 %v10280_v1  ;;  %2748 = vmatprep.subr.bf16.mxu0 %v10402_v47  ;;  %v10481_v47 = vld [vmem:[%s14828_s2 + $0x450] ss:$8 sps:$4 sm:$0xff]  }
 0x3d7   :  { %2016 = vmatpush1.bf16.msra.mxu1 %v10278_v2 }
 0x3d8   :  { %2017 = vmatprep.subr.bf16.mxu1 %v10283_v3 }
 0x3db   :  { %2018 = vmatpush1.bf16.msra.mxu1 %v10281_v4  ;;  %v10302_v4 = vld [vmem:[%s14825_s1 + $0x300] ss:$8 sps:$4 sm:$0xff]  }
 0x3dc   :  { %2019 = vmatprep.subr.bf16.mxu1 %v10286_v5 }
 0x3df   :  { %2020 = vmatpush1.bf16.msra.mxu1 %v10284_v6  ;;  %v10310_v6 = vld [vmem:[%s14825_s1 + $0x314] ss:$8 sps:$4 sm:$0xff]  }
 0x3e0   :  { %2021 = vmatprep.subr.bf16.mxu1 %v10289_v7  ;;  %v10308_v7 = vld [vmem:[%s14825_s1 + $0x310] ss:$8 sps:$4 sm:$0xff]  }
 0x3e3   :  { %2022 = vmatpush1.bf16.msra.mxu1 %v10287_v8  ;;  %v10316_v8 = vld [vmem:[%s14825_s1 + $0x324] ss:$8 sps:$4 sm:$0xff]  }
 0x3e4   :  { %2023 = vmatprep.subr.bf16.mxu1 %v10292_v9  ;;  %v10314_v9 = vld [vmem:[%s14825_s1 + $0x320] ss:$8 sps:$4 sm:$0xff]  }
 0x3e7   :  { %2024 = vmatpush1.bf16.msra.mxu1 %v10290_v10  ;;  %v10322_v10 = vld [vmem:[%s14825_s1 + $0x334] ss:$8 sps:$4 sm:$0xff]  }
 0x3e8   :  { %2025 = vmatprep.subr.bf16.mxu1 %v10295_v11  ;;  %v10320_v11 = vld [vmem:[%s14825_s1 + $0x330] ss:$8 sps:$4 sm:$0xff]  }
 0x3eb   :  { %2026 = vmatpush1.bf16.msra.mxu1 %v10293_v12  ;;  %v12320_v13 = vpop.f32.mrb[12].mxu0  ;;  %v10328_v12 = vld [vmem:[%s14825_s1 + $0x344] ss:$8 sps:$4 sm:$0xff]  }
 0x3ec   :  { %v12322_v14 = vpop.f32.mrb[13].mxu0  ;;  %2027 = vmatprep.subr.bf16.mxu1 %v10298_v17  ;;  %v10338_v17 = vld [vmem:[%s14825_s1 + $0x360] ss:$8 sps:$4 sm:$0xff]  }
 0x3ed   :  { %v1771_v15 = vpop.f32.mrb[14].mxu0 }
 0x3ee   :  { %v1772_v16 = vpop.f32.mrb[15].mxu0  ;;  %v10332_v15 = vld [vmem:[%s14825_s1 + $0x350] ss:$8 sps:$4 sm:$0xff]  }
 0x3ef   :  { %2028 = vmatpush1.bf16.msra.mxu1 %v10296_v18  ;;  %v10340_v16 = vld [vmem:[%s14825_s1 + $0x364] ss:$8 sps:$4 sm:$0xff]   ;;  %v10346_v18 = vld [vmem:[%s14825_s1 + $0x374] ss:$8 sps:$4 sm:$0xff]  }
 0x3f0   :  { %2029 = vmatprep.subr.bf16.mxu1 %v10301_v19  ;;  %v10344_v19 = vld [vmem:[%s14825_s1 + $0x370] ss:$8 sps:$4 sm:$0xff]  }
 0x3f3   :  { %2030 = vmatpush1.bf16.msra.mxu1 %v10299_v20  ;;  %v10352_v20 = vld [vmem:[%s14825_s1 + $0x384] ss:$8 sps:$4 sm:$0xff]  }
 0x3f4   :  { %2482 = vmatprep.subr.bf16.mxu1 %v10304_v21  ;;  %v10350_v21 = vld [vmem:[%s14825_s1 + $0x380] ss:$8 sps:$4 sm:$0xff]  }
 0x489   :  { %v1559_v56 = vpop.f32.mrb[8].mxu1 }
 0x48a   :  { %v1768_v58 = vadd.f32 %v12320_v13, %v1559_v56  ;;  %v1561_v59 = vpop.f32.mrb[9].mxu1  ;;  %v10326_v13 = vld [vmem:[%s14825_s1 + $0x340] ss:$8 sps:$4 sm:$0xff]  }
 0x48b   :  { %v1770_v60 = vadd.f32 %v12322_v14, %v1561_v59  ;;  %v1563_v61 = vpop.f32.mrb[10].mxu1  ;;  %v10334_v14 = vld [vmem:[%s14825_s1 + $0x354] ss:$8 sps:$4 sm:$0xff]  }
 0x48c   :  { %v1787_v62 = vadd.f32 %v1780_v55, %v1768_v58  ;;  %v1564_v63 = vpop.f32.mrb[11].mxu1 }
 0x48d   :  { %v1788_v0 = vadd.f32 %v1784_v57, %v1770_v60 }
 0x48e   :  { %v1789_v1 = vmax.f32 %v1787_v62, 0.0  ;;  %v10400_v62 = vld [vmem:[%s14827_s4 + $0x300] ss:$8 sps:$4 sm:$0xff]  }
 0x48f   :  { %v1790_v2 = vmax.f32 %v1788_v0, 0.0  ;;  %v10408_v0 = vld [vmem:[%s14827_s4 + $0x324] ss:$8 sps:$4 sm:$0xff]  }
 0x490   :  { %v1791_v5 = vpack.c.bf16 %v1789_v1, %v1789_v1  ;;  %v10406_v1 = vld [vmem:[%s14827_s4 + $0x320] ss:$8 sps:$4 sm:$0xff]  }
 0x491   :  { %v1792_v3 = vpack.c.bf16 %v1790_v2, %v1790_v2  ;;  %v10411_v2 = vld [vmem:[%s14827_s4 + $0x334] ss:$8 sps:$4 sm:$0xff]  }
 0x493   :  { %2031 = vmatprep.mubr.bf16.mxu1 %v1792_v3  ;;  %v10409_v3 = vld [vmem:[%s14827_s4 + $0x330] ss:$8 sps:$4 sm:$0xff]  }
 0x494   :  { %2032 = vmatmul.mubr.bf16.vlgmr.msra.gmra.mrb[12].mxu1 %v1791_v5  ;;  %v10412_v5 = vld [vmem:[%s14827_s4 + $0x340] ss:$8 sps:$4 sm:$0xff]  }
 0x495   :  { %2483 = vmatpush1.bf16.msra.mxu1 %v10302_v4  ;;  %2514 = vmatprep.mubr.bf16.mxu1 %v8528_v44  ;;  %v10414_v4 = vld [vmem:[%s14827_s4 + $0x344] ss:$8 sps:$4 sm:$0xff]   ;;  %v10471_v44 = vld [vmem:[%s14828_s2 + $0x434] ss:$8 sps:$4 sm:$0xff]  }
 0x496   :  { %2484 = vmatprep.subr.bf16.mxu1 %v10310_v6  ;;  %v10417_v6 = vld [vmem:[%s14827_s4 + $0x354] ss:$8 sps:$4 sm:$0xff]  }
 0x499   :  { %2485 = vmatpush1.bf16.msra.mxu1 %v10308_v7  ;;  %v10415_v7 = vld [vmem:[%s14827_s4 + $0x350] ss:$8 sps:$4 sm:$0xff]  }
 0x49a   :  { %2486 = vmatprep.subr.bf16.mxu1 %v10316_v8  ;;  %v10420_v8 = vld [vmem:[%s14827_s4 + $0x364] ss:$8 sps:$4 sm:$0xff]  }
 0x49d   :  { %2487 = vmatpush1.bf16.msra.mxu1 %v10314_v9  ;;  %v10418_v9 = vld [vmem:[%s14827_s4 + $0x360] ss:$8 sps:$4 sm:$0xff]  }
 0x49e   :  { %2488 = vmatprep.subr.bf16.mxu1 %v10322_v10  ;;  %v10423_v10 = vld [vmem:[%s14827_s4 + $0x374] ss:$8 sps:$4 sm:$0xff]  }
 0x4a1   :  { %2489 = vmatpush1.bf16.msra.mxu1 %v10320_v11  ;;  %v10421_v11 = vld [vmem:[%s14827_s4 + $0x370] ss:$8 sps:$4 sm:$0xff]  }
 0x4a2   :  { %2490 = vmatprep.subr.bf16.mxu1 %v10328_v12  ;;  %v10426_v12 = vld [vmem:[%s14827_s4 + $0x384] ss:$8 sps:$4 sm:$0xff]  }
 0x4a5   :  { %2491 = vmatpush1.bf16.msra.mxu1 %v10326_v13  ;;  %v10424_v13 = vld [vmem:[%s14827_s4 + $0x380] ss:$8 sps:$4 sm:$0xff]  }
 0x4a6   :  { %2492 = vmatprep.subr.bf16.mxu1 %v10334_v14  ;;  %v10429_v14 = vld [vmem:[%s14827_s4 + $0x394] ss:$8 sps:$4 sm:$0xff]  }
 0x4a9   :  { %2493 = vmatpush1.bf16.msra.mxu1 %v10332_v15  ;;  %v10427_v15 = vld [vmem:[%s14827_s4 + $0x390] ss:$8 sps:$4 sm:$0xff]  }
 0x4aa   :  { %2494 = vmatprep.subr.bf16.mxu1 %v10340_v16  ;;  %v10432_v16 = vld [vmem:[%s14827_s4 + $0x3a4] ss:$8 sps:$4 sm:$0xff]  }
 0x4ad   :  { %2495 = vmatpush1.bf16.msra.mxu1 %v10338_v17  ;;  %v10430_v17 = vld [vmem:[%s14827_s4 + $0x3a0] ss:$8 sps:$4 sm:$0xff]  }
 0x4ae   :  { %2496 = vmatprep.subr.bf16.mxu1 %v10346_v18  ;;  %v10435_v18 = vld [vmem:[%s14827_s4 + $0x3b4] ss:$8 sps:$4 sm:$0xff]  }
 0x4b1   :  { %2497 = vmatpush1.bf16.msra.mxu1 %v10344_v19  ;;  %v10433_v19 = vld [vmem:[%s14827_s4 + $0x3b0] ss:$8 sps:$4 sm:$0xff]  }
 0x4b2   :  { %2498 = vmatprep.subr.bf16.mxu1 %v10352_v20  ;;  %v10438_v20 = vld [vmem:[%s14827_s4 + $0x3c4] ss:$8 sps:$4 sm:$0xff]  }
 0x4b5   :  { %2499 = vmatpush1.bf16.msra.mxu1 %v10350_v21  ;;  %v10436_v21 = vld [vmem:[%s14827_s4 + $0x3c0] ss:$8 sps:$4 sm:$0xff]  }
 0x4b6   :  { %2500 = vmatprep.subr.bf16.mxu1 %v10358_v22  ;;  %v10441_v22 = vld [vmem:[%s14827_s4 + $0x3d4] ss:$8 sps:$4 sm:$0xff]  }
 0x4b9   :  { %2501 = vmatpush1.bf16.msra.mxu1 %v10356_v23  ;;  %v10439_v23 = vld [vmem:[%s14827_s4 + $0x3d0] ss:$8 sps:$4 sm:$0xff]  }
 0x4ba   :  { %2502 = vmatprep.subr.bf16.mxu1 %v10364_v24 }
 0x4bd   :  { %2503 = vmatpush1.bf16.msra.mxu1 %v10362_v25 }
 0x4be   :  { %2504 = vmatprep.subr.bf16.mxu1 %v10370_v26 }
 0x4c1   :  { %2505 = vmatpush1.bf16.msra.mxu1 %v10368_v27 }
 0x4c2   :  { %2506 = vmatprep.subr.bf16.mxu1 %v10376_v28  ;;  %v10444_v28 = vld [vmem:[%s14827_s4 + $0x3e4] ss:$8 sps:$4 sm:$0xff]  }
 0x4c5   :  { %2507 = vmatpush1.bf16.msra.mxu1 %v10374_v29  ;;  %v10442_v29 = vld [vmem:[%s14827_s4 + $0x3e0] ss:$8 sps:$4 sm:$0xff]  }
 0x4c6   :  { %2508 = vmatprep.subr.bf16.mxu1 %v10382_v30  ;;  %v10447_v30 = vld [vmem:[%s14827_s4 + $0x3f4] ss:$8 sps:$4 sm:$0xff]  }
 0x4c9   :  { %2509 = vmatpush1.bf16.msra.mxu1 %v10380_v31  ;;  %v10445_v31 = vld [vmem:[%s14827_s4 + $0x3f0] ss:$8 sps:$4 sm:$0xff]  }
 0x4ca   :  { %2510 = vmatprep.subr.bf16.mxu1 %v10388_v33  ;;  %v10450_v33 = vld [vmem:[%s14825_s1 + $0x404] ss:$8 sps:$4 sm:$0xff]  }
 0x4cd   :  { %2511 = vmatpush1.bf16.msra.mxu1 %v10386_v37  ;;  %v10451_v37 = vld [vmem:[%s14828_s2 + $0x400] ss:$8 sps:$4 sm:$0xff]  }
 0x4ce   :  { %2512 = vmatprep.subr.bf16.mxu1 %v10394_v40  ;;  %v10459_v40 = vld [vmem:[%s14828_s2 + $0x414] ss:$8 sps:$4 sm:$0xff]  }
 0x4d1   :  { %2513 = vmatpush1.bf16.msra.mxu1 %v10392_v41  ;;  %v10463_v41 = vld [vmem:[%s14828_s2 + $0x420] ss:$8 sps:$4 sm:$0xff]  }
 0x4d2   :  { %3023 = vmatprep.subr.bf16.mxu1 %v10453_v38  ;;  %v10502_v38 = vld [vmem:[%s14825_s1 + $0x490] ss:$8 sps:$4 sm:$0xff]  }
 0x4d4   :  { %2515 = vmatmul.mubr.bf16.vlgmr.msra.gmra.mrb[16].mxu1 %v8527_v46  ;;  %v10477_v46 = vld [vmem:[%s14828_s2 + $0x444] ss:$8 sps:$4 sm:$0xff]  }
 0x4d5   :  { %3024 = vmatpush1.bf16.msra.mxu1 %v10451_v37  ;;  %v10504_v37 = vld [vmem:[%s14825_s1 + $0x494] ss:$8 sps:$4 sm:$0xff]  }
 0x4d6   :  { %3025 = vmatprep.subr.bf16.mxu1 %v10459_v40  ;;  %v10508_v40 = vld [vmem:[%s14825_s1 + $0x4a0] ss:$8 sps:$4 sm:$0xff]  }
 0x4d9   :  { %3026 = vmatpush1.bf16.msra.mxu1 %v10457_v39  ;;  %v10510_v39 = vld [vmem:[%s14825_s1 + $0x4a4] ss:$8 sps:$4 sm:$0xff]  }
 0x4da   :  { %3027 = vmatprep.subr.bf16.mxu1 %v10465_v42  ;;  %v10514_v42 = vld [vmem:[%s14825_s1 + $0x4b0] ss:$8 sps:$4 sm:$0xff]  }
 0x4dd   :  { %3028 = vmatpush1.bf16.msra.mxu1 %v10463_v41  ;;  %v10516_v41 = vld [vmem:[%s14825_s1 + $0x4b4] ss:$8 sps:$4 sm:$0xff]  }
 0x4de   :  { %3029 = vmatprep.subr.bf16.mxu1 %v10471_v44  ;;  %v10520_v44 = vld [vmem:[%s14825_s1 + $0x4c0] ss:$8 sps:$4 sm:$0xff]  }
 0x4e1   :  { %3030 = vmatpush1.bf16.msra.mxu1 %v10469_v43  ;;  %v10522_v43 = vld [vmem:[%s14825_s1 + $0x4c4] ss:$8 sps:$4 sm:$0xff]  }
 0x4e2   :  { %3031 = vmatprep.subr.bf16.mxu1 %v10477_v46  ;;  %v10526_v46 = vld [vmem:[%s14825_s1 + $0x4d0] ss:$8 sps:$4 sm:$0xff]  }
 0x4e5   :  { %3032 = vmatpush1.bf16.msra.mxu1 %v10475_v45  ;;  %v10528_v45 = vld [vmem:[%s14825_s1 + $0x4d4] ss:$8 sps:$4 sm:$0xff]  }
 0x4e6   :  { %3033 = vmatprep.subr.bf16.mxu1 %v10483_v50  ;;  %v10532_v50 = vld [vmem:[%s14825_s1 + $0x4e0] ss:$8 sps:$4 sm:$0xff]  }
 0x4e9   :  { %3034 = vmatpush1.bf16.msra.mxu1 %v10481_v47  ;;  %v10534_v47 = vld [vmem:[%s14825_s1 + $0x4e4] ss:$8 sps:$4 sm:$0xff]  }
 0x567   :  { %v2033_v32 = vpop.f32.mrb[12].mxu1 }
 0x568   :  { %v2034_v34 = vadd.f32 %v2033_v32, %v1832_v51  ;;  %v2035_v53 = vpop.f32.mrb[13].mxu1  ;;  %v10487_v51 = vld [vmem:[%s14828_s2 + $0x460] ss:$8 sps:$4 sm:$0xff]   ;;  %v10493_v32 = vld [vmem:[%s14828_s2 + $0x470] ss:$8 sps:$4 sm:$0xff]  }
 0x569   :  { %v2036_v54 = vadd.f32 %v2035_v53, %v1836_v52  ;;  %v2037_v55 = vpop.f32.mrb[14].mxu1  ;;  %v10489_v52 = vld [vmem:[%s14828_s2 + $0x464] ss:$8 sps:$4 sm:$0xff]   ;;  %v10499_v53 = vld [vmem:[%s14828_s2 + $0x480] ss:$8 sps:$4 sm:$0xff]  }
 0x56a   :  { %v2040_v56 = vadd.f32 %v2034_v34, %v12231_v48  ;;  %v2038_v57 = vpop.f32.mrb[15].mxu1  ;;  %v10405_v48 = vld [vmem:[%s14827_s4 + $0x314] ss:$8 sps:$4 sm:$0xff]   ;;  %3035 = vmatprep.subr.bf16.mxu1 %v10489_v52  ;;  %v10505_v55 = vld [vmem:[%s14828_s2 + $0x490] ss:$8 sps:$4 sm:$0xff]  }
 0x56b   :  { %v2041_v58 = vadd.f32 %v2036_v54, %v12233_v49  ;;  %v10403_v49 = vld [vmem:[%s14827_s4 + $0x310] ss:$8 sps:$4 sm:$0xff]   ;;  %3036 = vmatpush1.bf16.msra.mxu1 %v10487_v51  ;;  %v10495_v34 = vld [vmem:[%s14828_s2 + $0x474] ss:$8 sps:$4 sm:$0xff]   ;;  %v10501_v54 = vld [vmem:[%s14828_s2 + $0x484] ss:$8 sps:$4 sm:$0xff]  }
 0x56c   :  { %v12548_v59 = vmax.f32 %v2040_v56, 0.0  ;;  %3037 = vmatprep.subr.bf16.mxu1 %v10495_v34  ;;  %v10507_v56 = vld [vmem:[%s14828_s2 + $0x494] ss:$8 sps:$4 sm:$0xff]   ;;  %v10511_v57 = vld [vmem:[%s14828_s2 + $0x4a0] ss:$8 sps:$4 sm:$0xff]  }
 0x56d   :  { %v12550_v60 = vmax.f32 %v2041_v58, 0.0  ;;  %v10513_v58 = vld [vmem:[%s14828_s2 + $0x4a4] ss:$8 sps:$4 sm:$0xff]   ;;  %v10535_v52 = vld [vmem:[%s14828_s2 + $0x4e0] ss:$8 sps:$4 sm:$0xff]  }
 0x56e   :  { %v2044_v63 = vpack.c.bf16 %v12548_v59, %v12548_v59  ;;  %v10537_v51 = vld [vmem:[%s14828_s2 + $0x4e4] ss:$8 sps:$4 sm:$0xff]   ;;  %v10538_v34 = vld [vmem:[%s14825_s1 + $0x4f0] ss:$8 sps:$4 sm:$0xff]  }
 0x56f   :  { %v2045_v61 = vpack.c.bf16 %v12550_v60, %v12550_v60  ;;  %3038 = vmatpush1.bf16.msra.mxu1 %v10493_v32  ;;  %v10540_v32 = vld [vmem:[%s14825_s1 + $0x4f4] ss:$8 sps:$4 sm:$0xff]  }
 0x570   :  { %3039 = vmatprep.subr.bf16.mxu1 %v10501_v54  ;;  %v10543_v54 = vld [vmem:[%s14828_s2 + $0x4f4] ss:$8 sps:$4 sm:$0xff]  }
 0x571   :  { %2306 = vmatprep.mubr.bf16.mxu0 %v2045_v61  ;;  %v10517_v61 = vld [vmem:[%s14828_s2 + $0x4b0] ss:$8 sps:$4 sm:$0xff]  }
 0x572   :  { %2307 = vmatmul.mubr.bf16.vlgmr.msra.gmra.mrb[16].mxu0 %v2044_v63  ;;  %v10523_v63 = vld [vmem:[%s14828_s2 + $0x4c0] ss:$8 sps:$4 sm:$0xff]  }
 0x573   :  { %2749 = vmatpush1.bf16.msra.mxu0 %v10400_v62  ;;  %3040 = vmatpush1.bf16.msra.mxu1 %v10499_v53  ;;  %v10519_v62 = vld [vmem:[%s14828_s2 + $0x4b4] ss:$8 sps:$4 sm:$0xff]   ;;  %v8627_v53 = vld [vmem:[%s14826_s0 + $0x20] sm:$0xff] }
 0x574   :  { %2750 = vmatprep.subr.bf16.mxu0 %v10405_v48  ;;  %3041 = vmatprep.subr.bf16.mxu1 %v10507_v56  ;;  %v10525_v48 = vld [vmem:[%s14828_s2 + $0x4c4] ss:$8 sps:$4 sm:$0xff]   ;;  %v10541_v56 = vld [vmem:[%s14828_s2 + $0x4f0] ss:$8 sps:$4 sm:$0xff]  }
 0x577   :  { %2751 = vmatpush1.bf16.msra.mxu0 %v10403_v49  ;;  %3042 = vmatpush1.bf16.msra.mxu1 %v10505_v55  ;;  %v10529_v49 = vld [vmem:[%s14828_s2 + $0x4d0] ss:$8 sps:$4 sm:$0xff]   ;;  %v8725_v55 = vcombine.high %v8627_v53, %v8627_v53 }
 0x578   :  { %2752 = vmatprep.subr.bf16.mxu0 %v10408_v0  ;;  %3043 = vmatprep.subr.bf16.mxu1 %v10513_v58  ;;  %v10531_v0 = vld [vmem:[%s14828_s2 + $0x4d4] ss:$8 sps:$4 sm:$0xff]   ;;  %v10548_v58 = vld [vmem:[%s14827_s4 + $0x404] ss:$8 sps:$4 sm:$0xff]  }
 0x57b   :  { %2753 = vmatpush1.bf16.msra.mxu0 %v10406_v1  ;;  %3044 = vmatpush1.bf16.msra.mxu1 %v10511_v57  ;;  %v8561_v1 = vld [vmem:[%s14829_s3 + $0x6] sm:$0x3]  ;;  %v8724_v57 = vcombine.low %v8627_v53, %v8627_v53 }
 0x57c   :  { %2754 = vmatprep.subr.bf16.mxu0 %v10411_v2  ;;  %3045 = vmatprep.subr.bf16.mxu1 %v10519_v62  ;;  %v2529_v2 = vrot.slane %v8561_v1, %v11792_v35  ;;  %v10611_v53 = vld [vmem:[%s14828_s2 + $0x524] ss:$8 sps:$4 sm:$0xff]  }
 0x57f   :  { %2755 = vmatpush1.bf16.msra.mxu0 %v10409_v3  ;;  %3046 = vmatpush1.bf16.msra.mxu1 %v10517_v61  ;;  %v8594_v61 = vld [vmem:[%s14830_s5 + $0x6] sm:$0x3] }
 0x580   :  { %2756 = vmatprep.subr.bf16.mxu0 %v10414_v4  ;;  %3047 = vmatprep.subr.bf16.mxu1 %v10525_v48  ;;  %v2533_v4 = vrot.slane %v8561_v1, %v11794_v36  ;;  %v2581_v62 = vrot.slane %v8594_v61, %v11792_v35 }
 0x583   :  { %2757 = vmatpush1.bf16.msra.mxu0 %v10412_v5  ;;  %3048 = vmatpush1.bf16.msra.mxu1 %v10523_v63  ;;  %v2585_v63 = vrot.slane %v8594_v61, %v11794_v36  ;;  %v10629_v61 = vld [vmem:[%s14828_s2 + $0x554] ss:$8 sps:$4 sm:$0xff]  }
 0x584   :  { %2758 = vmatprep.subr.bf16.mxu0 %v10417_v6  ;;  %3049 = vmatprep.subr.bf16.mxu1 %v10531_v0 }
 0x587   :  { %2759 = vmatpush1.bf16.msra.mxu0 %v10415_v7  ;;  %3050 = vmatpush1.bf16.msra.mxu1 %v10529_v49 }
 0x588   :  { %2760 = vmatprep.subr.bf16.mxu0 %v10420_v8  ;;  %3051 = vmatprep.subr.bf16.mxu1 %v10537_v51  ;;  %v10599_v51 = vld [vmem:[%s14828_s2 + $0x504] ss:$8 sps:$4 sm:$0xff]  }
 0x58b   :  { %2761 = vmatpush1.bf16.msra.mxu0 %v10418_v9  ;;  %3052 = vmatpush1.bf16.msra.mxu1 %v10535_v52  ;;  %v10603_v52 = vld [vmem:[%s14828_s2 + $0x510] ss:$8 sps:$4 sm:$0xff]  }
 0x58c   :  { %2762 = vmatprep.subr.bf16.mxu0 %v10423_v10  ;;  %3053 = vmatprep.subr.bf16.mxu1 %v10543_v54  ;;  %v10615_v54 = vld [vmem:[%s14828_s2 + $0x530] ss:$8 sps:$4 sm:$0xff]  }
 0x58f   :  { %2763 = vmatpush1.bf16.msra.mxu0 %v10421_v11  ;;  %3054 = vmatpush1.bf16.msra.mxu1 %v10541_v56  ;;  %v10621_v56 = vld [vmem:[%s14828_s2 + $0x540] ss:$8 sps:$4 sm:$0xff]  }
 0x590   :  { %2764 = vmatprep.subr.bf16.mxu0 %v10426_v12  ;;  %3497 = vmatprep.subr.bf16.mxu1 %v10548_v58  ;;  %v10627_v58 = vld [vmem:[%s14828_s2 + $0x550] ss:$8 sps:$4 sm:$0xff]  }
 0x593   :  { %2765 = vmatpush1.bf16.msra.mxu0 %v10424_v13 }
 0x594   :  { %2766 = vmatprep.subr.bf16.mxu0 %v10429_v14 }
 0x597   :  { %2767 = vmatpush1.bf16.msra.mxu0 %v10427_v15  ;;  %v10448_v15 = vld [vmem:[%s14825_s1 + $0x400] ss:$8 sps:$4 sm:$0xff]  }
 0x598   :  { %2768 = vmatprep.subr.bf16.mxu0 %v10432_v16 }
 0x59b   :  { %2769 = vmatpush1.bf16.msra.mxu0 %v10430_v17  ;;  %v10456_v17 = vld [vmem:[%s14825_s1 + $0x414] ss:$8 sps:$4 sm:$0xff]  }
 0x59c   :  { %2770 = vmatprep.subr.bf16.mxu0 %v10435_v18  ;;  %v10454_v18 = vld [vmem:[%s14825_s1 + $0x410] ss:$8 sps:$4 sm:$0xff]  }
 0x59f   :  { %2771 = vmatpush1.bf16.msra.mxu0 %v10433_v19  ;;  %v10462_v19 = vld [vmem:[%s14825_s1 + $0x424] ss:$8 sps:$4 sm:$0xff]  }
 0x5a0   :  { %2772 = vmatprep.subr.bf16.mxu0 %v10438_v20  ;;  %v10460_v20 = vld [vmem:[%s14825_s1 + $0x420] ss:$8 sps:$4 sm:$0xff]  }
 0x5a3   :  { %2773 = vmatpush1.bf16.msra.mxu0 %v10436_v21  ;;  %v10468_v21 = vld [vmem:[%s14825_s1 + $0x434] ss:$8 sps:$4 sm:$0xff]  }
 0x5a4   :  { %2774 = vmatprep.subr.bf16.mxu0 %v10441_v22  ;;  %v10466_v22 = vld [vmem:[%s14825_s1 + $0x430] ss:$8 sps:$4 sm:$0xff]  }
 0x5a7   :  { %2775 = vmatpush1.bf16.msra.mxu0 %v10439_v23  ;;  %v12637_v24 = vpop.f32.mrb[16].mxu1  ;;  %v10474_v23 = vld [vmem:[%s14825_s1 + $0x444] ss:$8 sps:$4 sm:$0xff]  }
 0x5a8   :  { %v12639_v25 = vpop.f32.mrb[17].mxu1  ;;  %2776 = vmatprep.subr.bf16.mxu0 %v10444_v28  ;;  %v10484_v28 = vld [vmem:[%s14825_s1 + $0x460] ss:$8 sps:$4 sm:$0xff]  }
 0x5a9   :  { %v2520_v26 = vpop.f32.mrb[18].mxu1 }
 0x5aa   :  { %v2521_v27 = vpop.f32.mrb[19].mxu1  ;;  %v10478_v26 = vld [vmem:[%s14825_s1 + $0x450] ss:$8 sps:$4 sm:$0xff]  }
 0x5ab   :  { %2777 = vmatpush1.bf16.msra.mxu0 %v10442_v29  ;;  %v10486_v27 = vld [vmem:[%s14825_s1 + $0x464] ss:$8 sps:$4 sm:$0xff]   ;;  %v10492_v29 = vld [vmem:[%s14825_s1 + $0x474] ss:$8 sps:$4 sm:$0xff]  }
 0x5ac   :  { %2778 = vmatprep.subr.bf16.mxu0 %v10447_v30  ;;  %v10490_v30 = vld [vmem:[%s14825_s1 + $0x470] ss:$8 sps:$4 sm:$0xff]  }
 0x5af   :  { %2779 = vmatpush1.bf16.msra.mxu0 %v10445_v31  ;;  %v10498_v31 = vld [vmem:[%s14825_s1 + $0x484] ss:$8 sps:$4 sm:$0xff]  }
 0x5b0   :  { %3231 = vmatprep.subr.bf16.mxu0 %v10450_v33  ;;  %v10496_v33 = vld [vmem:[%s14825_s1 + $0x480] ss:$8 sps:$4 sm:$0xff]  }
 0x645   :  { %v2308_v3 = vpop.f32.mrb[16].mxu0 }
 0x646   :  { %v2517_v5 = vadd.f32 %v12637_v24, %v2308_v3  ;;  %v2310_v6 = vpop.f32.mrb[17].mxu0  ;;  %v10472_v24 = vld [vmem:[%s14825_s1 + $0x440] ss:$8 sps:$4 sm:$0xff]  }
 0x647   :  { %v2519_v7 = vadd.f32 %v12639_v25, %v2310_v6  ;;  %v2312_v8 = vpop.f32.mrb[18].mxu0  ;;  %v10480_v25 = vld [vmem:[%s14825_s1 + $0x454] ss:$8 sps:$4 sm:$0xff]  }
 0x648   :  { %v2536_v9 = vadd.f32 %v2529_v2, %v2517_v5  ;;  %v2313_v10 = vpop.f32.mrb[19].mxu0 }
 0x649   :  { %v2537_v11 = vadd.f32 %v2533_v4, %v2519_v7 }
 0x64a   :  { %v2538_v12 = vmax.f32 %v2536_v9, 0.0  ;;  %v10546_v9 = vld [vmem:[%s14827_s4 + $0x400] ss:$8 sps:$4 sm:$0xff]  }
 0x64b   :  { %v2539_v13 = vmax.f32 %v2537_v11, 0.0  ;;  %v10554_v11 = vld [vmem:[%s14827_s4 + $0x424] ss:$8 sps:$4 sm:$0xff]  }
 0x64c   :  { %v2540_v16 = vpack.c.bf16 %v2538_v12, %v2538_v12  ;;  %v10552_v12 = vld [vmem:[%s14827_s4 + $0x420] ss:$8 sps:$4 sm:$0xff]  }
 0x64d   :  { %v2541_v14 = vpack.c.bf16 %v2539_v13, %v2539_v13  ;;  %v10557_v13 = vld [vmem:[%s14827_s4 + $0x434] ss:$8 sps:$4 sm:$0xff]  }
 0x64f   :  { %2780 = vmatprep.mubr.bf16.mxu0 %v2541_v14  ;;  %v10555_v14 = vld [vmem:[%s14827_s4 + $0x430] ss:$8 sps:$4 sm:$0xff]  }
 0x650   :  { %2781 = vmatmul.mubr.bf16.vlgmr.msra.gmra.mrb[20].mxu0 %v2540_v16  ;;  %v10558_v16 = vld [vmem:[%s14827_s4 + $0x440] ss:$8 sps:$4 sm:$0xff]  }
 0x651   :  { %3232 = vmatpush1.bf16.msra.mxu0 %v10448_v15  ;;  %3263 = vmatprep.mubr.bf16.mxu0 %v8725_v55  ;;  %v10560_v15 = vld [vmem:[%s14827_s4 + $0x444] ss:$8 sps:$4 sm:$0xff]   ;;  %v10617_v55 = vld [vmem:[%s14828_s2 + $0x534] ss:$8 sps:$4 sm:$0xff]  }
 0x652   :  { %3233 = vmatprep.subr.bf16.mxu0 %v10456_v17  ;;  %v10563_v17 = vld [vmem:[%s14827_s4 + $0x454] ss:$8 sps:$4 sm:$0xff]  }
 0x655   :  { %3234 = vmatpush1.bf16.msra.mxu0 %v10454_v18  ;;  %v10561_v18 = vld [vmem:[%s14827_s4 + $0x450] ss:$8 sps:$4 sm:$0xff]  }
 0x656   :  { %3235 = vmatprep.subr.bf16.mxu0 %v10462_v19  ;;  %v10566_v19 = vld [vmem:[%s14827_s4 + $0x464] ss:$8 sps:$4 sm:$0xff]  }
 0x659   :  { %3236 = vmatpush1.bf16.msra.mxu0 %v10460_v20  ;;  %v10564_v20 = vld [vmem:[%s14827_s4 + $0x460] ss:$8 sps:$4 sm:$0xff]  }
 0x65a   :  { %3237 = vmatprep.subr.bf16.mxu0 %v10468_v21  ;;  %v10569_v21 = vld [vmem:[%s14827_s4 + $0x474] ss:$8 sps:$4 sm:$0xff]  }
 0x65d   :  { %3238 = vmatpush1.bf16.msra.mxu0 %v10466_v22  ;;  %v10567_v22 = vld [vmem:[%s14827_s4 + $0x470] ss:$8 sps:$4 sm:$0xff]  }
 0x65e   :  { %3239 = vmatprep.subr.bf16.mxu0 %v10474_v23  ;;  %v10572_v23 = vld [vmem:[%s14827_s4 + $0x484] ss:$8 sps:$4 sm:$0xff]  }
 0x661   :  { %3240 = vmatpush1.bf16.msra.mxu0 %v10472_v24  ;;  %v10570_v24 = vld [vmem:[%s14827_s4 + $0x480] ss:$8 sps:$4 sm:$0xff]  }
 0x662   :  { %3241 = vmatprep.subr.bf16.mxu0 %v10480_v25  ;;  %v10575_v25 = vld [vmem:[%s14827_s4 + $0x494] ss:$8 sps:$4 sm:$0xff]  }
 0x665   :  { %3242 = vmatpush1.bf16.msra.mxu0 %v10478_v26  ;;  %v10573_v26 = vld [vmem:[%s14827_s4 + $0x490] ss:$8 sps:$4 sm:$0xff]  }
 0x666   :  { %3243 = vmatprep.subr.bf16.mxu0 %v10486_v27  ;;  %v10578_v27 = vld [vmem:[%s14827_s4 + $0x4a4] ss:$8 sps:$4 sm:$0xff]  }
 0x669   :  { %3244 = vmatpush1.bf16.msra.mxu0 %v10484_v28  ;;  %v10576_v28 = vld [vmem:[%s14827_s4 + $0x4a0] ss:$8 sps:$4 sm:$0xff]  }
 0x66a   :  { %3245 = vmatprep.subr.bf16.mxu0 %v10492_v29  ;;  %v10581_v29 = vld [vmem:[%s14827_s4 + $0x4b4] ss:$8 sps:$4 sm:$0xff]  }
 0x66d   :  { %3246 = vmatpush1.bf16.msra.mxu0 %v10490_v30  ;;  %v10579_v30 = vld [vmem:[%s14827_s4 + $0x4b0] ss:$8 sps:$4 sm:$0xff]  }
 0x66e   :  { %3247 = vmatprep.subr.bf16.mxu0 %v10498_v31  ;;  %v10584_v31 = vld [vmem:[%s14827_s4 + $0x4c4] ss:$8 sps:$4 sm:$0xff]  }
 0x671   :  { %3248 = vmatpush1.bf16.msra.mxu0 %v10496_v33  ;;  %v10582_v33 = vld [vmem:[%s14827_s4 + $0x4c0] ss:$8 sps:$4 sm:$0xff]  }
 0x672   :  { %3249 = vmatprep.subr.bf16.mxu0 %v10504_v37  ;;  %v10587_v37 = vld [vmem:[%s14827_s4 + $0x4d4] ss:$8 sps:$4 sm:$0xff]  }
 0x675   :  { %3250 = vmatpush1.bf16.msra.mxu0 %v10502_v38  ;;  %v10585_v38 = vld [vmem:[%s14827_s4 + $0x4d0] ss:$8 sps:$4 sm:$0xff]  }
 0x676   :  { %3251 = vmatprep.subr.bf16.mxu0 %v10510_v39 }
 0x679   :  { %3252 = vmatpush1.bf16.msra.mxu0 %v10508_v40 }
 0x67a   :  { %3253 = vmatprep.subr.bf16.mxu0 %v10516_v41 }
 0x67d   :  { %3254 = vmatpush1.bf16.msra.mxu0 %v10514_v42 }
 0x67e   :  { %3255 = vmatprep.subr.bf16.mxu0 %v10522_v43  ;;  %v10590_v43 = vld [vmem:[%s14827_s4 + $0x4e4] ss:$8 sps:$4 sm:$0xff]  }
 0x681   :  { %3256 = vmatpush1.bf16.msra.mxu0 %v10520_v44  ;;  %v10588_v44 = vld [vmem:[%s14827_s4 + $0x4e0] ss:$8 sps:$4 sm:$0xff]  }
 0x682   :  { %3257 = vmatprep.subr.bf16.mxu0 %v10528_v45  ;;  %v10593_v45 = vld [vmem:[%s14827_s4 + $0x4f4] ss:$8 sps:$4 sm:$0xff]  }
 0x685   :  { %3258 = vmatpush1.bf16.msra.mxu0 %v10526_v46  ;;  %v10591_v46 = vld [vmem:[%s14827_s4 + $0x4f0] ss:$8 sps:$4 sm:$0xff]  }
 0x686   :  { %3259 = vmatprep.subr.bf16.mxu0 %v10534_v47  ;;  %v10596_v47 = vld [vmem:[%s14825_s1 + $0x504] ss:$8 sps:$4 sm:$0xff]  }
 0x689   :  { %3260 = vmatpush1.bf16.msra.mxu0 %v10532_v50  ;;  %v10597_v50 = vld [vmem:[%s14828_s2 + $0x500] ss:$8 sps:$4 sm:$0xff]  }
 0x68a   :  { %3261 = vmatprep.subr.bf16.mxu0 %v10540_v32  ;;  %v10605_v32 = vld [vmem:[%s14828_s2 + $0x514] ss:$8 sps:$4 sm:$0xff]  }
 0x68d   :  { %3262 = vmatpush1.bf16.msra.mxu0 %v10538_v34  ;;  %v10609_v34 = vld [vmem:[%s14828_s2 + $0x520] ss:$8 sps:$4 sm:$0xff]  }
 0x68e   :  { %3772 = vmatprep.subr.bf16.mxu0 %v10599_v51  ;;  %v10648_v51 = vld [vmem:[%s14825_s1 + $0x590] ss:$8 sps:$4 sm:$0xff]  }
 0x690   :  { %3264 = vmatmul.mubr.bf16.vlgmr.msra.gmra.mrb[24].mxu0 %v8724_v57  ;;  %v10623_v57 = vld [vmem:[%s14828_s2 + $0x544] ss:$8 sps:$4 sm:$0xff]  }
 0x691   :  { %3773 = vmatpush1.bf16.msra.mxu0 %v10597_v50  ;;  %v10650_v50 = vld [vmem:[%s14825_s1 + $0x594] ss:$8 sps:$4 sm:$0xff]  }
 0x692   :  { %3774 = vmatprep.subr.bf16.mxu0 %v10605_v32  ;;  %v10654_v32 = vld [vmem:[%s14825_s1 + $0x5a0] ss:$8 sps:$4 sm:$0xff]  }
 0x695   :  { %3775 = vmatpush1.bf16.msra.mxu0 %v10603_v52  ;;  %v10656_v52 = vld [vmem:[%s14825_s1 + $0x5a4] ss:$8 sps:$4 sm:$0xff]  }
 0x696   :  { %3776 = vmatprep.subr.bf16.mxu0 %v10611_v53  ;;  %v10660_v53 = vld [vmem:[%s14825_s1 + $0x5b0] ss:$8 sps:$4 sm:$0xff]  }
 0x699   :  { %3777 = vmatpush1.bf16.msra.mxu0 %v10609_v34  ;;  %v10662_v34 = vld [vmem:[%s14825_s1 + $0x5b4] ss:$8 sps:$4 sm:$0xff]  }
 0x69a   :  { %3778 = vmatprep.subr.bf16.mxu0 %v10617_v55  ;;  %v10666_v55 = vld [vmem:[%s14825_s1 + $0x5c0] ss:$8 sps:$4 sm:$0xff]  }
 0x69d   :  { %3779 = vmatpush1.bf16.msra.mxu0 %v10615_v54  ;;  %v10668_v54 = vld [vmem:[%s14825_s1 + $0x5c4] ss:$8 sps:$4 sm:$0xff]  }
 0x69e   :  { %3780 = vmatprep.subr.bf16.mxu0 %v10623_v57  ;;  %v10672_v57 = vld [vmem:[%s14825_s1 + $0x5d0] ss:$8 sps:$4 sm:$0xff]  }
 0x6a1   :  { %3781 = vmatpush1.bf16.msra.mxu0 %v10621_v56  ;;  %v10674_v56 = vld [vmem:[%s14825_s1 + $0x5d4] ss:$8 sps:$4 sm:$0xff]  }
 0x6a2   :  { %3782 = vmatprep.subr.bf16.mxu0 %v10629_v61  ;;  %v10678_v61 = vld [vmem:[%s14825_s1 + $0x5e0] ss:$8 sps:$4 sm:$0xff]  }
 0x6a5   :  { %3783 = vmatpush1.bf16.msra.mxu0 %v10627_v58  ;;  %v10680_v58 = vld [vmem:[%s14825_s1 + $0x5e4] ss:$8 sps:$4 sm:$0xff]  }
 0x723   :  { %v2782_v48 = vpop.f32.mrb[20].mxu0 }
 0x724   :  { %v2783_v49 = vadd.f32 %v2782_v48, %v2581_v62  ;;  %v2784_v0 = vpop.f32.mrb[21].mxu0  ;;  %v10633_v62 = vld [vmem:[%s14828_s2 + $0x560] ss:$8 sps:$4 sm:$0xff]   ;;  %v10639_v48 = vld [vmem:[%s14828_s2 + $0x570] ss:$8 sps:$4 sm:$0xff]  }
 0x725   :  { %v2785_v1 = vadd.f32 %v2784_v0, %v2585_v63  ;;  %v2786_v2 = vpop.f32.mrb[22].mxu0  ;;  %v10635_v63 = vld [vmem:[%s14828_s2 + $0x564] ss:$8 sps:$4 sm:$0xff]   ;;  %v10645_v0 = vld [vmem:[%s14828_s2 + $0x580] ss:$8 sps:$4 sm:$0xff]  }
 0x726   :  { %v2789_v3 = vadd.f32 %v2783_v49, %v12548_v59  ;;  %v2787_v4 = vpop.f32.mrb[23].mxu0  ;;  %v10551_v59 = vld [vmem:[%s14827_s4 + $0x414] ss:$8 sps:$4 sm:$0xff]   ;;  %3784 = vmatprep.subr.bf16.mxu0 %v10635_v63  ;;  %v10651_v2 = vld [vmem:[%s14828_s2 + $0x590] ss:$8 sps:$4 sm:$0xff]  }
 0x727   :  { %v2790_v5 = vadd.f32 %v2785_v1, %v12550_v60  ;;  %v10549_v60 = vld [vmem:[%s14827_s4 + $0x410] ss:$8 sps:$4 sm:$0xff]   ;;  %3785 = vmatpush1.bf16.msra.mxu0 %v10633_v62  ;;  %v10641_v49 = vld [vmem:[%s14828_s2 + $0x574] ss:$8 sps:$4 sm:$0xff]   ;;  %v10647_v1 = vld [vmem:[%s14828_s2 + $0x584] ss:$8 sps:$4 sm:$0xff]  }
 0x728   :  { %v12865_v6 = vmax.f32 %v2789_v3, 0.0  ;;  %3786 = vmatprep.subr.bf16.mxu0 %v10641_v49  ;;  %v10653_v3 = vld [vmem:[%s14828_s2 + $0x594] ss:$8 sps:$4 sm:$0xff]   ;;  %v10657_v4 = vld [vmem:[%s14828_s2 + $0x5a0] ss:$8 sps:$4 sm:$0xff]  }
 0x729   :  { %v12867_v7 = vmax.f32 %v2790_v5, 0.0  ;;  %v10659_v5 = vld [vmem:[%s14828_s2 + $0x5a4] ss:$8 sps:$4 sm:$0xff]   ;;  %v10681_v63 = vld [vmem:[%s14828_s2 + $0x5e0] ss:$8 sps:$4 sm:$0xff]  }
 0x72a   :  { %v2793_v10 = vpack.c.bf16 %v12865_v6, %v12865_v6  ;;  %v10683_v62 = vld [vmem:[%s14828_s2 + $0x5e4] ss:$8 sps:$4 sm:$0xff]   ;;  %v10684_v49 = vld [vmem:[%s14825_s1 + $0x5f0] ss:$8 sps:$4 sm:$0xff]  }
 0x72b   :  { %v2794_v8 = vpack.c.bf16 %v12867_v7, %v12867_v7  ;;  %3787 = vmatpush1.bf16.msra.mxu0 %v10639_v48  ;;  %v10686_v48 = vld [vmem:[%s14825_s1 + $0x5f4] ss:$8 sps:$4 sm:$0xff]  }
 0x72c   :  { %3788 = vmatprep.subr.bf16.mxu0 %v10647_v1  ;;  %v10689_v1 = vld [vmem:[%s14828_s2 + $0x5f4] ss:$8 sps:$4 sm:$0xff]  }
 0x72d   :  { %3055 = vmatprep.mubr.bf16.mxu1 %v2794_v8  ;;  %v10663_v8 = vld [vmem:[%s14828_s2 + $0x5b0] ss:$8 sps:$4 sm:$0xff]  }
 0x72e   :  { %3056 = vmatmul.mubr.bf16.vlgmr.msra.gmra.mrb[20].mxu1 %v2793_v10  ;;  %v10669_v10 = vld [vmem:[%s14828_s2 + $0x5c0] ss:$8 sps:$4 sm:$0xff]  }
 0x72f   :  { %3498 = vmatpush1.bf16.msra.mxu1 %v10546_v9  ;;  %3789 = vmatpush1.bf16.msra.mxu0 %v10645_v0  ;;  %v10665_v9 = vld [vmem:[%s14828_s2 + $0x5b4] ss:$8 sps:$4 sm:$0xff]   ;;  %v8824_v0 = vld [vmem:[%s14826_s0 + $0x28] sm:$0xff] }
 0x730   :  { %3499 = vmatprep.subr.bf16.mxu1 %v10551_v59  ;;  %3790 = vmatprep.subr.bf16.mxu0 %v10653_v3  ;;  %v10671_v59 = vld [vmem:[%s14828_s2 + $0x5c4] ss:$8 sps:$4 sm:$0xff]   ;;  %v10687_v3 = vld [vmem:[%s14828_s2 + $0x5f0] ss:$8 sps:$4 sm:$0xff]  }
 0x733   :  { %3500 = vmatpush1.bf16.msra.mxu1 %v10549_v60  ;;  %3791 = vmatpush1.bf16.msra.mxu0 %v10651_v2  ;;  %v10675_v60 = vld [vmem:[%s14828_s2 + $0x5d0] ss:$8 sps:$4 sm:$0xff]   ;;  %v8922_v2 = vcombine.high %v8824_v0, %v8824_v0 }
 0x734   :  { %3501 = vmatprep.subr.bf16.mxu1 %v10554_v11  ;;  %3792 = vmatprep.subr.bf16.mxu0 %v10659_v5  ;;  %v10677_v11 = vld [vmem:[%s14828_s2 + $0x5d4] ss:$8 sps:$4 sm:$0xff]   ;;  %v10694_v5 = vld [vmem:[%s14827_s4 + $0x504] ss:$8 sps:$4 sm:$0xff]  }
 0x737   :  { %3502 = vmatpush1.bf16.msra.mxu1 %v10552_v12  ;;  %3793 = vmatpush1.bf16.msra.mxu0 %v10657_v4  ;;  %v8758_v12 = vld [vmem:[%s14829_s3 + $0x8] sm:$0x3]  ;;  %v8921_v4 = vcombine.low %v8824_v0, %v8824_v0  ;;  %v10757_v0 = vld [vmem:[%s14828_s2 + $0x624] ss:$8 sps:$4 sm:$0xff]  }
 0x738   :  { %3503 = vmatprep.subr.bf16.mxu1 %v10557_v13  ;;  %3794 = vmatprep.subr.bf16.mxu0 %v10665_v9  ;;  %v3278_v13 = vrot.slane %v8758_v12, %v11792_v35 }
 0x73b   :  { %3504 = vmatpush1.bf16.msra.mxu1 %v10555_v14  ;;  %3795 = vmatpush1.bf16.msra.mxu0 %v10663_v8  ;;  %v8791_v8 = vld [vmem:[%s14830_s5 + $0x8] sm:$0x3] }
 0x73c   :  { %3505 = vmatprep.subr.bf16.mxu1 %v10560_v15  ;;  %3796 = vmatprep.subr.bf16.mxu0 %v10671_v59  ;;  %v3282_v15 = vrot.slane %v8758_v12, %v11794_v36  ;;  %v3330_v9 = vrot.slane %v8791_v8, %v11792_v35 }
 0x73f   :  { %3506 = vmatpush1.bf16.msra.mxu1 %v10558_v16  ;;  %3797 = vmatpush1.bf16.msra.mxu0 %v10669_v10  ;;  %v3334_v10 = vrot.slane %v8791_v8, %v11794_v36  ;;  %v10775_v8 = vld [vmem:[%s14828_s2 + $0x654] ss:$8 sps:$4 sm:$0xff]  }
 0x740   :  { %3507 = vmatprep.subr.bf16.mxu1 %v10563_v17  ;;  %3798 = vmatprep.subr.bf16.mxu0 %v10677_v11 }
 0x743   :  { %3508 = vmatpush1.bf16.msra.mxu1 %v10561_v18  ;;  %3799 = vmatpush1.bf16.msra.mxu0 %v10675_v60 }
 0x744   :  { %3509 = vmatprep.subr.bf16.mxu1 %v10566_v19  ;;  %3800 = vmatprep.subr.bf16.mxu0 %v10683_v62  ;;  %v10745_v62 = vld [vmem:[%s14828_s2 + $0x604] ss:$8 sps:$4 sm:$0xff]  }
 0x747   :  { %3510 = vmatpush1.bf16.msra.mxu1 %v10564_v20  ;;  %3801 = vmatpush1.bf16.msra.mxu0 %v10681_v63  ;;  %v10749_v63 = vld [vmem:[%s14828_s2 + $0x610] ss:$8 sps:$4 sm:$0xff]  }
 0x748   :  { %3511 = vmatprep.subr.bf16.mxu1 %v10569_v21  ;;  %3802 = vmatprep.subr.bf16.mxu0 %v10689_v1  ;;  %v10761_v1 = vld [vmem:[%s14828_s2 + $0x630] ss:$8 sps:$4 sm:$0xff]  }
 0x74b   :  { %3512 = vmatpush1.bf16.msra.mxu1 %v10567_v22  ;;  %3803 = vmatpush1.bf16.msra.mxu0 %v10687_v3  ;;  %v10767_v3 = vld [vmem:[%s14828_s2 + $0x640] ss:$8 sps:$4 sm:$0xff]  }
 0x74c   :  { %3513 = vmatprep.subr.bf16.mxu1 %v10572_v23  ;;  %4246 = vmatprep.subr.bf16.mxu0 %v10694_v5  ;;  %v10773_v5 = vld [vmem:[%s14828_s2 + $0x650] ss:$8 sps:$4 sm:$0xff]  }
 0x74f   :  { %3514 = vmatpush1.bf16.msra.mxu1 %v10570_v24 }
 0x750   :  { %3515 = vmatprep.subr.bf16.mxu1 %v10575_v25 }
 0x753   :  { %3516 = vmatpush1.bf16.msra.mxu1 %v10573_v26  ;;  %v10594_v26 = vld [vmem:[%s14825_s1 + $0x500] ss:$8 sps:$4 sm:$0xff]  }
 0x754   :  { %3517 = vmatprep.subr.bf16.mxu1 %v10578_v27 }
 0x757   :  { %3518 = vmatpush1.bf16.msra.mxu1 %v10576_v28  ;;  %v10602_v28 = vld [vmem:[%s14825_s1 + $0x514] ss:$8 sps:$4 sm:$0xff]  }
 0x758   :  { %3519 = vmatprep.subr.bf16.mxu1 %v10581_v29  ;;  %v10600_v29 = vld [vmem:[%s14825_s1 + $0x510] ss:$8 sps:$4 sm:$0xff]  }
 0x75b   :  { %3520 = vmatpush1.bf16.msra.mxu1 %v10579_v30  ;;  %v10608_v30 = vld [vmem:[%s14825_s1 + $0x524] ss:$8 sps:$4 sm:$0xff]  }
 0x75c   :  { %3521 = vmatprep.subr.bf16.mxu1 %v10584_v31  ;;  %v10606_v31 = vld [vmem:[%s14825_s1 + $0x520] ss:$8 sps:$4 sm:$0xff]  }
 0x75f   :  { %3522 = vmatpush1.bf16.msra.mxu1 %v10582_v33  ;;  %v10614_v33 = vld [vmem:[%s14825_s1 + $0x534] ss:$8 sps:$4 sm:$0xff]  }
 0x760   :  { %3523 = vmatprep.subr.bf16.mxu1 %v10587_v37  ;;  %v10612_v37 = vld [vmem:[%s14825_s1 + $0x530] ss:$8 sps:$4 sm:$0xff]  }
 0x763   :  { %3524 = vmatpush1.bf16.msra.mxu1 %v10585_v38  ;;  %v12954_v39 = vpop.f32.mrb[24].mxu0  ;;  %v10620_v38 = vld [vmem:[%s14825_s1 + $0x544] ss:$8 sps:$4 sm:$0xff]  }
 0x764   :  { %v12956_v40 = vpop.f32.mrb[25].mxu0  ;;  %3525 = vmatprep.subr.bf16.mxu1 %v10590_v43  ;;  %v10630_v43 = vld [vmem:[%s14825_s1 + $0x560] ss:$8 sps:$4 sm:$0xff]  }
 0x765   :  { %v3269_v41 = vpop.f32.mrb[26].mxu0 }
 0x766   :  { %v3270_v42 = vpop.f32.mrb[27].mxu0  ;;  %v10624_v41 = vld [vmem:[%s14825_s1 + $0x550] ss:$8 sps:$4 sm:$0xff]  }
 0x767   :  { %3526 = vmatpush1.bf16.msra.mxu1 %v10588_v44  ;;  %v10632_v42 = vld [vmem:[%s14825_s1 + $0x564] ss:$8 sps:$4 sm:$0xff]   ;;  %v10638_v44 = vld [vmem:[%s14825_s1 + $0x574] ss:$8 sps:$4 sm:$0xff]  }
 0x768   :  { %3527 = vmatprep.subr.bf16.mxu1 %v10593_v45  ;;  %v10636_v45 = vld [vmem:[%s14825_s1 + $0x570] ss:$8 sps:$4 sm:$0xff]  }
 0x76b   :  { %3528 = vmatpush1.bf16.msra.mxu1 %v10591_v46  ;;  %v10644_v46 = vld [vmem:[%s14825_s1 + $0x584] ss:$8 sps:$4 sm:$0xff]  }
 0x76c   :  { %3980 = vmatprep.subr.bf16.mxu1 %v10596_v47  ;;  %v10642_v47 = vld [vmem:[%s14825_s1 + $0x580] ss:$8 sps:$4 sm:$0xff]  }
 0x801   :  { %v3057_v14 = vpop.f32.mrb[20].mxu1 }
 0x802   :  { %v3266_v16 = vadd.f32 %v12954_v39, %v3057_v14  ;;  %v3059_v17 = vpop.f32.mrb[21].mxu1  ;;  %v10618_v39 = vld [vmem:[%s14825_s1 + $0x540] ss:$8 sps:$4 sm:$0xff]  }
 0x803   :  { %v3268_v18 = vadd.f32 %v12956_v40, %v3059_v17  ;;  %v3061_v19 = vpop.f32.mrb[22].mxu1  ;;  %v10626_v40 = vld [vmem:[%s14825_s1 + $0x554] ss:$8 sps:$4 sm:$0xff]  }
 0x804   :  { %v3285_v20 = vadd.f32 %v3278_v13, %v3266_v16  ;;  %v3062_v21 = vpop.f32.mrb[23].mxu1 }
 0x805   :  { %v3286_v22 = vadd.f32 %v3282_v15, %v3268_v18 }
 0x806   :  { %v3287_v23 = vmax.f32 %v3285_v20, 0.0  ;;  %v10692_v20 = vld [vmem:[%s14827_s4 + $0x500] ss:$8 sps:$4 sm:$0xff]  }
 0x807   :  { %v3288_v24 = vmax.f32 %v3286_v22, 0.0  ;;  %v10700_v22 = vld [vmem:[%s14827_s4 + $0x524] ss:$8 sps:$4 sm:$0xff]  }
 0x808   :  { %v3289_v27 = vpack.c.bf16 %v3287_v23, %v3287_v23  ;;  %v10698_v23 = vld [vmem:[%s14827_s4 + $0x520] ss:$8 sps:$4 sm:$0xff]  }
 0x809   :  { %v3290_v25 = vpack.c.bf16 %v3288_v24, %v3288_v24  ;;  %v10703_v24 = vld [vmem:[%s14827_s4 + $0x534] ss:$8 sps:$4 sm:$0xff]  }
 0x80b   :  { %3529 = vmatprep.mubr.bf16.mxu1 %v3290_v25  ;;  %v10701_v25 = vld [vmem:[%s14827_s4 + $0x530] ss:$8 sps:$4 sm:$0xff]  }
 0x80c   :  { %3530 = vmatmul.mubr.bf16.vlgmr.msra.gmra.mrb[24].mxu1 %v3289_v27  ;;  %v10704_v27 = vld [vmem:[%s14827_s4 + $0x540] ss:$8 sps:$4 sm:$0xff]  }
 0x80d   :  { %3981 = vmatpush1.bf16.msra.mxu1 %v10594_v26  ;;  %4012 = vmatprep.mubr.bf16.mxu1 %v8922_v2  ;;  %v10706_v26 = vld [vmem:[%s14827_s4 + $0x544] ss:$8 sps:$4 sm:$0xff]   ;;  %v10763_v2 = vld [vmem:[%s14828_s2 + $0x634] ss:$8 sps:$4 sm:$0xff]  }
 0x80e   :  { %3982 = vmatprep.subr.bf16.mxu1 %v10602_v28  ;;  %v10709_v28 = vld [vmem:[%s14827_s4 + $0x554] ss:$8 sps:$4 sm:$0xff]  }
 0x811   :  { %3983 = vmatpush1.bf16.msra.mxu1 %v10600_v29  ;;  %v10707_v29 = vld [vmem:[%s14827_s4 + $0x550] ss:$8 sps:$4 sm:$0xff]  }
 0x812   :  { %3984 = vmatprep.subr.bf16.mxu1 %v10608_v30  ;;  %v10712_v30 = vld [vmem:[%s14827_s4 + $0x564] ss:$8 sps:$4 sm:$0xff]  }
 0x815   :  { %3985 = vmatpush1.bf16.msra.mxu1 %v10606_v31  ;;  %v10710_v31 = vld [vmem:[%s14827_s4 + $0x560] ss:$8 sps:$4 sm:$0xff]  }
 0x816   :  { %3986 = vmatprep.subr.bf16.mxu1 %v10614_v33  ;;  %v10715_v33 = vld [vmem:[%s14827_s4 + $0x574] ss:$8 sps:$4 sm:$0xff]  }
 0x819   :  { %3987 = vmatpush1.bf16.msra.mxu1 %v10612_v37  ;;  %v10713_v37 = vld [vmem:[%s14827_s4 + $0x570] ss:$8 sps:$4 sm:$0xff]  }
 0x81a   :  { %3988 = vmatprep.subr.bf16.mxu1 %v10620_v38  ;;  %v10718_v38 = vld [vmem:[%s14827_s4 + $0x584] ss:$8 sps:$4 sm:$0xff]  }
 0x81d   :  { %3989 = vmatpush1.bf16.msra.mxu1 %v10618_v39  ;;  %v10716_v39 = vld [vmem:[%s14827_s4 + $0x580] ss:$8 sps:$4 sm:$0xff]  }
 0x81e   :  { %3990 = vmatprep.subr.bf16.mxu1 %v10626_v40  ;;  %v10721_v40 = vld [vmem:[%s14827_s4 + $0x594] ss:$8 sps:$4 sm:$0xff]  }
 0x821   :  { %3991 = vmatpush1.bf16.msra.mxu1 %v10624_v41  ;;  %v10719_v41 = vld [vmem:[%s14827_s4 + $0x590] ss:$8 sps:$4 sm:$0xff]  }
 0x822   :  { %3992 = vmatprep.subr.bf16.mxu1 %v10632_v42  ;;  %v10724_v42 = vld [vmem:[%s14827_s4 + $0x5a4] ss:$8 sps:$4 sm:$0xff]  }
 0x825   :  { %3993 = vmatpush1.bf16.msra.mxu1 %v10630_v43  ;;  %v10722_v43 = vld [vmem:[%s14827_s4 + $0x5a0] ss:$8 sps:$4 sm:$0xff]  }
 0x826   :  { %3994 = vmatprep.subr.bf16.mxu1 %v10638_v44  ;;  %v10727_v44 = vld [vmem:[%s14827_s4 + $0x5b4] ss:$8 sps:$4 sm:$0xff]  }
 0x829   :  { %3995 = vmatpush1.bf16.msra.mxu1 %v10636_v45  ;;  %v10725_v45 = vld [vmem:[%s14827_s4 + $0x5b0] ss:$8 sps:$4 sm:$0xff]  }
 0x82a   :  { %3996 = vmatprep.subr.bf16.mxu1 %v10644_v46  ;;  %v10730_v46 = vld [vmem:[%s14827_s4 + $0x5c4] ss:$8 sps:$4 sm:$0xff]  }
 0x82d   :  { %3997 = vmatpush1.bf16.msra.mxu1 %v10642_v47  ;;  %v10728_v47 = vld [vmem:[%s14827_s4 + $0x5c0] ss:$8 sps:$4 sm:$0xff]  }
 0x82e   :  { %3998 = vmatprep.subr.bf16.mxu1 %v10650_v50  ;;  %v10733_v50 = vld [vmem:[%s14827_s4 + $0x5d4] ss:$8 sps:$4 sm:$0xff]  }
 0x831   :  { %3999 = vmatpush1.bf16.msra.mxu1 %v10648_v51  ;;  %v10731_v51 = vld [vmem:[%s14827_s4 + $0x5d0] ss:$8 sps:$4 sm:$0xff]  }
 0x832   :  { %4000 = vmatprep.subr.bf16.mxu1 %v10656_v52 }
 0x835   :  { %4001 = vmatpush1.bf16.msra.mxu1 %v10654_v32 }
 0x836   :  { %4002 = vmatprep.subr.bf16.mxu1 %v10662_v34 }
 0x839   :  { %4003 = vmatpush1.bf16.msra.mxu1 %v10660_v53 }
 0x83a   :  { %4004 = vmatprep.subr.bf16.mxu1 %v10668_v54  ;;  %v10736_v54 = vld [vmem:[%s14827_s4 + $0x5e4] ss:$8 sps:$4 sm:$0xff]  }
 0x83d   :  { %4005 = vmatpush1.bf16.msra.mxu1 %v10666_v55  ;;  %v10734_v55 = vld [vmem:[%s14827_s4 + $0x5e0] ss:$8 sps:$4 sm:$0xff]  }
 0x83e   :  { %4006 = vmatprep.subr.bf16.mxu1 %v10674_v56  ;;  %v10739_v56 = vld [vmem:[%s14827_s4 + $0x5f4] ss:$8 sps:$4 sm:$0xff]  }
 0x841   :  { %4007 = vmatpush1.bf16.msra.mxu1 %v10672_v57  ;;  %v10737_v57 = vld [vmem:[%s14827_s4 + $0x5f0] ss:$8 sps:$4 sm:$0xff]  }
 0x842   :  { %4008 = vmatprep.subr.bf16.mxu1 %v10680_v58  ;;  %v10742_v58 = vld [vmem:[%s14825_s1 + $0x604] ss:$8 sps:$4 sm:$0xff]  }
 0x845   :  { %4009 = vmatpush1.bf16.msra.mxu1 %v10678_v61  ;;  %v10743_v61 = vld [vmem:[%s14828_s2 + $0x600] ss:$8 sps:$4 sm:$0xff]  }
 0x846   :  { %4010 = vmatprep.subr.bf16.mxu1 %v10686_v48  ;;  %v10751_v48 = vld [vmem:[%s14828_s2 + $0x614] ss:$8 sps:$4 sm:$0xff]  }
 0x849   :  { %4011 = vmatpush1.bf16.msra.mxu1 %v10684_v49  ;;  %v10755_v49 = vld [vmem:[%s14828_s2 + $0x620] ss:$8 sps:$4 sm:$0xff]  }
 0x84a   :  { %4521 = vmatprep.subr.bf16.mxu1 %v10745_v62  ;;  %v10794_v62 = vld [vmem:[%s14825_s1 + $0x690] ss:$8 sps:$4 sm:$0xff]  }
 0x84c   :  { %4013 = vmatmul.mubr.bf16.vlgmr.msra.gmra.mrb[28].mxu1 %v8921_v4  ;;  %v10769_v4 = vld [vmem:[%s14828_s2 + $0x644] ss:$8 sps:$4 sm:$0xff]  }
 0x84d   :  { %4522 = vmatpush1.bf16.msra.mxu1 %v10743_v61  ;;  %v10796_v61 = vld [vmem:[%s14825_s1 + $0x694] ss:$8 sps:$4 sm:$0xff]  }
 0x84e   :  { %4523 = vmatprep.subr.bf16.mxu1 %v10751_v48  ;;  %v10800_v48 = vld [vmem:[%s14825_s1 + $0x6a0] ss:$8 sps:$4 sm:$0xff]  }
 0x851   :  { %4524 = vmatpush1.bf16.msra.mxu1 %v10749_v63  ;;  %v10802_v63 = vld [vmem:[%s14825_s1 + $0x6a4] ss:$8 sps:$4 sm:$0xff]  }
 0x852   :  { %4525 = vmatprep.subr.bf16.mxu1 %v10757_v0  ;;  %v10806_v0 = vld [vmem:[%s14825_s1 + $0x6b0] ss:$8 sps:$4 sm:$0xff]  }
 0x855   :  { %4526 = vmatpush1.bf16.msra.mxu1 %v10755_v49  ;;  %v10808_v49 = vld [vmem:[%s14825_s1 + $0x6b4] ss:$8 sps:$4 sm:$0xff]  }
 0x856   :  { %4527 = vmatprep.subr.bf16.mxu1 %v10763_v2  ;;  %v10812_v2 = vld [vmem:[%s14825_s1 + $0x6c0] ss:$8 sps:$4 sm:$0xff]  }
 0x859   :  { %4528 = vmatpush1.bf16.msra.mxu1 %v10761_v1  ;;  %v10814_v1 = vld [vmem:[%s14825_s1 + $0x6c4] ss:$8 sps:$4 sm:$0xff]  }
 0x85a   :  { %4529 = vmatprep.subr.bf16.mxu1 %v10769_v4  ;;  %v10818_v4 = vld [vmem:[%s14825_s1 + $0x6d0] ss:$8 sps:$4 sm:$0xff]  }
 0x85d   :  { %4530 = vmatpush1.bf16.msra.mxu1 %v10767_v3  ;;  %v10820_v3 = vld [vmem:[%s14825_s1 + $0x6d4] ss:$8 sps:$4 sm:$0xff]  }
 0x85e   :  { %4531 = vmatprep.subr.bf16.mxu1 %v10775_v8  ;;  %v10824_v8 = vld [vmem:[%s14825_s1 + $0x6e0] ss:$8 sps:$4 sm:$0xff]  }
 0x861   :  { %4532 = vmatpush1.bf16.msra.mxu1 %v10773_v5  ;;  %v10826_v5 = vld [vmem:[%s14825_s1 + $0x6e4] ss:$8 sps:$4 sm:$0xff]  }
 0x8df   :  { %v3531_v59 = vpop.f32.mrb[24].mxu1 }
 0x8e0   :  { %v3532_v60 = vadd.f32 %v3531_v59, %v3330_v9  ;;  %v3533_v11 = vpop.f32.mrb[25].mxu1  ;;  %v10779_v9 = vld [vmem:[%s14828_s2 + $0x660] ss:$8 sps:$4 sm:$0xff]   ;;  %v10785_v59 = vld [vmem:[%s14828_s2 + $0x670] ss:$8 sps:$4 sm:$0xff]  }
 0x8e1   :  { %v3534_v12 = vadd.f32 %v3533_v11, %v3334_v10  ;;  %v3535_v13 = vpop.f32.mrb[26].mxu1  ;;  %v10781_v10 = vld [vmem:[%s14828_s2 + $0x664] ss:$8 sps:$4 sm:$0xff]   ;;  %v10791_v11 = vld [vmem:[%s14828_s2 + $0x680] ss:$8 sps:$4 sm:$0xff]  }
 0x8e2   :  { %v3538_v14 = vadd.f32 %v3532_v60, %v12865_v6  ;;  %v3536_v15 = vpop.f32.mrb[27].mxu1  ;;  %v10697_v6 = vld [vmem:[%s14827_s4 + $0x514] ss:$8 sps:$4 sm:$0xff]   ;;  %4533 = vmatprep.subr.bf16.mxu1 %v10781_v10  ;;  %v10797_v13 = vld [vmem:[%s14828_s2 + $0x690] ss:$8 sps:$4 sm:$0xff]  }
 0x8e3   :  { %v3539_v16 = vadd.f32 %v3534_v12, %v12867_v7  ;;  %v10695_v7 = vld [vmem:[%s14827_s4 + $0x510] ss:$8 sps:$4 sm:$0xff]   ;;  %4534 = vmatpush1.bf16.msra.mxu1 %v10779_v9  ;;  %v10787_v60 = vld [vmem:[%s14828_s2 + $0x674] ss:$8 sps:$4 sm:$0xff]   ;;  %v10793_v12 = vld [vmem:[%s14828_s2 + $0x684] ss:$8 sps:$4 sm:$0xff]  }
 0x8e4   :  { %v13182_v17 = vmax.f32 %v3538_v14, 0.0  ;;  %4535 = vmatprep.subr.bf16.mxu1 %v10787_v60  ;;  %v10799_v14 = vld [vmem:[%s14828_s2 + $0x694] ss:$8 sps:$4 sm:$0xff]   ;;  %v10803_v15 = vld [vmem:[%s14828_s2 + $0x6a0] ss:$8 sps:$4 sm:$0xff]  }
 0x8e5   :  { %v13184_v18 = vmax.f32 %v3539_v16, 0.0  ;;  %v10805_v16 = vld [vmem:[%s14828_s2 + $0x6a4] ss:$8 sps:$4 sm:$0xff]   ;;  %v10827_v10 = vld [vmem:[%s14828_s2 + $0x6e0] ss:$8 sps:$4 sm:$0xff]  }
 0x8e6   :  { %v3542_v21 = vpack.c.bf16 %v13182_v17, %v13182_v17  ;;  %v10829_v9 = vld [vmem:[%s14828_s2 + $0x6e4] ss:$8 sps:$4 sm:$0xff]   ;;  %v10830_v60 = vld [vmem:[%s14825_s1 + $0x6f0] ss:$8 sps:$4 sm:$0xff]  }
 0x8e7   :  { %v3543_v19 = vpack.c.bf16 %v13184_v18, %v13184_v18  ;;  %4536 = vmatpush1.bf16.msra.mxu1 %v10785_v59  ;;  %v10832_v59 = vld [vmem:[%s14825_s1 + $0x6f4] ss:$8 sps:$4 sm:$0xff]  }
 0x8e8   :  { %4537 = vmatprep.subr.bf16.mxu1 %v10793_v12  ;;  %v10835_v12 = vld [vmem:[%s14828_s2 + $0x6f4] ss:$8 sps:$4 sm:$0xff]  }
 0x8e9   :  { %3804 = vmatprep.mubr.bf16.mxu0 %v3543_v19  ;;  %v10809_v19 = vld [vmem:[%s14828_s2 + $0x6b0] ss:$8 sps:$4 sm:$0xff]  }
 0x8ea   :  { %3805 = vmatmul.mubr.bf16.vlgmr.msra.gmra.mrb[28].mxu0 %v3542_v21  ;;  %v10815_v21 = vld [vmem:[%s14828_s2 + $0x6c0] ss:$8 sps:$4 sm:$0xff]  }
 0x8eb   :  { %4247 = vmatpush1.bf16.msra.mxu0 %v10692_v20  ;;  %4538 = vmatpush1.bf16.msra.mxu1 %v10791_v11  ;;  %v10811_v20 = vld [vmem:[%s14828_s2 + $0x6b4] ss:$8 sps:$4 sm:$0xff]  }
 0x8ec   :  { %4248 = vmatprep.subr.bf16.mxu0 %v10697_v6  ;;  %4539 = vmatprep.subr.bf16.mxu1 %v10799_v14  ;;  %v10817_v6 = vld [vmem:[%s14828_s2 + $0x6c4] ss:$8 sps:$4 sm:$0xff]   ;;  %v9021_v11 = vld [vmem:[%s14826_s0 + $0x30] sm:$0xff] }
 0x8ed   :  { %v10833_v14 = vld [vmem:[%s14828_s2 + $0x6f0] ss:$8 sps:$4 sm:$0xff]  }
 0x8ef   :  { %4249 = vmatpush1.bf16.msra.mxu0 %v10695_v7  ;;  %4540 = vmatpush1.bf16.msra.mxu1 %v10797_v13  ;;  %v10821_v7 = vld [vmem:[%s14828_s2 + $0x6d0] ss:$8 sps:$4 sm:$0xff]   ;;  %v9119_v13 = vcombine.high %v9021_v11, %v9021_v11 }
 0x8f0   :  { %4250 = vmatprep.subr.bf16.mxu0 %v10700_v22  ;;  %4541 = vmatprep.subr.bf16.mxu1 %v10805_v16  ;;  %v10823_v22 = vld [vmem:[%s14828_s2 + $0x6d4] ss:$8 sps:$4 sm:$0xff]   ;;  %v10840_v16 = vld [vmem:[%s14827_s4 + $0x604] ss:$8 sps:$4 sm:$0xff]  }
 0x8f3   :  { %4251 = vmatpush1.bf16.msra.mxu0 %v10698_v23  ;;  %4542 = vmatpush1.bf16.msra.mxu1 %v10803_v15  ;;  %v8955_v23 = vld [vmem:[%s14829_s3 + $0xa] sm:$0x3]  ;;  %v9118_v15 = vcombine.low %v9021_v11, %v9021_v11  ;;  %v10903_v11 = vld [vmem:[%s14828_s2 + $0x724] ss:$8 sps:$4 sm:$0xff]  }
 0x8f4   :  { %4252 = vmatprep.subr.bf16.mxu0 %v10703_v24  ;;  %4543 = vmatprep.subr.bf16.mxu1 %v10811_v20  ;;  %v4027_v24 = vrot.slane %v8955_v23, %v11792_v35 }
 0x8f7   :  { %4253 = vmatpush1.bf16.msra.mxu0 %v10701_v25  ;;  %4544 = vmatpush1.bf16.msra.mxu1 %v10809_v19  ;;  %v8988_v19 = vld [vmem:[%s14830_s5 + $0xa] sm:$0x3] }
 0x8f8   :  { %4254 = vmatprep.subr.bf16.mxu0 %v10706_v26  ;;  %4545 = vmatprep.subr.bf16.mxu1 %v10817_v6  ;;  %v4031_v26 = vrot.slane %v8955_v23, %v11794_v36  ;;  %v4079_v20 = vrot.slane %v8988_v19, %v11792_v35 }
 0x8fb   :  { %4255 = vmatpush1.bf16.msra.mxu0 %v10704_v27  ;;  %4546 = vmatpush1.bf16.msra.mxu1 %v10815_v21  ;;  %v4083_v21 = vrot.slane %v8988_v19, %v11794_v36  ;;  %v10921_v19 = vld [vmem:[%s14828_s2 + $0x754] ss:$8 sps:$4 sm:$0xff]  }
 0x8fc   :  { %4256 = vmatprep.subr.bf16.mxu0 %v10709_v28  ;;  %4547 = vmatprep.subr.bf16.mxu1 %v10823_v22 }
 0x8ff   :  { %4257 = vmatpush1.bf16.msra.mxu0 %v10707_v29  ;;  %4548 = vmatpush1.bf16.msra.mxu1 %v10821_v7 }
 0x900   :  { %4258 = vmatprep.subr.bf16.mxu0 %v10712_v30  ;;  %4549 = vmatprep.subr.bf16.mxu1 %v10829_v9  ;;  %v10891_v9 = vld [vmem:[%s14828_s2 + $0x704] ss:$8 sps:$4 sm:$0xff]  }
 0x903   :  { %4259 = vmatpush1.bf16.msra.mxu0 %v10710_v31  ;;  %4550 = vmatpush1.bf16.msra.mxu1 %v10827_v10  ;;  %v10895_v10 = vld [vmem:[%s14828_s2 + $0x710] ss:$8 sps:$4 sm:$0xff]  }
 0x904   :  { %4260 = vmatprep.subr.bf16.mxu0 %v10715_v33  ;;  %4551 = vmatprep.subr.bf16.mxu1 %v10835_v12  ;;  %v10907_v12 = vld [vmem:[%s14828_s2 + $0x730] ss:$8 sps:$4 sm:$0xff]  }
 0x907   :  { %4261 = vmatpush1.bf16.msra.mxu0 %v10713_v37  ;;  %4552 = vmatpush1.bf16.msra.mxu1 %v10833_v14  ;;  %v10913_v14 = vld [vmem:[%s14828_s2 + $0x740] ss:$8 sps:$4 sm:$0xff]  }
 0x908   :  { %4262 = vmatprep.subr.bf16.mxu0 %v10718_v38  ;;  %4995 = vmatprep.subr.bf16.mxu1 %v10840_v16  ;;  %v10919_v16 = vld [vmem:[%s14828_s2 + $0x750] ss:$8 sps:$4 sm:$0xff]  }
 0x90b   :  { %4263 = vmatpush1.bf16.msra.mxu0 %v10716_v39 }
 0x90c   :  { %4264 = vmatprep.subr.bf16.mxu0 %v10721_v40 }
 0x90f   :  { %4265 = vmatpush1.bf16.msra.mxu0 %v10719_v41  ;;  %v10740_v41 = vld [vmem:[%s14825_s1 + $0x600] ss:$8 sps:$4 sm:$0xff]  }
 0x910   :  { %4266 = vmatprep.subr.bf16.mxu0 %v10724_v42 }
 0x913   :  { %4267 = vmatpush1.bf16.msra.mxu0 %v10722_v43  ;;  %v10748_v43 = vld [vmem:[%s14825_s1 + $0x614] ss:$8 sps:$4 sm:$0xff]  }
 0x914   :  { %4268 = vmatprep.subr.bf16.mxu0 %v10727_v44  ;;  %v10746_v44 = vld [vmem:[%s14825_s1 + $0x610] ss:$8 sps:$4 sm:$0xff]  }
 0x917   :  { %4269 = vmatpush1.bf16.msra.mxu0 %v10725_v45  ;;  %v10754_v45 = vld [vmem:[%s14825_s1 + $0x624] ss:$8 sps:$4 sm:$0xff]  }
 0x918   :  { %4270 = vmatprep.subr.bf16.mxu0 %v10730_v46  ;;  %v10752_v46 = vld [vmem:[%s14825_s1 + $0x620] ss:$8 sps:$4 sm:$0xff]  }
 0x91b   :  { %4271 = vmatpush1.bf16.msra.mxu0 %v10728_v47  ;;  %v10760_v47 = vld [vmem:[%s14825_s1 + $0x634] ss:$8 sps:$4 sm:$0xff]  }
 0x91c   :  { %4272 = vmatprep.subr.bf16.mxu0 %v10733_v50  ;;  %v10758_v50 = vld [vmem:[%s14825_s1 + $0x630] ss:$8 sps:$4 sm:$0xff]  }
 0x91f   :  { %4273 = vmatpush1.bf16.msra.mxu0 %v10731_v51  ;;  %v13271_v52 = vpop.f32.mrb[28].mxu1  ;;  %v10766_v51 = vld [vmem:[%s14825_s1 + $0x644] ss:$8 sps:$4 sm:$0xff]  }
 0x920   :  { %v13273_v32 = vpop.f32.mrb[29].mxu1  ;;  %4274 = vmatprep.subr.bf16.mxu0 %v10736_v54  ;;  %v10776_v54 = vld [vmem:[%s14825_s1 + $0x660] ss:$8 sps:$4 sm:$0xff]  }
 0x921   :  { %v4018_v34 = vpop.f32.mrb[30].mxu1 }
 0x922   :  { %v4019_v53 = vpop.f32.mrb[31].mxu1  ;;  %v10770_v34 = vld [vmem:[%s14825_s1 + $0x650] ss:$8 sps:$4 sm:$0xff]  }
 0x923   :  { %4275 = vmatpush1.bf16.msra.mxu0 %v10734_v55  ;;  %v10778_v53 = vld [vmem:[%s14825_s1 + $0x664] ss:$8 sps:$4 sm:$0xff]   ;;  %v10784_v55 = vld [vmem:[%s14825_s1 + $0x674] ss:$8 sps:$4 sm:$0xff]  }
 0x924   :  { %4276 = vmatprep.subr.bf16.mxu0 %v10739_v56  ;;  %v10782_v56 = vld [vmem:[%s14825_s1 + $0x670] ss:$8 sps:$4 sm:$0xff]  }
 0x927   :  { %4277 = vmatpush1.bf16.msra.mxu0 %v10737_v57  ;;  %v10790_v57 = vld [vmem:[%s14825_s1 + $0x684] ss:$8 sps:$4 sm:$0xff]  }
 0x928   :  { %4729 = vmatprep.subr.bf16.mxu0 %v10742_v58  ;;  %v10788_v58 = vld [vmem:[%s14825_s1 + $0x680] ss:$8 sps:$4 sm:$0xff]  }
 0x9bd   :  { %v3806_v25 = vpop.f32.mrb[28].mxu0 }
 0x9be   :  { %v4015_v27 = vadd.f32 %v13271_v52, %v3806_v25  ;;  %v3808_v28 = vpop.f32.mrb[29].mxu0  ;;  %v10764_v52 = vld [vmem:[%s14825_s1 + $0x640] ss:$8 sps:$4 sm:$0xff]  }
 0x9bf   :  { %v4017_v29 = vadd.f32 %v13273_v32, %v3808_v28  ;;  %v3810_v30 = vpop.f32.mrb[30].mxu0  ;;  %v10772_v32 = vld [vmem:[%s14825_s1 + $0x654] ss:$8 sps:$4 sm:$0xff]  }
 0x9c0   :  { %v4034_v31 = vadd.f32 %v4027_v24, %v4015_v27  ;;  %v3811_v33 = vpop.f32.mrb[31].mxu0 }
 0x9c1   :  { %v4035_v37 = vadd.f32 %v4031_v26, %v4017_v29 }
 0x9c2   :  { %v4036_v38 = vmax.f32 %v4034_v31, 0.0  ;;  %v10838_v31 = vld [vmem:[%s14827_s4 + $0x600] ss:$8 sps:$4 sm:$0xff]  }
 0x9c3   :  { %v4037_v39 = vmax.f32 %v4035_v37, 0.0  ;;  %v10846_v37 = vld [vmem:[%s14827_s4 + $0x624] ss:$8 sps:$4 sm:$0xff]  }
 0x9c4   :  { %v4038_v42 = vpack.c.bf16 %v4036_v38, %v4036_v38  ;;  %v10844_v38 = vld [vmem:[%s14827_s4 + $0x620] ss:$8 sps:$4 sm:$0xff]  }
 0x9c5   :  { %v4039_v40 = vpack.c.bf16 %v4037_v39, %v4037_v39  ;;  %v10849_v39 = vld [vmem:[%s14827_s4 + $0x634] ss:$8 sps:$4 sm:$0xff]  }
 0x9c7   :  { %4278 = vmatprep.mubr.bf16.mxu0 %v4039_v40  ;;  %v10847_v40 = vld [vmem:[%s14827_s4 + $0x630] ss:$8 sps:$4 sm:$0xff]  }
 0x9c8   :  { %4279 = vmatmul.mubr.bf16.vlgmr.msra.gmra.mrb[32].mxu0 %v4038_v42  ;;  %v10850_v42 = vld [vmem:[%s14827_s4 + $0x640] ss:$8 sps:$4 sm:$0xff]  }
 0x9c9   :  { %4730 = vmatpush1.bf16.msra.mxu0 %v10740_v41  ;;  %4761 = vmatprep.mubr.bf16.mxu0 %v9119_v13  ;;  %v10852_v41 = vld [vmem:[%s14827_s4 + $0x644] ss:$8 sps:$4 sm:$0xff]   ;;  %v10909_v13 = vld [vmem:[%s14828_s2 + $0x734] ss:$8 sps:$4 sm:$0xff]  }
 0x9ca   :  { %4731 = vmatprep.subr.bf16.mxu0 %v10748_v43  ;;  %v10855_v43 = vld [vmem:[%s14827_s4 + $0x654] ss:$8 sps:$4 sm:$0xff]  }
 0x9cd   :  { %4732 = vmatpush1.bf16.msra.mxu0 %v10746_v44  ;;  %v10853_v44 = vld [vmem:[%s14827_s4 + $0x650] ss:$8 sps:$4 sm:$0xff]  }
 0x9ce   :  { %4733 = vmatprep.subr.bf16.mxu0 %v10754_v45  ;;  %v10858_v45 = vld [vmem:[%s14827_s4 + $0x664] ss:$8 sps:$4 sm:$0xff]  }
 0x9d1   :  { %4734 = vmatpush1.bf16.msra.mxu0 %v10752_v46  ;;  %v10856_v46 = vld [vmem:[%s14827_s4 + $0x660] ss:$8 sps:$4 sm:$0xff]  }
 0x9d2   :  { %4735 = vmatprep.subr.bf16.mxu0 %v10760_v47  ;;  %v10861_v47 = vld [vmem:[%s14827_s4 + $0x674] ss:$8 sps:$4 sm:$0xff]  }
 0x9d5   :  { %4736 = vmatpush1.bf16.msra.mxu0 %v10758_v50  ;;  %v10859_v50 = vld [vmem:[%s14827_s4 + $0x670] ss:$8 sps:$4 sm:$0xff]  }
 0x9d6   :  { %4737 = vmatprep.subr.bf16.mxu0 %v10766_v51  ;;  %v10864_v51 = vld [vmem:[%s14827_s4 + $0x684] ss:$8 sps:$4 sm:$0xff]  }
 0x9d9   :  { %4738 = vmatpush1.bf16.msra.mxu0 %v10764_v52  ;;  %v10862_v52 = vld [vmem:[%s14827_s4 + $0x680] ss:$8 sps:$4 sm:$0xff]  }
 0x9da   :  { %4739 = vmatprep.subr.bf16.mxu0 %v10772_v32  ;;  %v10867_v32 = vld [vmem:[%s14827_s4 + $0x694] ss:$8 sps:$4 sm:$0xff]  }
 0x9dd   :  { %4740 = vmatpush1.bf16.msra.mxu0 %v10770_v34  ;;  %v10865_v34 = vld [vmem:[%s14827_s4 + $0x690] ss:$8 sps:$4 sm:$0xff]  }
 0x9de   :  { %4741 = vmatprep.subr.bf16.mxu0 %v10778_v53  ;;  %v10870_v53 = vld [vmem:[%s14827_s4 + $0x6a4] ss:$8 sps:$4 sm:$0xff]  }
 0x9e1   :  { %4742 = vmatpush1.bf16.msra.mxu0 %v10776_v54  ;;  %v10868_v54 = vld [vmem:[%s14827_s4 + $0x6a0] ss:$8 sps:$4 sm:$0xff]  }
 0x9e2   :  { %4743 = vmatprep.subr.bf16.mxu0 %v10784_v55  ;;  %v10873_v55 = vld [vmem:[%s14827_s4 + $0x6b4] ss:$8 sps:$4 sm:$0xff]  }
 0x9e5   :  { %4744 = vmatpush1.bf16.msra.mxu0 %v10782_v56  ;;  %v10871_v56 = vld [vmem:[%s14827_s4 + $0x6b0] ss:$8 sps:$4 sm:$0xff]  }
 0x9e6   :  { %4745 = vmatprep.subr.bf16.mxu0 %v10790_v57  ;;  %v10876_v57 = vld [vmem:[%s14827_s4 + $0x6c4] ss:$8 sps:$4 sm:$0xff]  }
 0x9e9   :  { %4746 = vmatpush1.bf16.msra.mxu0 %v10788_v58  ;;  %v10874_v58 = vld [vmem:[%s14827_s4 + $0x6c0] ss:$8 sps:$4 sm:$0xff]  }
 0x9ea   :  { %4747 = vmatprep.subr.bf16.mxu0 %v10796_v61  ;;  %v10879_v61 = vld [vmem:[%s14827_s4 + $0x6d4] ss:$8 sps:$4 sm:$0xff]  }
 0x9ed   :  { %4748 = vmatpush1.bf16.msra.mxu0 %v10794_v62  ;;  %v10877_v62 = vld [vmem:[%s14827_s4 + $0x6d0] ss:$8 sps:$4 sm:$0xff]  }
 0x9ee   :  { %4749 = vmatprep.subr.bf16.mxu0 %v10802_v63 }
 0x9f1   :  { %4750 = vmatpush1.bf16.msra.mxu0 %v10800_v48 }
 0x9f2   :  { %4751 = vmatprep.subr.bf16.mxu0 %v10808_v49 }
 0x9f5   :  { %4752 = vmatpush1.bf16.msra.mxu0 %v10806_v0 }
 0x9f6   :  { %4753 = vmatprep.subr.bf16.mxu0 %v10814_v1  ;;  %v10882_v1 = vld [vmem:[%s14827_s4 + $0x6e4] ss:$8 sps:$4 sm:$0xff]  }
 0x9f9   :  { %4754 = vmatpush1.bf16.msra.mxu0 %v10812_v2  ;;  %v10880_v2 = vld [vmem:[%s14827_s4 + $0x6e0] ss:$8 sps:$4 sm:$0xff]  }
 0x9fa   :  { %4755 = vmatprep.subr.bf16.mxu0 %v10820_v3  ;;  %v10885_v3 = vld [vmem:[%s14827_s4 + $0x6f4] ss:$8 sps:$4 sm:$0xff]  }
 0x9fd   :  { %4756 = vmatpush1.bf16.msra.mxu0 %v10818_v4  ;;  %v10883_v4 = vld [vmem:[%s14827_s4 + $0x6f0] ss:$8 sps:$4 sm:$0xff]  }
 0x9fe   :  { %4757 = vmatprep.subr.bf16.mxu0 %v10826_v5  ;;  %v10888_v5 = vld [vmem:[%s14825_s1 + $0x704] ss:$8 sps:$4 sm:$0xff]  }
 0xa01   :  { %4758 = vmatpush1.bf16.msra.mxu0 %v10824_v8  ;;  %v10889_v8 = vld [vmem:[%s14828_s2 + $0x700] ss:$8 sps:$4 sm:$0xff]  }
 0xa02   :  { %4759 = vmatprep.subr.bf16.mxu0 %v10832_v59  ;;  %v10897_v59 = vld [vmem:[%s14828_s2 + $0x714] ss:$8 sps:$4 sm:$0xff]  }
 0xa05   :  { %4760 = vmatpush1.bf16.msra.mxu0 %v10830_v60  ;;  %v10901_v60 = vld [vmem:[%s14828_s2 + $0x720] ss:$8 sps:$4 sm:$0xff]  }
 0xa06   :  { %5270 = vmatprep.subr.bf16.mxu0 %v10891_v9  ;;  %v10940_v9 = vld [vmem:[%s14825_s1 + $0x790] ss:$8 sps:$4 sm:$0xff]  }
 0xa08   :  { %4762 = vmatmul.mubr.bf16.vlgmr.msra.gmra.mrb[36].mxu0 %v9118_v15  ;;  %v10915_v15 = vld [vmem:[%s14828_s2 + $0x744] ss:$8 sps:$4 sm:$0xff]  }
 0xa09   :  { %5271 = vmatpush1.bf16.msra.mxu0 %v10889_v8  ;;  %v10942_v8 = vld [vmem:[%s14825_s1 + $0x794] ss:$8 sps:$4 sm:$0xff]  }
 0xa0a   :  { %5272 = vmatprep.subr.bf16.mxu0 %v10897_v59  ;;  %v10946_v59 = vld [vmem:[%s14825_s1 + $0x7a0] ss:$8 sps:$4 sm:$0xff]  }
 0xa0d   :  { %5273 = vmatpush1.bf16.msra.mxu0 %v10895_v10  ;;  %v10948_v10 = vld [vmem:[%s14825_s1 + $0x7a4] ss:$8 sps:$4 sm:$0xff]  }
 0xa0e   :  { %5274 = vmatprep.subr.bf16.mxu0 %v10903_v11  ;;  %v10952_v11 = vld [vmem:[%s14825_s1 + $0x7b0] ss:$8 sps:$4 sm:$0xff]  }
 0xa11   :  { %5275 = vmatpush1.bf16.msra.mxu0 %v10901_v60  ;;  %v10954_v60 = vld [vmem:[%s14825_s1 + $0x7b4] ss:$8 sps:$4 sm:$0xff]  }
 0xa12   :  { %5276 = vmatprep.subr.bf16.mxu0 %v10909_v13  ;;  %v10958_v13 = vld [vmem:[%s14825_s1 + $0x7c0] ss:$8 sps:$4 sm:$0xff]  }
 0xa15   :  { %5277 = vmatpush1.bf16.msra.mxu0 %v10907_v12  ;;  %v10960_v12 = vld [vmem:[%s14825_s1 + $0x7c4] ss:$8 sps:$4 sm:$0xff]  }
 0xa16   :  { %5278 = vmatprep.subr.bf16.mxu0 %v10915_v15  ;;  %v10964_v15 = vld [vmem:[%s14825_s1 + $0x7d0] ss:$8 sps:$4 sm:$0xff]  }
 0xa19   :  { %5279 = vmatpush1.bf16.msra.mxu0 %v10913_v14  ;;  %v10966_v14 = vld [vmem:[%s14825_s1 + $0x7d4] ss:$8 sps:$4 sm:$0xff]  }
 0xa1a   :  { %5280 = vmatprep.subr.bf16.mxu0 %v10921_v19  ;;  %v10970_v19 = vld [vmem:[%s14825_s1 + $0x7e0] ss:$8 sps:$4 sm:$0xff]  }
 0xa1d   :  { %5281 = vmatpush1.bf16.msra.mxu0 %v10919_v16  ;;  %v10972_v16 = vld [vmem:[%s14825_s1 + $0x7e4] ss:$8 sps:$4 sm:$0xff]  }
 0xa9b   :  { %v4280_v6 = vpop.f32.mrb[32].mxu0 }
 0xa9c   :  { %v4281_v7 = vadd.f32 %v4280_v6, %v4079_v20  ;;  %v4282_v22 = vpop.f32.mrb[33].mxu0  ;;  %v10925_v20 = vld [vmem:[%s14828_s2 + $0x760] ss:$8 sps:$4 sm:$0xff]   ;;  %v10931_v6 = vld [vmem:[%s14828_s2 + $0x770] ss:$8 sps:$4 sm:$0xff]  }
 0xa9d   :  { %v4283_v23 = vadd.f32 %v4282_v22, %v4083_v21  ;;  %v4284_v24 = vpop.f32.mrb[34].mxu0  ;;  %v10927_v21 = vld [vmem:[%s14828_s2 + $0x764] ss:$8 sps:$4 sm:$0xff]   ;;  %v10937_v22 = vld [vmem:[%s14828_s2 + $0x780] ss:$8 sps:$4 sm:$0xff]  }
 0xa9e   :  { %v4287_v25 = vadd.f32 %v4281_v7, %v13182_v17  ;;  %v4285_v26 = vpop.f32.mrb[35].mxu0  ;;  %v10843_v17 = vld [vmem:[%s14827_s4 + $0x614] ss:$8 sps:$4 sm:$0xff]   ;;  %5282 = vmatprep.subr.bf16.mxu0 %v10927_v21  ;;  %v10943_v24 = vld [vmem:[%s14828_s2 + $0x790] ss:$8 sps:$4 sm:$0xff]  }
 0xa9f   :  { %v4288_v27 = vadd.f32 %v4283_v23, %v13184_v18  ;;  %v10841_v18 = vld [vmem:[%s14827_s4 + $0x610] ss:$8 sps:$4 sm:$0xff]   ;;  %5283 = vmatpush1.bf16.msra.mxu0 %v10925_v20  ;;  %v10933_v7 = vld [vmem:[%s14828_s2 + $0x774] ss:$8 sps:$4 sm:$0xff]   ;;  %v10939_v23 = vld [vmem:[%s14828_s2 + $0x784] ss:$8 sps:$4 sm:$0xff]  }
 0xaa0   :  { %v13499_v28 = vmax.f32 %v4287_v25, 0.0  ;;  %5284 = vmatprep.subr.bf16.mxu0 %v10933_v7  ;;  %v10945_v25 = vld [vmem:[%s14828_s2 + $0x794] ss:$8 sps:$4 sm:$0xff]   ;;  %v10949_v26 = vld [vmem:[%s14828_s2 + $0x7a0] ss:$8 sps:$4 sm:$0xff]  }
 0xaa1   :  { %v13501_v29 = vmax.f32 %v4288_v27, 0.0  ;;  %v10951_v27 = vld [vmem:[%s14828_s2 + $0x7a4] ss:$8 sps:$4 sm:$0xff]   ;;  %v10973_v21 = vld [vmem:[%s14828_s2 + $0x7e0] ss:$8 sps:$4 sm:$0xff]  }
 0xaa2   :  { %v4291_v33 = vpack.c.bf16 %v13499_v28, %v13499_v28  ;;  %v10975_v20 = vld [vmem:[%s14828_s2 + $0x7e4] ss:$8 sps:$4 sm:$0xff]   ;;  %v10976_v7 = vld [vmem:[%s14825_s1 + $0x7f0] ss:$8 sps:$4 sm:$0xff]  }
 0xaa3   :  { %v4292_v30 = vpack.c.bf16 %v13501_v29, %v13501_v29  ;;  %5285 = vmatpush1.bf16.msra.mxu0 %v10931_v6  ;;  %v10978_v6 = vld [vmem:[%s14825_s1 + $0x7f4] ss:$8 sps:$4 sm:$0xff]  }
 0xaa4   :  { %5286 = vmatprep.subr.bf16.mxu0 %v10939_v23  ;;  %v10981_v23 = vld [vmem:[%s14828_s2 + $0x7f4] ss:$8 sps:$4 sm:$0xff]  }
 0xaa5   :  { %4553 = vmatprep.mubr.bf16.mxu1 %v4292_v30  ;;  %v10955_v30 = vld [vmem:[%s14828_s2 + $0x7b0] ss:$8 sps:$4 sm:$0xff]  }
 0xaa6   :  { %4554 = vmatmul.mubr.bf16.vlgmr.msra.gmra.mrb[32].mxu1 %v4291_v33  ;;  %v10961_v33 = vld [vmem:[%s14828_s2 + $0x7c0] ss:$8 sps:$4 sm:$0xff]  }
 0xaa7   :  { %4996 = vmatpush1.bf16.msra.mxu1 %v10838_v31  ;;  %5287 = vmatpush1.bf16.msra.mxu0 %v10937_v22  ;;  %v10957_v31 = vld [vmem:[%s14828_s2 + $0x7b4] ss:$8 sps:$4 sm:$0xff]  }
 0xaa8   :  { %4997 = vmatprep.subr.bf16.mxu1 %v10843_v17  ;;  %5288 = vmatprep.subr.bf16.mxu0 %v10945_v25  ;;  %v10963_v17 = vld [vmem:[%s14828_s2 + $0x7c4] ss:$8 sps:$4 sm:$0xff]   ;;  %v9218_v22 = vld [vmem:[%s14826_s0 + $0x38] sm:$0xff] }
 0xaa9   :  { %v10979_v25 = vld [vmem:[%s14828_s2 + $0x7f0] ss:$8 sps:$4 sm:$0xff]  }
 0xaab   :  { %4998 = vmatpush1.bf16.msra.mxu1 %v10841_v18  ;;  %5289 = vmatpush1.bf16.msra.mxu0 %v10943_v24  ;;  %v10967_v18 = vld [vmem:[%s14828_s2 + $0x7d0] ss:$8 sps:$4 sm:$0xff]   ;;  %v9316_v24 = vcombine.high %v9218_v22, %v9218_v22 }
 0xaac   :  { %4999 = vmatprep.subr.bf16.mxu1 %v10846_v37  ;;  %5290 = vmatprep.subr.bf16.mxu0 %v10951_v27  ;;  %v10969_v37 = vld [vmem:[%s14828_s2 + $0x7d4] ss:$8 sps:$4 sm:$0xff]   ;;  %v10986_v27 = vld [vmem:[%s14827_s4 + $0x704] ss:$8 sps:$4 sm:$0xff]  }
 0xaaf   :  { %5000 = vmatpush1.bf16.msra.mxu1 %v10844_v38  ;;  %5291 = vmatpush1.bf16.msra.mxu0 %v10949_v26  ;;  %v9152_v38 = vld [vmem:[%s14829_s3 + $0xc] sm:$0x3]  ;;  %v9315_v26 = vcombine.low %v9218_v22, %v9218_v22 }
 0xab0   :  { %5001 = vmatprep.subr.bf16.mxu1 %v10849_v39  ;;  %5292 = vmatprep.subr.bf16.mxu0 %v10957_v31  ;;  %v4776_v39 = vrot.slane %v9152_v38, %v11792_v35  ;;  %v11049_v22 = vld [vmem:[%s14828_s2 + $0x824] ss:$8 sps:$4 sm:$0xff]  }
 0xab3   :  { %5002 = vmatpush1.bf16.msra.mxu1 %v10847_v40  ;;  %5293 = vmatpush1.bf16.msra.mxu0 %v10955_v30  ;;  %v9185_v30 = vld [vmem:[%s14830_s5 + $0xc] sm:$0x3] }
 0xab4   :  { %5003 = vmatprep.subr.bf16.mxu1 %v10852_v41  ;;  %5294 = vmatprep.subr.bf16.mxu0 %v10963_v17  ;;  %v4780_v41 = vrot.slane %v9152_v38, %v11794_v36  ;;  %v4828_v31 = vrot.slane %v9185_v30, %v11792_v35 }
 0xab7   :  { %5004 = vmatpush1.bf16.msra.mxu1 %v10850_v42  ;;  %5295 = vmatpush1.bf16.msra.mxu0 %v10961_v33  ;;  %v4832_v33 = vrot.slane %v9185_v30, %v11794_v36  ;;  %v11067_v30 = vld [vmem:[%s14828_s2 + $0x854] ss:$8 sps:$4 sm:$0xff]  }
 0xab8   :  { %5005 = vmatprep.subr.bf16.mxu1 %v10855_v43  ;;  %5296 = vmatprep.subr.bf16.mxu0 %v10969_v37 }
 0xabb   :  { %5006 = vmatpush1.bf16.msra.mxu1 %v10853_v44  ;;  %5297 = vmatpush1.bf16.msra.mxu0 %v10967_v18 }
 0xabc   :  { %5007 = vmatprep.subr.bf16.mxu1 %v10858_v45  ;;  %5298 = vmatprep.subr.bf16.mxu0 %v10975_v20  ;;  %v11037_v20 = vld [vmem:[%s14828_s2 + $0x804] ss:$8 sps:$4 sm:$0xff]  }
 0xabf   :  { %5008 = vmatpush1.bf16.msra.mxu1 %v10856_v46  ;;  %5299 = vmatpush1.bf16.msra.mxu0 %v10973_v21  ;;  %v11041_v21 = vld [vmem:[%s14828_s2 + $0x810] ss:$8 sps:$4 sm:$0xff]  }
 0xac0   :  { %5009 = vmatprep.subr.bf16.mxu1 %v10861_v47  ;;  %5300 = vmatprep.subr.bf16.mxu0 %v10981_v23  ;;  %v11053_v23 = vld [vmem:[%s14828_s2 + $0x830] ss:$8 sps:$4 sm:$0xff]  }
 0xac3   :  { %5010 = vmatpush1.bf16.msra.mxu1 %v10859_v50  ;;  %5301 = vmatpush1.bf16.msra.mxu0 %v10979_v25  ;;  %v11059_v25 = vld [vmem:[%s14828_s2 + $0x840] ss:$8 sps:$4 sm:$0xff]  }
 0xac4   :  { %5011 = vmatprep.subr.bf16.mxu1 %v10864_v51  ;;  %5744 = vmatprep.subr.bf16.mxu0 %v10986_v27  ;;  %v11065_v27 = vld [vmem:[%s14828_s2 + $0x850] ss:$8 sps:$4 sm:$0xff]  }
 0xac7   :  { %5012 = vmatpush1.bf16.msra.mxu1 %v10862_v52 }
 0xac8   :  { %5013 = vmatprep.subr.bf16.mxu1 %v10867_v32 }
 0xacb   :  { %5014 = vmatpush1.bf16.msra.mxu1 %v10865_v34  ;;  %v10886_v34 = vld [vmem:[%s14825_s1 + $0x700] ss:$8 sps:$4 sm:$0xff]  }
 0xacc   :  { %5015 = vmatprep.subr.bf16.mxu1 %v10870_v53 }
 0xacf   :  { %5016 = vmatpush1.bf16.msra.mxu1 %v10868_v54  ;;  %v10894_v54 = vld [vmem:[%s14825_s1 + $0x714] ss:$8 sps:$4 sm:$0xff]  }
 0xad0   :  { %5017 = vmatprep.subr.bf16.mxu1 %v10873_v55  ;;  %v10892_v55 = vld [vmem:[%s14825_s1 + $0x710] ss:$8 sps:$4 sm:$0xff]  }
 0xad3   :  { %5018 = vmatpush1.bf16.msra.mxu1 %v10871_v56  ;;  %v10900_v56 = vld [vmem:[%s14825_s1 + $0x724] ss:$8 sps:$4 sm:$0xff]  }
 0xad4   :  { %5019 = vmatprep.subr.bf16.mxu1 %v10876_v57  ;;  %v10898_v57 = vld [vmem:[%s14825_s1 + $0x720] ss:$8 sps:$4 sm:$0xff]  }
 0xad7   :  { %5020 = vmatpush1.bf16.msra.mxu1 %v10874_v58  ;;  %v10906_v58 = vld [vmem:[%s14825_s1 + $0x734] ss:$8 sps:$4 sm:$0xff]  }
 0xad8   :  { %5021 = vmatprep.subr.bf16.mxu1 %v10879_v61  ;;  %v10904_v61 = vld [vmem:[%s14825_s1 + $0x730] ss:$8 sps:$4 sm:$0xff]  }
 0xadb   :  { %5022 = vmatpush1.bf16.msra.mxu1 %v10877_v62  ;;  %v13588_v63 = vpop.f32.mrb[36].mxu0  ;;  %v10912_v62 = vld [vmem:[%s14825_s1 + $0x744] ss:$8 sps:$4 sm:$0xff]  }
 0xadc   :  { %v13590_v48 = vpop.f32.mrb[37].mxu0  ;;  %5023 = vmatprep.subr.bf16.mxu1 %v10882_v1  ;;  %v10922_v1 = vld [vmem:[%s14825_s1 + $0x760] ss:$8 sps:$4 sm:$0xff]  }
 0xadd   :  { %v4767_v49 = vpop.f32.mrb[38].mxu0 }
 0xade   :  { %v4768_v0 = vpop.f32.mrb[39].mxu0  ;;  %v10916_v49 = vld [vmem:[%s14825_s1 + $0x750] ss:$8 sps:$4 sm:$0xff]  }
 0xadf   :  { %5024 = vmatpush1.bf16.msra.mxu1 %v10880_v2  ;;  %v10924_v0 = vld [vmem:[%s14825_s1 + $0x764] ss:$8 sps:$4 sm:$0xff]   ;;  %v10930_v2 = vld [vmem:[%s14825_s1 + $0x774] ss:$8 sps:$4 sm:$0xff]  }
 0xae0   :  { %5025 = vmatprep.subr.bf16.mxu1 %v10885_v3  ;;  %v10928_v3 = vld [vmem:[%s14825_s1 + $0x770] ss:$8 sps:$4 sm:$0xff]  }
 0xae3   :  { %5026 = vmatpush1.bf16.msra.mxu1 %v10883_v4  ;;  %v10936_v4 = vld [vmem:[%s14825_s1 + $0x784] ss:$8 sps:$4 sm:$0xff]  }
 0xae4   :  { %5478 = vmatprep.subr.bf16.mxu1 %v10888_v5  ;;  %v10934_v5 = vld [vmem:[%s14825_s1 + $0x780] ss:$8 sps:$4 sm:$0xff]  }
 0xb79   :  { %v4555_v40 = vpop.f32.mrb[32].mxu1 }
 0xb7a   :  { %v4764_v42 = vadd.f32 %v13588_v63, %v4555_v40  ;;  %v4557_v43 = vpop.f32.mrb[33].mxu1  ;;  %v10910_v63 = vld [vmem:[%s14825_s1 + $0x740] ss:$8 sps:$4 sm:$0xff]  }
 0xb7b   :  { %v4766_v44 = vadd.f32 %v13590_v48, %v4557_v43  ;;  %v4559_v45 = vpop.f32.mrb[34].mxu1  ;;  %v10918_v48 = vld [vmem:[%s14825_s1 + $0x754] ss:$8 sps:$4 sm:$0xff]  }
 0xb7c   :  { %v4783_v46 = vadd.f32 %v4776_v39, %v4764_v42  ;;  %v4560_v47 = vpop.f32.mrb[35].mxu1 }
 0xb7d   :  { %v4784_v50 = vadd.f32 %v4780_v41, %v4766_v44 }
 0xb7e   :  { %v4785_v51 = vmax.f32 %v4783_v46, 0.0  ;;  %v10984_v46 = vld [vmem:[%s14827_s4 + $0x700] ss:$8 sps:$4 sm:$0xff]  }
 0xb7f   :  { %v4786_v52 = vmax.f32 %v4784_v50, 0.0  ;;  %v10992_v50 = vld [vmem:[%s14827_s4 + $0x724] ss:$8 sps:$4 sm:$0xff]  }
 0xb80   :  { %v4787_v53 = vpack.c.bf16 %v4785_v51, %v4785_v51  ;;  %v10990_v51 = vld [vmem:[%s14827_s4 + $0x720] ss:$8 sps:$4 sm:$0xff]  }
 0xb81   :  { %v4788_v32 = vpack.c.bf16 %v4786_v52, %v4786_v52  ;;  %v10995_v52 = vld [vmem:[%s14827_s4 + $0x734] ss:$8 sps:$4 sm:$0xff]  }
 0xb83   :  { %5027 = vmatprep.mubr.bf16.mxu1 %v4788_v32  ;;  %v10993_v32 = vld [vmem:[%s14827_s4 + $0x730] ss:$8 sps:$4 sm:$0xff]  }
 0xb84   :  { %5028 = vmatmul.mubr.bf16.vlgmr.msra.gmra.mrb[36].mxu1 %v4787_v53  ;;  %v10996_v53 = vld [vmem:[%s14827_s4 + $0x740] ss:$8 sps:$4 sm:$0xff]  }
 0xb85   :  { %5479 = vmatpush1.bf16.msra.mxu1 %v10886_v34  ;;  %5510 = vmatprep.mubr.bf16.mxu1 %v9316_v24  ;;  %v10998_v34 = vld [vmem:[%s14827_s4 + $0x744] ss:$8 sps:$4 sm:$0xff]   ;;  %v11055_v24 = vld [vmem:[%s14828_s2 + $0x834] ss:$8 sps:$4 sm:$0xff]  }
 0xb86   :  { %5480 = vmatprep.subr.bf16.mxu1 %v10894_v54  ;;  %v11001_v54 = vld [vmem:[%s14827_s4 + $0x754] ss:$8 sps:$4 sm:$0xff]  }
 0xb89   :  { %5481 = vmatpush1.bf16.msra.mxu1 %v10892_v55  ;;  %v10999_v55 = vld [vmem:[%s14827_s4 + $0x750] ss:$8 sps:$4 sm:$0xff]  }
 0xb8a   :  { %5482 = vmatprep.subr.bf16.mxu1 %v10900_v56  ;;  %v11004_v56 = vld [vmem:[%s14827_s4 + $0x764] ss:$8 sps:$4 sm:$0xff]  }
 0xb8d   :  { %5483 = vmatpush1.bf16.msra.mxu1 %v10898_v57  ;;  %v11002_v57 = vld [vmem:[%s14827_s4 + $0x760] ss:$8 sps:$4 sm:$0xff]  }
 0xb8e   :  { %5484 = vmatprep.subr.bf16.mxu1 %v10906_v58  ;;  %v11007_v58 = vld [vmem:[%s14827_s4 + $0x774] ss:$8 sps:$4 sm:$0xff]  }
 0xb91   :  { %5485 = vmatpush1.bf16.msra.mxu1 %v10904_v61  ;;  %v11005_v61 = vld [vmem:[%s14827_s4 + $0x770] ss:$8 sps:$4 sm:$0xff]  }
 0xb92   :  { %5486 = vmatprep.subr.bf16.mxu1 %v10912_v62  ;;  %v11010_v62 = vld [vmem:[%s14827_s4 + $0x784] ss:$8 sps:$4 sm:$0xff]  }
 0xb95   :  { %5487 = vmatpush1.bf16.msra.mxu1 %v10910_v63  ;;  %v11008_v63 = vld [vmem:[%s14827_s4 + $0x780] ss:$8 sps:$4 sm:$0xff]  }
 0xb96   :  { %5488 = vmatprep.subr.bf16.mxu1 %v10918_v48  ;;  %v11013_v48 = vld [vmem:[%s14827_s4 + $0x794] ss:$8 sps:$4 sm:$0xff]  }
 0xb99   :  { %5489 = vmatpush1.bf16.msra.mxu1 %v10916_v49  ;;  %v11011_v49 = vld [vmem:[%s14827_s4 + $0x790] ss:$8 sps:$4 sm:$0xff]  }
 0xb9a   :  { %5490 = vmatprep.subr.bf16.mxu1 %v10924_v0  ;;  %v11016_v0 = vld [vmem:[%s14827_s4 + $0x7a4] ss:$8 sps:$4 sm:$0xff]  }
 0xb9d   :  { %5491 = vmatpush1.bf16.msra.mxu1 %v10922_v1  ;;  %v11014_v1 = vld [vmem:[%s14827_s4 + $0x7a0] ss:$8 sps:$4 sm:$0xff]  }
 0xb9e   :  { %5492 = vmatprep.subr.bf16.mxu1 %v10930_v2  ;;  %v11019_v2 = vld [vmem:[%s14827_s4 + $0x7b4] ss:$8 sps:$4 sm:$0xff]  }
 0xba1   :  { %5493 = vmatpush1.bf16.msra.mxu1 %v10928_v3  ;;  %v11017_v3 = vld [vmem:[%s14827_s4 + $0x7b0] ss:$8 sps:$4 sm:$0xff]  }
 0xba2   :  { %5494 = vmatprep.subr.bf16.mxu1 %v10936_v4  ;;  %v11022_v4 = vld [vmem:[%s14827_s4 + $0x7c4] ss:$8 sps:$4 sm:$0xff]  }
 0xba5   :  { %5495 = vmatpush1.bf16.msra.mxu1 %v10934_v5  ;;  %v11020_v5 = vld [vmem:[%s14827_s4 + $0x7c0] ss:$8 sps:$4 sm:$0xff]  }
 0xba6   :  { %5496 = vmatprep.subr.bf16.mxu1 %v10942_v8  ;;  %v11025_v8 = vld [vmem:[%s14827_s4 + $0x7d4] ss:$8 sps:$4 sm:$0xff]  }
 0xba9   :  { %5497 = vmatpush1.bf16.msra.mxu1 %v10940_v9  ;;  %v11023_v9 = vld [vmem:[%s14827_s4 + $0x7d0] ss:$8 sps:$4 sm:$0xff]  }
 0xbaa   :  { %5498 = vmatprep.subr.bf16.mxu1 %v10948_v10 }
 0xbad   :  { %5499 = vmatpush1.bf16.msra.mxu1 %v10946_v59 }
 0xbae   :  { %5500 = vmatprep.subr.bf16.mxu1 %v10954_v60 }
 0xbb1   :  { %5501 = vmatpush1.bf16.msra.mxu1 %v10952_v11 }
 0xbb2   :  { %5502 = vmatprep.subr.bf16.mxu1 %v10960_v12  ;;  %v11028_v12 = vld [vmem:[%s14827_s4 + $0x7e4] ss:$8 sps:$4 sm:$0xff]  }
 0xbb5   :  { %5503 = vmatpush1.bf16.msra.mxu1 %v10958_v13  ;;  %v11026_v13 = vld [vmem:[%s14827_s4 + $0x7e0] ss:$8 sps:$4 sm:$0xff]  }
 0xbb6   :  { %5504 = vmatprep.subr.bf16.mxu1 %v10966_v14  ;;  %v11031_v14 = vld [vmem:[%s14827_s4 + $0x7f4] ss:$8 sps:$4 sm:$0xff]  }
 0xbb9   :  { %5505 = vmatpush1.bf16.msra.mxu1 %v10964_v15  ;;  %v11029_v15 = vld [vmem:[%s14827_s4 + $0x7f0] ss:$8 sps:$4 sm:$0xff]  }
 0xbba   :  { %5506 = vmatprep.subr.bf16.mxu1 %v10972_v16  ;;  %v11034_v16 = vld [vmem:[%s14825_s1 + $0x804] ss:$8 sps:$4 sm:$0xff]  }
 0xbbd   :  { %5507 = vmatpush1.bf16.msra.mxu1 %v10970_v19  ;;  %v11035_v19 = vld [vmem:[%s14828_s2 + $0x800] ss:$8 sps:$4 sm:$0xff]  }
 0xbbe   :  { %5508 = vmatprep.subr.bf16.mxu1 %v10978_v6  ;;  %v11043_v6 = vld [vmem:[%s14828_s2 + $0x814] ss:$8 sps:$4 sm:$0xff]  }
 0xbc1   :  { %5509 = vmatpush1.bf16.msra.mxu1 %v10976_v7  ;;  %v11047_v7 = vld [vmem:[%s14828_s2 + $0x820] ss:$8 sps:$4 sm:$0xff]  }
 0xbc2   :  { %6019 = vmatprep.subr.bf16.mxu1 %v11037_v20  ;;  %v11086_v20 = vld [vmem:[%s14825_s1 + $0x890] ss:$8 sps:$4 sm:$0xff]  }
 0xbc4   :  { %5511 = vmatmul.mubr.bf16.vlgmr.msra.gmra.mrb[40].mxu1 %v9315_v26  ;;  %v11061_v26 = vld [vmem:[%s14828_s2 + $0x844] ss:$8 sps:$4 sm:$0xff]  }
 0xbc5   :  { %6020 = vmatpush1.bf16.msra.mxu1 %v11035_v19  ;;  %v11088_v19 = vld [vmem:[%s14825_s1 + $0x894] ss:$8 sps:$4 sm:$0xff]  }
 0xbc6   :  { %6021 = vmatprep.subr.bf16.mxu1 %v11043_v6  ;;  %v11092_v6 = vld [vmem:[%s14825_s1 + $0x8a0] ss:$8 sps:$4 sm:$0xff]  }
 0xbc9   :  { %6022 = vmatpush1.bf16.msra.mxu1 %v11041_v21  ;;  %v11094_v21 = vld [vmem:[%s14825_s1 + $0x8a4] ss:$8 sps:$4 sm:$0xff]  }
 0xbca   :  { %6023 = vmatprep.subr.bf16.mxu1 %v11049_v22  ;;  %v11098_v22 = vld [vmem:[%s14825_s1 + $0x8b0] ss:$8 sps:$4 sm:$0xff]  }
 0xbcd   :  { %6024 = vmatpush1.bf16.msra.mxu1 %v11047_v7  ;;  %v11100_v7 = vld [vmem:[%s14825_s1 + $0x8b4] ss:$8 sps:$4 sm:$0xff]  }
 0xbce   :  { %6025 = vmatprep.subr.bf16.mxu1 %v11055_v24  ;;  %v11104_v24 = vld [vmem:[%s14825_s1 + $0x8c0] ss:$8 sps:$4 sm:$0xff]  }
 0xbd1   :  { %6026 = vmatpush1.bf16.msra.mxu1 %v11053_v23  ;;  %v11106_v23 = vld [vmem:[%s14825_s1 + $0x8c4] ss:$8 sps:$4 sm:$0xff]  }
 0xbd2   :  { %6027 = vmatprep.subr.bf16.mxu1 %v11061_v26  ;;  %v11110_v26 = vld [vmem:[%s14825_s1 + $0x8d0] ss:$8 sps:$4 sm:$0xff]  }
 0xbd5   :  { %6028 = vmatpush1.bf16.msra.mxu1 %v11059_v25  ;;  %v11112_v25 = vld [vmem:[%s14825_s1 + $0x8d4] ss:$8 sps:$4 sm:$0xff]  }
 0xbd6   :  { %6029 = vmatprep.subr.bf16.mxu1 %v11067_v30  ;;  %v11116_v30 = vld [vmem:[%s14825_s1 + $0x8e0] ss:$8 sps:$4 sm:$0xff]  }
 0xbd9   :  { %6030 = vmatpush1.bf16.msra.mxu1 %v11065_v27  ;;  %v11118_v27 = vld [vmem:[%s14825_s1 + $0x8e4] ss:$8 sps:$4 sm:$0xff]  }
 0xc57   :  { %v5029_v17 = vpop.f32.mrb[36].mxu1 }
 0xc58   :  { %v5030_v18 = vadd.f32 %v5029_v17, %v4828_v31  ;;  %v5031_v37 = vpop.f32.mrb[37].mxu1  ;;  %v11071_v31 = vld [vmem:[%s14828_s2 + $0x860] ss:$8 sps:$4 sm:$0xff]   ;;  %v11077_v17 = vld [vmem:[%s14828_s2 + $0x870] ss:$8 sps:$4 sm:$0xff]  }
 0xc59   :  { %v5032_v38 = vadd.f32 %v5031_v37, %v4832_v33  ;;  %v5033_v39 = vpop.f32.mrb[38].mxu1  ;;  %v11073_v33 = vld [vmem:[%s14828_s2 + $0x864] ss:$8 sps:$4 sm:$0xff]   ;;  %v11083_v37 = vld [vmem:[%s14828_s2 + $0x880] ss:$8 sps:$4 sm:$0xff]  }
 0xc5a   :  { %v5036_v40 = vadd.f32 %v5030_v18, %v13499_v28  ;;  %v5034_v41 = vpop.f32.mrb[39].mxu1  ;;  %v10989_v28 = vld [vmem:[%s14827_s4 + $0x714] ss:$8 sps:$4 sm:$0xff]   ;;  %6031 = vmatprep.subr.bf16.mxu1 %v11073_v33  ;;  %v11089_v39 = vld [vmem:[%s14828_s2 + $0x890] ss:$8 sps:$4 sm:$0xff]  }
 0xc5b   :  { %v5037_v42 = vadd.f32 %v5032_v38, %v13501_v29  ;;  %v10987_v29 = vld [vmem:[%s14827_s4 + $0x710] ss:$8 sps:$4 sm:$0xff]   ;;  %6032 = vmatpush1.bf16.msra.mxu1 %v11071_v31  ;;  %v11079_v18 = vld [vmem:[%s14828_s2 + $0x874] ss:$8 sps:$4 sm:$0xff]   ;;  %v11085_v38 = vld [vmem:[%s14828_s2 + $0x884] ss:$8 sps:$4 sm:$0xff]  }
 0xc5c   :  { %v13816_v43 = vmax.f32 %v5036_v40, 0.0  ;;  %6033 = vmatprep.subr.bf16.mxu1 %v11079_v18  ;;  %v11091_v40 = vld [vmem:[%s14828_s2 + $0x894] ss:$8 sps:$4 sm:$0xff]   ;;  %v11095_v41 = vld [vmem:[%s14828_s2 + $0x8a0] ss:$8 sps:$4 sm:$0xff]  }
 0xc5d   :  { %v13818_v44 = vmax.f32 %v5037_v42, 0.0  ;;  %v11097_v42 = vld [vmem:[%s14828_s2 + $0x8a4] ss:$8 sps:$4 sm:$0xff]   ;;  %v11119_v33 = vld [vmem:[%s14828_s2 + $0x8e0] ss:$8 sps:$4 sm:$0xff]  }
 0xc5e   :  { %v5040_v47 = vpack.c.bf16 %v13816_v43, %v13816_v43  ;;  %v11121_v31 = vld [vmem:[%s14828_s2 + $0x8e4] ss:$8 sps:$4 sm:$0xff]   ;;  %v11122_v18 = vld [vmem:[%s14825_s1 + $0x8f0] ss:$8 sps:$4 sm:$0xff]  }
 0xc5f   :  { %v5041_v45 = vpack.c.bf16 %v13818_v44, %v13818_v44  ;;  %6034 = vmatpush1.bf16.msra.mxu1 %v11077_v17  ;;  %v11124_v17 = vld [vmem:[%s14825_s1 + $0x8f4] ss:$8 sps:$4 sm:$0xff]  }
 0xc60   :  { %6035 = vmatprep.subr.bf16.mxu1 %v11085_v38  ;;  %v11127_v38 = vld [vmem:[%s14828_s2 + $0x8f4] ss:$8 sps:$4 sm:$0xff]  }
 0xc61   :  { %5302 = vmatprep.mubr.bf16.mxu0 %v5041_v45  ;;  %v11101_v45 = vld [vmem:[%s14828_s2 + $0x8b0] ss:$8 sps:$4 sm:$0xff]  }
 0xc62   :  { %5303 = vmatmul.mubr.bf16.vlgmr.msra.gmra.mrb[40].mxu0 %v5040_v47  ;;  %v11107_v47 = vld [vmem:[%s14828_s2 + $0x8c0] ss:$8 sps:$4 sm:$0xff]  }
 0xc63   :  { %5745 = vmatpush1.bf16.msra.mxu0 %v10984_v46  ;;  %6036 = vmatpush1.bf16.msra.mxu1 %v11083_v37  ;;  %v11103_v46 = vld [vmem:[%s14828_s2 + $0x8b4] ss:$8 sps:$4 sm:$0xff]   ;;  %v9415_v37 = vld [vmem:[%s14826_s0 + $0x40] sm:$0xff] }
 0xc64   :  { %5746 = vmatprep.subr.bf16.mxu0 %v10989_v28  ;;  %6037 = vmatprep.subr.bf16.mxu1 %v11091_v40  ;;  %v11109_v28 = vld [vmem:[%s14828_s2 + $0x8c4] ss:$8 sps:$4 sm:$0xff]   ;;  %v11125_v40 = vld [vmem:[%s14828_s2 + $0x8f0] ss:$8 sps:$4 sm:$0xff]  }
 0xc67   :  { %5747 = vmatpush1.bf16.msra.mxu0 %v10987_v29  ;;  %6038 = vmatpush1.bf16.msra.mxu1 %v11089_v39  ;;  %v11113_v29 = vld [vmem:[%s14828_s2 + $0x8d0] ss:$8 sps:$4 sm:$0xff]   ;;  %v9513_v39 = vcombine.high %v9415_v37, %v9415_v37 }
 0xc68   :  { %5748 = vmatprep.subr.bf16.mxu0 %v10992_v50  ;;  %6039 = vmatprep.subr.bf16.mxu1 %v11097_v42  ;;  %v11115_v50 = vld [vmem:[%s14828_s2 + $0x8d4] ss:$8 sps:$4 sm:$0xff]   ;;  %v11132_v42 = vld [vmem:[%s14827_s4 + $0x804] ss:$8 sps:$4 sm:$0xff]  }
 0xc6b   :  { %5749 = vmatpush1.bf16.msra.mxu0 %v10990_v51  ;;  %6040 = vmatpush1.bf16.msra.mxu1 %v11095_v41  ;;  %v9349_v51 = vld [vmem:[%s14829_s3 + $0xe] sm:$0x3]  ;;  %v9512_v41 = vcombine.low %v9415_v37, %v9415_v37 }
 0xc6c   :  { %5750 = vmatprep.subr.bf16.mxu0 %v10995_v52  ;;  %6041 = vmatprep.subr.bf16.mxu1 %v11103_v46  ;;  %v5525_v52 = vrot.slane %v9349_v51, %v11792_v35  ;;  %v11195_v37 = vld [vmem:[%s14828_s2 + $0x924] ss:$8 sps:$4 sm:$0xff]  }
 0xc6f   :  { %5751 = vmatpush1.bf16.msra.mxu0 %v10993_v32  ;;  %6042 = vmatpush1.bf16.msra.mxu1 %v11101_v45  ;;  %v9382_v45 = vld [vmem:[%s14830_s5 + $0xe] sm:$0x3] }
 0xc70   :  { %5752 = vmatprep.subr.bf16.mxu0 %v10998_v34  ;;  %6043 = vmatprep.subr.bf16.mxu1 %v11109_v28  ;;  %v5529_v34 = vrot.slane %v9349_v51, %v11794_v36  ;;  %v5577_v46 = vrot.slane %v9382_v45, %v11792_v35 }
 0xc73   :  { %5753 = vmatpush1.bf16.msra.mxu0 %v10996_v53  ;;  %6044 = vmatpush1.bf16.msra.mxu1 %v11107_v47  ;;  %v5581_v47 = vrot.slane %v9382_v45, %v11794_v36  ;;  %v11213_v45 = vld [vmem:[%s14828_s2 + $0x954] ss:$8 sps:$4 sm:$0xff]  }
 0xc74   :  { %5754 = vmatprep.subr.bf16.mxu0 %v11001_v54  ;;  %6045 = vmatprep.subr.bf16.mxu1 %v11115_v50 }
 0xc77   :  { %5755 = vmatpush1.bf16.msra.mxu0 %v10999_v55  ;;  %6046 = vmatpush1.bf16.msra.mxu1 %v11113_v29 }
 0xc78   :  { %5756 = vmatprep.subr.bf16.mxu0 %v11004_v56  ;;  %6047 = vmatprep.subr.bf16.mxu1 %v11121_v31  ;;  %v11183_v31 = vld [vmem:[%s14828_s2 + $0x904] ss:$8 sps:$4 sm:$0xff]  }
 0xc7b   :  { %5757 = vmatpush1.bf16.msra.mxu0 %v11002_v57  ;;  %6048 = vmatpush1.bf16.msra.mxu1 %v11119_v33  ;;  %v11187_v33 = vld [vmem:[%s14828_s2 + $0x910] ss:$8 sps:$4 sm:$0xff]  }
 0xc7c   :  { %5758 = vmatprep.subr.bf16.mxu0 %v11007_v58  ;;  %6049 = vmatprep.subr.bf16.mxu1 %v11127_v38  ;;  %v11199_v38 = vld [vmem:[%s14828_s2 + $0x930] ss:$8 sps:$4 sm:$0xff]  }
 0xc7f   :  { %5759 = vmatpush1.bf16.msra.mxu0 %v11005_v61  ;;  %6050 = vmatpush1.bf16.msra.mxu1 %v11125_v40  ;;  %v11205_v40 = vld [vmem:[%s14828_s2 + $0x940] ss:$8 sps:$4 sm:$0xff]  }
 0xc80   :  { %5760 = vmatprep.subr.bf16.mxu0 %v11010_v62  ;;  %6493 = vmatprep.subr.bf16.mxu1 %v11132_v42  ;;  %v11211_v42 = vld [vmem:[%s14828_s2 + $0x950] ss:$8 sps:$4 sm:$0xff]  }
 0xc83   :  { %5761 = vmatpush1.bf16.msra.mxu0 %v11008_v63 }
 0xc84   :  { %5762 = vmatprep.subr.bf16.mxu0 %v11013_v48 }
 0xc87   :  { %5763 = vmatpush1.bf16.msra.mxu0 %v11011_v49  ;;  %v11032_v49 = vld [vmem:[%s14825_s1 + $0x800] ss:$8 sps:$4 sm:$0xff]  }
 0xc88   :  { %5764 = vmatprep.subr.bf16.mxu0 %v11016_v0 }
 0xc8b   :  { %5765 = vmatpush1.bf16.msra.mxu0 %v11014_v1  ;;  %v11040_v1 = vld [vmem:[%s14825_s1 + $0x814] ss:$8 sps:$4 sm:$0xff]  }
 0xc8c   :  { %5766 = vmatprep.subr.bf16.mxu0 %v11019_v2  ;;  %v11038_v2 = vld [vmem:[%s14825_s1 + $0x810] ss:$8 sps:$4 sm:$0xff]  }
 0xc8f   :  { %5767 = vmatpush1.bf16.msra.mxu0 %v11017_v3  ;;  %v11046_v3 = vld [vmem:[%s14825_s1 + $0x824] ss:$8 sps:$4 sm:$0xff]  }
 0xc90   :  { %5768 = vmatprep.subr.bf16.mxu0 %v11022_v4  ;;  %v11044_v4 = vld [vmem:[%s14825_s1 + $0x820] ss:$8 sps:$4 sm:$0xff]  }
 0xc93   :  { %5769 = vmatpush1.bf16.msra.mxu0 %v11020_v5  ;;  %v11052_v5 = vld [vmem:[%s14825_s1 + $0x834] ss:$8 sps:$4 sm:$0xff]  }
 0xc94   :  { %5770 = vmatprep.subr.bf16.mxu0 %v11025_v8  ;;  %v11050_v8 = vld [vmem:[%s14825_s1 + $0x830] ss:$8 sps:$4 sm:$0xff]  }
 0xc97   :  { %5771 = vmatpush1.bf16.msra.mxu0 %v11023_v9  ;;  %v13905_v10 = vpop.f32.mrb[40].mxu1  ;;  %v11058_v9 = vld [vmem:[%s14825_s1 + $0x844] ss:$8 sps:$4 sm:$0xff]  }
 0xc98   :  { %v13907_v59 = vpop.f32.mrb[41].mxu1  ;;  %5772 = vmatprep.subr.bf16.mxu0 %v11028_v12  ;;  %v11068_v12 = vld [vmem:[%s14825_s1 + $0x860] ss:$8 sps:$4 sm:$0xff]  }
 0xc99   :  { %v5516_v60 = vpop.f32.mrb[42].mxu1 }
 0xc9a   :  { %v5517_v11 = vpop.f32.mrb[43].mxu1  ;;  %v11062_v60 = vld [vmem:[%s14825_s1 + $0x850] ss:$8 sps:$4 sm:$0xff]  }
 0xc9b   :  { %5773 = vmatpush1.bf16.msra.mxu0 %v11026_v13  ;;  %v11070_v11 = vld [vmem:[%s14825_s1 + $0x864] ss:$8 sps:$4 sm:$0xff]   ;;  %v11076_v13 = vld [vmem:[%s14825_s1 + $0x874] ss:$8 sps:$4 sm:$0xff]  }
 0xc9c   :  { %5774 = vmatprep.subr.bf16.mxu0 %v11031_v14  ;;  %v11074_v14 = vld [vmem:[%s14825_s1 + $0x870] ss:$8 sps:$4 sm:$0xff]  }
 0xc9f   :  { %5775 = vmatpush1.bf16.msra.mxu0 %v11029_v15  ;;  %v11082_v15 = vld [vmem:[%s14825_s1 + $0x884] ss:$8 sps:$4 sm:$0xff]  }
 0xca0   :  { %6227 = vmatprep.subr.bf16.mxu0 %v11034_v16  ;;  %v11080_v16 = vld [vmem:[%s14825_s1 + $0x880] ss:$8 sps:$4 sm:$0xff]  }
 0xd35   :  { %v5304_v32 = vpop.f32.mrb[40].mxu0 }
 0xd36   :  { %v5513_v53 = vadd.f32 %v13905_v10, %v5304_v32  ;;  %v5306_v54 = vpop.f32.mrb[41].mxu0  ;;  %v11056_v10 = vld [vmem:[%s14825_s1 + $0x840] ss:$8 sps:$4 sm:$0xff]  }
 0xd37   :  { %v5515_v55 = vadd.f32 %v13907_v59, %v5306_v54  ;;  %v5308_v56 = vpop.f32.mrb[42].mxu0  ;;  %v11064_v59 = vld [vmem:[%s14825_s1 + $0x854] ss:$8 sps:$4 sm:$0xff]  }
 0xd38   :  { %v5532_v57 = vadd.f32 %v5525_v52, %v5513_v53  ;;  %v5309_v58 = vpop.f32.mrb[43].mxu0 }
 0xd39   :  { %v5533_v61 = vadd.f32 %v5529_v34, %v5515_v55 }
 0xd3a   :  { %v5534_v62 = vmax.f32 %v5532_v57, 0.0  ;;  %v11130_v57 = vld [vmem:[%s14827_s4 + $0x800] ss:$8 sps:$4 sm:$0xff]  }
 0xd3b   :  { %v5535_v63 = vmax.f32 %v5533_v61, 0.0  ;;  %v11138_v61 = vld [vmem:[%s14827_s4 + $0x824] ss:$8 sps:$4 sm:$0xff]  }
 0xd3c   :  { %v5536_v0 = vpack.c.bf16 %v5534_v62, %v5534_v62  ;;  %v11136_v62 = vld [vmem:[%s14827_s4 + $0x820] ss:$8 sps:$4 sm:$0xff]  }
 0xd3d   :  { %v5537_v48 = vpack.c.bf16 %v5535_v63, %v5535_v63  ;;  %v11141_v63 = vld [vmem:[%s14827_s4 + $0x834] ss:$8 sps:$4 sm:$0xff]  }
 0xd3f   :  { %5776 = vmatprep.mubr.bf16.mxu0 %v5537_v48  ;;  %v11139_v48 = vld [vmem:[%s14827_s4 + $0x830] ss:$8 sps:$4 sm:$0xff]  }
 0xd40   :  { %5777 = vmatmul.mubr.bf16.vlgmr.msra.gmra.mrb[44].mxu0 %v5536_v0  ;;  %v11142_v0 = vld [vmem:[%s14827_s4 + $0x840] ss:$8 sps:$4 sm:$0xff]  }
 0xd41   :  { %6228 = vmatpush1.bf16.msra.mxu0 %v11032_v49  ;;  %6259 = vmatprep.mubr.bf16.mxu0 %v9513_v39  ;;  %v11144_v49 = vld [vmem:[%s14827_s4 + $0x844] ss:$8 sps:$4 sm:$0xff]   ;;  %v11201_v39 = vld [vmem:[%s14828_s2 + $0x934] ss:$8 sps:$4 sm:$0xff]  }
 0xd42   :  { %6229 = vmatprep.subr.bf16.mxu0 %v11040_v1  ;;  %v11147_v1 = vld [vmem:[%s14827_s4 + $0x854] ss:$8 sps:$4 sm:$0xff]  }
 0xd45   :  { %6230 = vmatpush1.bf16.msra.mxu0 %v11038_v2  ;;  %v11145_v2 = vld [vmem:[%s14827_s4 + $0x850] ss:$8 sps:$4 sm:$0xff]  }
 0xd46   :  { %6231 = vmatprep.subr.bf16.mxu0 %v11046_v3  ;;  %v11150_v3 = vld [vmem:[%s14827_s4 + $0x864] ss:$8 sps:$4 sm:$0xff]  }
 0xd49   :  { %6232 = vmatpush1.bf16.msra.mxu0 %v11044_v4  ;;  %v11148_v4 = vld [vmem:[%s14827_s4 + $0x860] ss:$8 sps:$4 sm:$0xff]  }
 0xd4a   :  { %6233 = vmatprep.subr.bf16.mxu0 %v11052_v5  ;;  %v11153_v5 = vld [vmem:[%s14827_s4 + $0x874] ss:$8 sps:$4 sm:$0xff]  }
 0xd4d   :  { %6234 = vmatpush1.bf16.msra.mxu0 %v11050_v8  ;;  %v11151_v8 = vld [vmem:[%s14827_s4 + $0x870] ss:$8 sps:$4 sm:$0xff]  }
 0xd4e   :  { %6235 = vmatprep.subr.bf16.mxu0 %v11058_v9  ;;  %v11156_v9 = vld [vmem:[%s14827_s4 + $0x884] ss:$8 sps:$4 sm:$0xff]  }
 0xd51   :  { %6236 = vmatpush1.bf16.msra.mxu0 %v11056_v10  ;;  %v11154_v10 = vld [vmem:[%s14827_s4 + $0x880] ss:$8 sps:$4 sm:$0xff]  }
 0xd52   :  { %6237 = vmatprep.subr.bf16.mxu0 %v11064_v59  ;;  %v11159_v59 = vld [vmem:[%s14827_s4 + $0x894] ss:$8 sps:$4 sm:$0xff]  }
 0xd55   :  { %6238 = vmatpush1.bf16.msra.mxu0 %v11062_v60  ;;  %v11157_v60 = vld [vmem:[%s14827_s4 + $0x890] ss:$8 sps:$4 sm:$0xff]  }
 0xd56   :  { %6239 = vmatprep.subr.bf16.mxu0 %v11070_v11  ;;  %v11162_v11 = vld [vmem:[%s14827_s4 + $0x8a4] ss:$8 sps:$4 sm:$0xff]  }
 0xd59   :  { %6240 = vmatpush1.bf16.msra.mxu0 %v11068_v12  ;;  %v11160_v12 = vld [vmem:[%s14827_s4 + $0x8a0] ss:$8 sps:$4 sm:$0xff]  }
 0xd5a   :  { %6241 = vmatprep.subr.bf16.mxu0 %v11076_v13  ;;  %v11165_v13 = vld [vmem:[%s14827_s4 + $0x8b4] ss:$8 sps:$4 sm:$0xff]  }
 0xd5d   :  { %6242 = vmatpush1.bf16.msra.mxu0 %v11074_v14  ;;  %v11163_v14 = vld [vmem:[%s14827_s4 + $0x8b0] ss:$8 sps:$4 sm:$0xff]  }
 0xd5e   :  { %6243 = vmatprep.subr.bf16.mxu0 %v11082_v15  ;;  %v11168_v15 = vld [vmem:[%s14827_s4 + $0x8c4] ss:$8 sps:$4 sm:$0xff]  }
 0xd61   :  { %6244 = vmatpush1.bf16.msra.mxu0 %v11080_v16  ;;  %v11166_v16 = vld [vmem:[%s14827_s4 + $0x8c0] ss:$8 sps:$4 sm:$0xff]  }
 0xd62   :  { %6245 = vmatprep.subr.bf16.mxu0 %v11088_v19  ;;  %v11171_v19 = vld [vmem:[%s14827_s4 + $0x8d4] ss:$8 sps:$4 sm:$0xff]  }
 0xd65   :  { %6246 = vmatpush1.bf16.msra.mxu0 %v11086_v20  ;;  %v11169_v20 = vld [vmem:[%s14827_s4 + $0x8d0] ss:$8 sps:$4 sm:$0xff]  }
 0xd66   :  { %6247 = vmatprep.subr.bf16.mxu0 %v11094_v21 }
 0xd69   :  { %6248 = vmatpush1.bf16.msra.mxu0 %v11092_v6 }
 0xd6a   :  { %6249 = vmatprep.subr.bf16.mxu0 %v11100_v7 }
 0xd6d   :  { %6250 = vmatpush1.bf16.msra.mxu0 %v11098_v22 }
 0xd6e   :  { %6251 = vmatprep.subr.bf16.mxu0 %v11106_v23  ;;  %v11174_v23 = vld [vmem:[%s14827_s4 + $0x8e4] ss:$8 sps:$4 sm:$0xff]  }
 0xd71   :  { %6252 = vmatpush1.bf16.msra.mxu0 %v11104_v24  ;;  %v11172_v24 = vld [vmem:[%s14827_s4 + $0x8e0] ss:$8 sps:$4 sm:$0xff]  }
 0xd72   :  { %6253 = vmatprep.subr.bf16.mxu0 %v11112_v25  ;;  %v11177_v25 = vld [vmem:[%s14827_s4 + $0x8f4] ss:$8 sps:$4 sm:$0xff]  }
 0xd75   :  { %6254 = vmatpush1.bf16.msra.mxu0 %v11110_v26  ;;  %v11175_v26 = vld [vmem:[%s14827_s4 + $0x8f0] ss:$8 sps:$4 sm:$0xff]  }
 0xd76   :  { %6255 = vmatprep.subr.bf16.mxu0 %v11118_v27  ;;  %v11180_v27 = vld [vmem:[%s14825_s1 + $0x904] ss:$8 sps:$4 sm:$0xff]  }
 0xd79   :  { %6256 = vmatpush1.bf16.msra.mxu0 %v11116_v30  ;;  %v11181_v30 = vld [vmem:[%s14828_s2 + $0x900] ss:$8 sps:$4 sm:$0xff]  }
 0xd7a   :  { %6257 = vmatprep.subr.bf16.mxu0 %v11124_v17  ;;  %v11189_v17 = vld [vmem:[%s14828_s2 + $0x914] ss:$8 sps:$4 sm:$0xff]  }
 0xd7d   :  { %6258 = vmatpush1.bf16.msra.mxu0 %v11122_v18  ;;  %v11193_v18 = vld [vmem:[%s14828_s2 + $0x920] ss:$8 sps:$4 sm:$0xff]  }
 0xd7e   :  { %6768 = vmatprep.subr.bf16.mxu0 %v11183_v31  ;;  %v11232_v31 = vld [vmem:[%s14825_s1 + $0x990] ss:$8 sps:$4 sm:$0xff]  }
 0xd80   :  { %6260 = vmatmul.mubr.bf16.vlgmr.msra.gmra.mrb[48].mxu0 %v9512_v41  ;;  %v11207_v41 = vld [vmem:[%s14828_s2 + $0x944] ss:$8 sps:$4 sm:$0xff]  }
 0xd81   :  { %6769 = vmatpush1.bf16.msra.mxu0 %v11181_v30  ;;  %v11234_v30 = vld [vmem:[%s14825_s1 + $0x994] ss:$8 sps:$4 sm:$0xff]  }
 0xd82   :  { %6770 = vmatprep.subr.bf16.mxu0 %v11189_v17  ;;  %v11238_v17 = vld [vmem:[%s14825_s1 + $0x9a0] ss:$8 sps:$4 sm:$0xff]  }
 0xd85   :  { %6771 = vmatpush1.bf16.msra.mxu0 %v11187_v33  ;;  %v11240_v33 = vld [vmem:[%s14825_s1 + $0x9a4] ss:$8 sps:$4 sm:$0xff]  }
 0xd86   :  { %6772 = vmatprep.subr.bf16.mxu0 %v11195_v37  ;;  %v11244_v37 = vld [vmem:[%s14825_s1 + $0x9b0] ss:$8 sps:$4 sm:$0xff]  }
 0xd89   :  { %6773 = vmatpush1.bf16.msra.mxu0 %v11193_v18  ;;  %v11246_v18 = vld [vmem:[%s14825_s1 + $0x9b4] ss:$8 sps:$4 sm:$0xff]  }
 0xd8a   :  { %6774 = vmatprep.subr.bf16.mxu0 %v11201_v39  ;;  %v11250_v39 = vld [vmem:[%s14825_s1 + $0x9c0] ss:$8 sps:$4 sm:$0xff]  }
 0xd8d   :  { %6775 = vmatpush1.bf16.msra.mxu0 %v11199_v38  ;;  %v11252_v38 = vld [vmem:[%s14825_s1 + $0x9c4] ss:$8 sps:$4 sm:$0xff]  }
 0xd8e   :  { %6776 = vmatprep.subr.bf16.mxu0 %v11207_v41  ;;  %v11256_v41 = vld [vmem:[%s14825_s1 + $0x9d0] ss:$8 sps:$4 sm:$0xff]  }
 0xd91   :  { %6777 = vmatpush1.bf16.msra.mxu0 %v11205_v40  ;;  %v11258_v40 = vld [vmem:[%s14825_s1 + $0x9d4] ss:$8 sps:$4 sm:$0xff]  }
 0xd92   :  { %6778 = vmatprep.subr.bf16.mxu0 %v11213_v45  ;;  %v11262_v45 = vld [vmem:[%s14825_s1 + $0x9e0] ss:$8 sps:$4 sm:$0xff]  }
 0xd95   :  { %6779 = vmatpush1.bf16.msra.mxu0 %v11211_v42  ;;  %v11264_v42 = vld [vmem:[%s14825_s1 + $0x9e4] ss:$8 sps:$4 sm:$0xff]  }
 0xe13   :  { %v5778_v28 = vpop.f32.mrb[44].mxu0 }
 0xe14   :  { %v5779_v29 = vadd.f32 %v5778_v28, %v5577_v46  ;;  %v5780_v50 = vpop.f32.mrb[45].mxu0  ;;  %v11217_v46 = vld [vmem:[%s14828_s2 + $0x960] ss:$8 sps:$4 sm:$0xff]   ;;  %v11223_v28 = vld [vmem:[%s14828_s2 + $0x970] ss:$8 sps:$4 sm:$0xff]  }
 0xe15   :  { %v5781_v51 = vadd.f32 %v5780_v50, %v5581_v47  ;;  %v5782_v52 = vpop.f32.mrb[46].mxu0  ;;  %v11219_v47 = vld [vmem:[%s14828_s2 + $0x964] ss:$8 sps:$4 sm:$0xff]   ;;  %v11229_v50 = vld [vmem:[%s14828_s2 + $0x980] ss:$8 sps:$4 sm:$0xff]  }
 0xe16   :  { %v5785_v32 = vadd.f32 %v5779_v29, %v13816_v43  ;;  %v5783_v34 = vpop.f32.mrb[47].mxu0  ;;  %v11135_v43 = vld [vmem:[%s14827_s4 + $0x814] ss:$8 sps:$4 sm:$0xff]   ;;  %6780 = vmatprep.subr.bf16.mxu0 %v11219_v47  ;;  %v11235_v52 = vld [vmem:[%s14828_s2 + $0x990] ss:$8 sps:$4 sm:$0xff]  }
 0xe17   :  { %v5786_v53 = vadd.f32 %v5781_v51, %v13818_v44  ;;  %v11133_v44 = vld [vmem:[%s14827_s4 + $0x810] ss:$8 sps:$4 sm:$0xff]   ;;  %6781 = vmatpush1.bf16.msra.mxu0 %v11217_v46  ;;  %v11225_v29 = vld [vmem:[%s14828_s2 + $0x974] ss:$8 sps:$4 sm:$0xff]   ;;  %v11231_v51 = vld [vmem:[%s14828_s2 + $0x984] ss:$8 sps:$4 sm:$0xff]  }
 0xe18   :  { %v14133_v54 = vmax.f32 %v5785_v32, 0.0  ;;  %6782 = vmatprep.subr.bf16.mxu0 %v11225_v29  ;;  %v11237_v32 = vld [vmem:[%s14828_s2 + $0x994] ss:$8 sps:$4 sm:$0xff]   ;;  %v11241_v34 = vld [vmem:[%s14828_s2 + $0x9a0] ss:$8 sps:$4 sm:$0xff]  }
 0xe19   :  { %v14135_v55 = vmax.f32 %v5786_v53, 0.0  ;;  %v11243_v53 = vld [vmem:[%s14828_s2 + $0x9a4] ss:$8 sps:$4 sm:$0xff]   ;;  %v11265_v47 = vld [vmem:[%s14828_s2 + $0x9e0] ss:$8 sps:$4 sm:$0xff]  }
 0xe1a   :  { %v5789_v58 = vpack.c.bf16 %v14133_v54, %v14133_v54  ;;  %v11267_v46 = vld [vmem:[%s14828_s2 + $0x9e4] ss:$8 sps:$4 sm:$0xff]   ;;  %v11268_v29 = vld [vmem:[%s14825_s1 + $0x9f0] ss:$8 sps:$4 sm:$0xff]  }
 0xe1b   :  { %v5790_v56 = vpack.c.bf16 %v14135_v55, %v14135_v55  ;;  %6783 = vmatpush1.bf16.msra.mxu0 %v11223_v28  ;;  %v11270_v28 = vld [vmem:[%s14825_s1 + $0x9f4] ss:$8 sps:$4 sm:$0xff]  }
 0xe1c   :  { %6784 = vmatprep.subr.bf16.mxu0 %v11231_v51  ;;  %v11273_v51 = vld [vmem:[%s14828_s2 + $0x9f4] ss:$8 sps:$4 sm:$0xff]  }
 0xe1d   :  { %6051 = vmatprep.mubr.bf16.mxu1 %v5790_v56  ;;  %v11247_v56 = vld [vmem:[%s14828_s2 + $0x9b0] ss:$8 sps:$4 sm:$0xff]  }
 0xe1e   :  { %6052 = vmatmul.mubr.bf16.vlgmr.msra.gmra.mrb[44].mxu1 %v5789_v58  ;;  %v11253_v58 = vld [vmem:[%s14828_s2 + $0x9c0] ss:$8 sps:$4 sm:$0xff]  }
 0xe1f   :  { %6494 = vmatpush1.bf16.msra.mxu1 %v11130_v57  ;;  %6785 = vmatpush1.bf16.msra.mxu0 %v11229_v50  ;;  %v11249_v57 = vld [vmem:[%s14828_s2 + $0x9b4] ss:$8 sps:$4 sm:$0xff]   ;;  %v9612_v50 = vld [vmem:[%s14826_s0 + $0x48] sm:$0xff] }
 0xe20   :  { %6495 = vmatprep.subr.bf16.mxu1 %v11135_v43  ;;  %6786 = vmatprep.subr.bf16.mxu0 %v11237_v32  ;;  %v11255_v43 = vld [vmem:[%s14828_s2 + $0x9c4] ss:$8 sps:$4 sm:$0xff]   ;;  %v11271_v32 = vld [vmem:[%s14828_s2 + $0x9f0] ss:$8 sps:$4 sm:$0xff]  }
 0xe23   :  { %6496 = vmatpush1.bf16.msra.mxu1 %v11133_v44  ;;  %6787 = vmatpush1.bf16.msra.mxu0 %v11235_v52  ;;  %v11259_v44 = vld [vmem:[%s14828_s2 + $0x9d0] ss:$8 sps:$4 sm:$0xff]   ;;  %v9710_v52 = vcombine.high %v9612_v50, %v9612_v50 }
 0xe24   :  { %6497 = vmatprep.subr.bf16.mxu1 %v11138_v61  ;;  %6788 = vmatprep.subr.bf16.mxu0 %v11243_v53  ;;  %v11261_v61 = vld [vmem:[%s14828_s2 + $0x9d4] ss:$8 sps:$4 sm:$0xff]   ;;  %v11278_v53 = vld [vmem:[%s14827_s4 + $0x904] ss:$8 sps:$4 sm:$0xff]  }
 0xe27   :  { %6498 = vmatpush1.bf16.msra.mxu1 %v11136_v62  ;;  %6789 = vmatpush1.bf16.msra.mxu0 %v11241_v34  ;;  %v9546_v62 = vld [vmem:[%s14829_s3 + $0x10] sm:$0x3]  ;;  %v9709_v34 = vcombine.low %v9612_v50, %v9612_v50  ;;  %v11335_v50 = vld [vmem:[%s14831_s6 + $0x34] ss:$8 sps:$4 sm:$0xff]  }
 0xe28   :  { %6499 = vmatprep.subr.bf16.mxu1 %v11141_v63  ;;  %6790 = vmatprep.subr.bf16.mxu0 %v11249_v57  ;;  %v6274_v63 = vrot.slane %v9546_v62, %v11792_v35 }
 0xe2b   :  { %6500 = vmatpush1.bf16.msra.mxu1 %v11139_v48  ;;  %6791 = vmatpush1.bf16.msra.mxu0 %v11247_v56  ;;  %v9579_v56 = vld [vmem:[%s14830_s5 + $0x10] sm:$0x3] }
 0xe2c   :  { %6501 = vmatprep.subr.bf16.mxu1 %v11144_v49  ;;  %6792 = vmatprep.subr.bf16.mxu0 %v11255_v43  ;;  %v6278_v49 = vrot.slane %v9546_v62, %v11794_v36  ;;  %v6326_v57 = vrot.slane %v9579_v56, %v11792_v35 }
 0xe2f   :  { %6502 = vmatpush1.bf16.msra.mxu1 %v11142_v0  ;;  %6793 = vmatpush1.bf16.msra.mxu0 %v11253_v58  ;;  %v6330_v58 = vrot.slane %v9579_v56, %v11794_v36  ;;  %v11344_v56 = vld [vmem:[%s14831_s6 + $0x64] ss:$8 sps:$4 sm:$0xff]  }
 0xe30   :  { %6503 = vmatprep.subr.bf16.mxu1 %v11147_v1  ;;  %6794 = vmatprep.subr.bf16.mxu0 %v11261_v61 }
 0xe33   :  { %6504 = vmatpush1.bf16.msra.mxu1 %v11145_v2  ;;  %6795 = vmatpush1.bf16.msra.mxu0 %v11259_v44 }
 0xe34   :  { %6505 = vmatprep.subr.bf16.mxu1 %v11150_v3  ;;  %6796 = vmatprep.subr.bf16.mxu0 %v11267_v46  ;;  %v11329_v46 = vld [vmem:[%s14831_s6 + $0x14] ss:$8 sps:$4 sm:$0xff]  }
 0xe37   :  { %6506 = vmatpush1.bf16.msra.mxu1 %v11148_v4  ;;  %6797 = vmatpush1.bf16.msra.mxu0 %v11265_v47  ;;  %v11327_v47 = vld [vmem:[%s14831_s6 + $0x10] ss:$8 sps:$4 sm:$0xff]  }
 0xe38   :  { %6507 = vmatprep.subr.bf16.mxu1 %v11153_v5  ;;  %6798 = vmatprep.subr.bf16.mxu0 %v11273_v51  ;;  %v11333_v51 = vld [vmem:[%s14831_s6 + $0x30] ss:$8 sps:$4 sm:$0xff]  }
 0xe3b   :  { %6508 = vmatpush1.bf16.msra.mxu1 %v11151_v8  ;;  %6799 = vmatpush1.bf16.msra.mxu0 %v11271_v32  ;;  %v11336_v32 = vld [vmem:[%s14831_s6 + $0x40] ss:$8 sps:$4 sm:$0xff]  }
 0xe3c   :  { %6509 = vmatprep.subr.bf16.mxu1 %v11156_v9  ;;  %7242 = vmatprep.subr.bf16.mxu0 %v11278_v53  ;;  %v11339_v53 = vld [vmem:[%s14831_s6 + $0x50] ss:$8 sps:$4 sm:$0xff]  }
 0xe3f   :  { %6510 = vmatpush1.bf16.msra.mxu1 %v11154_v10 }
 0xe40   :  { %6511 = vmatprep.subr.bf16.mxu1 %v11159_v59 }
 0xe43   :  { %6512 = vmatpush1.bf16.msra.mxu1 %v11157_v60  ;;  %v11178_v60 = vld [vmem:[%s14825_s1 + $0x900] ss:$8 sps:$4 sm:$0xff]  }
 0xe44   :  { %6513 = vmatprep.subr.bf16.mxu1 %v11162_v11 }
 0xe47   :  { %6514 = vmatpush1.bf16.msra.mxu1 %v11160_v12  ;;  %v11186_v12 = vld [vmem:[%s14825_s1 + $0x914] ss:$8 sps:$4 sm:$0xff]  }
 0xe48   :  { %6515 = vmatprep.subr.bf16.mxu1 %v11165_v13  ;;  %v11184_v13 = vld [vmem:[%s14825_s1 + $0x910] ss:$8 sps:$4 sm:$0xff]  }
 0xe4b   :  { %6516 = vmatpush1.bf16.msra.mxu1 %v11163_v14  ;;  %v11192_v14 = vld [vmem:[%s14825_s1 + $0x924] ss:$8 sps:$4 sm:$0xff]  }
 0xe4c   :  { %6517 = vmatprep.subr.bf16.mxu1 %v11168_v15  ;;  %v11190_v15 = vld [vmem:[%s14825_s1 + $0x920] ss:$8 sps:$4 sm:$0xff]  }
 0xe4f   :  { %6518 = vmatpush1.bf16.msra.mxu1 %v11166_v16  ;;  %v11198_v16 = vld [vmem:[%s14825_s1 + $0x934] ss:$8 sps:$4 sm:$0xff]  }
 0xe50   :  { %6519 = vmatprep.subr.bf16.mxu1 %v11171_v19  ;;  %v11196_v19 = vld [vmem:[%s14825_s1 + $0x930] ss:$8 sps:$4 sm:$0xff]  }
 0xe53   :  { %6520 = vmatpush1.bf16.msra.mxu1 %v11169_v20  ;;  %v14222_v21 = vpop.f32.mrb[48].mxu0  ;;  %v11204_v20 = vld [vmem:[%s14825_s1 + $0x944] ss:$8 sps:$4 sm:$0xff]  }
 0xe54   :  { %v14224_v6 = vpop.f32.mrb[49].mxu0  ;;  %6521 = vmatprep.subr.bf16.mxu1 %v11174_v23  ;;  %v11214_v23 = vld [vmem:[%s14825_s1 + $0x960] ss:$8 sps:$4 sm:$0xff]  }
 0xe55   :  { %v6265_v7 = vpop.f32.mrb[50].mxu0 }
 0xe56   :  { %v6266_v22 = vpop.f32.mrb[51].mxu0  ;;  %v11208_v7 = vld [vmem:[%s14825_s1 + $0x950] ss:$8 sps:$4 sm:$0xff]  }
 0xe57   :  { %6522 = vmatpush1.bf16.msra.mxu1 %v11172_v24  ;;  %v11216_v22 = vld [vmem:[%s14825_s1 + $0x964] ss:$8 sps:$4 sm:$0xff]   ;;  %v11222_v24 = vld [vmem:[%s14825_s1 + $0x974] ss:$8 sps:$4 sm:$0xff]  }
 0xe58   :  { %6523 = vmatprep.subr.bf16.mxu1 %v11177_v25  ;;  %v11220_v25 = vld [vmem:[%s14825_s1 + $0x970] ss:$8 sps:$4 sm:$0xff]  }
 0xe5b   :  { %6524 = vmatpush1.bf16.msra.mxu1 %v11175_v26  ;;  %v11228_v26 = vld [vmem:[%s14825_s1 + $0x984] ss:$8 sps:$4 sm:$0xff]  }
 0xe5c   :  { %6976 = vmatprep.subr.bf16.mxu1 %v11180_v27  ;;  %v11226_v27 = vld [vmem:[%s14825_s1 + $0x980] ss:$8 sps:$4 sm:$0xff]  }
 0xef1   :  { %v6053_v48 = vpop.f32.mrb[44].mxu1 }
 0xef2   :  { %v6262_v0 = vadd.f32 %v14222_v21, %v6053_v48  ;;  %v6055_v1 = vpop.f32.mrb[45].mxu1  ;;  %v11202_v21 = vld [vmem:[%s14825_s1 + $0x940] ss:$8 sps:$4 sm:$0xff]  }
 0xef3   :  { %v6264_v2 = vadd.f32 %v14224_v6, %v6055_v1  ;;  %v6057_v3 = vpop.f32.mrb[46].mxu1  ;;  %v11210_v6 = vld [vmem:[%s14825_s1 + $0x954] ss:$8 sps:$4 sm:$0xff]  }
 0xef4   :  { %v6281_v4 = vadd.f32 %v6274_v63, %v6262_v0  ;;  %v6058_v5 = vpop.f32.mrb[47].mxu1 }
 0xef5   :  { %v6282_v8 = vadd.f32 %v6278_v49, %v6264_v2 }
 0xef6   :  { %v6283_v9 = vmax.f32 %v6281_v4, 0.0  ;;  %v11276_v4 = vld [vmem:[%s14827_s4 + $0x900] ss:$8 sps:$4 sm:$0xff]  }
 0xef7   :  { %v6284_v10 = vmax.f32 %v6282_v8, 0.0  ;;  %v11284_v8 = vld [vmem:[%s14827_s4 + $0x924] ss:$8 sps:$4 sm:$0xff]  }
 0xef8   :  { %v6285_v11 = vpack.c.bf16 %v6283_v9, %v6283_v9  ;;  %v11282_v9 = vld [vmem:[%s14827_s4 + $0x920] ss:$8 sps:$4 sm:$0xff]  }
 0xef9   :  { %v6286_v59 = vpack.c.bf16 %v6284_v10, %v6284_v10  ;;  %v11287_v10 = vld [vmem:[%s14827_s4 + $0x934] ss:$8 sps:$4 sm:$0xff]  }
 0xefb   :  { %6525 = vmatprep.mubr.bf16.mxu1 %v6286_v59  ;;  %v11285_v59 = vld [vmem:[%s14827_s4 + $0x930] ss:$8 sps:$4 sm:$0xff]  }
 0xefc   :  { %6526 = vmatmul.mubr.bf16.vlgmr.msra.gmra.mrb[48].mxu1 %v6285_v11  ;;  %v11288_v11 = vld [vmem:[%s14827_s4 + $0x940] ss:$8 sps:$4 sm:$0xff]  }
 0xefd   :  { %6977 = vmatpush1.bf16.msra.mxu1 %v11178_v60  ;;  %7008 = vmatprep.mubr.bf16.mxu1 %v9710_v52  ;;  %v11290_v60 = vld [vmem:[%s14827_s4 + $0x944] ss:$8 sps:$4 sm:$0xff]  }
 0xefe   :  { %6978 = vmatprep.subr.bf16.mxu1 %v11186_v12  ;;  %v11293_v12 = vld [vmem:[%s14827_s4 + $0x954] ss:$8 sps:$4 sm:$0xff]   ;;  %v11338_v52 = vld [vmem:[%s14831_s6 + $0x44] ss:$8 sps:$4 sm:$0xff]  }
 0xf01   :  { %6979 = vmatpush1.bf16.msra.mxu1 %v11184_v13  ;;  %v11291_v13 = vld [vmem:[%s14827_s4 + $0x950] ss:$8 sps:$4 sm:$0xff]  }
 0xf02   :  { %6980 = vmatprep.subr.bf16.mxu1 %v11192_v14  ;;  %v11296_v14 = vld [vmem:[%s14827_s4 + $0x964] ss:$8 sps:$4 sm:$0xff]  }
 0xf05   :  { %6981 = vmatpush1.bf16.msra.mxu1 %v11190_v15  ;;  %v11294_v15 = vld [vmem:[%s14827_s4 + $0x960] ss:$8 sps:$4 sm:$0xff]  }
 0xf06   :  { %6982 = vmatprep.subr.bf16.mxu1 %v11198_v16  ;;  %v11299_v16 = vld [vmem:[%s14827_s4 + $0x974] ss:$8 sps:$4 sm:$0xff]  }
 0xf09   :  { %6983 = vmatpush1.bf16.msra.mxu1 %v11196_v19  ;;  %v11297_v19 = vld [vmem:[%s14827_s4 + $0x970] ss:$8 sps:$4 sm:$0xff]  }
 0xf0a   :  { %6984 = vmatprep.subr.bf16.mxu1 %v11204_v20  ;;  %v11302_v20 = vld [vmem:[%s14827_s4 + $0x984] ss:$8 sps:$4 sm:$0xff]  }
 0xf0d   :  { %6985 = vmatpush1.bf16.msra.mxu1 %v11202_v21  ;;  %v11300_v21 = vld [vmem:[%s14827_s4 + $0x980] ss:$8 sps:$4 sm:$0xff]  }
 0xf0e   :  { %6986 = vmatprep.subr.bf16.mxu1 %v11210_v6  ;;  %v11305_v6 = vld [vmem:[%s14827_s4 + $0x994] ss:$8 sps:$4 sm:$0xff]  }
 0xf11   :  { %6987 = vmatpush1.bf16.msra.mxu1 %v11208_v7  ;;  %v11303_v7 = vld [vmem:[%s14827_s4 + $0x990] ss:$8 sps:$4 sm:$0xff]  }
 0xf12   :  { %6988 = vmatprep.subr.bf16.mxu1 %v11216_v22  ;;  %v11308_v22 = vld [vmem:[%s14827_s4 + $0x9a4] ss:$8 sps:$4 sm:$0xff]  }
 0xf15   :  { %6989 = vmatpush1.bf16.msra.mxu1 %v11214_v23  ;;  %v11306_v23 = vld [vmem:[%s14827_s4 + $0x9a0] ss:$8 sps:$4 sm:$0xff]  }
 0xf16   :  { %6990 = vmatprep.subr.bf16.mxu1 %v11222_v24  ;;  %v11311_v24 = vld [vmem:[%s14827_s4 + $0x9b4] ss:$8 sps:$4 sm:$0xff]  }
 0xf19   :  { %6991 = vmatpush1.bf16.msra.mxu1 %v11220_v25  ;;  %v11309_v25 = vld [vmem:[%s14827_s4 + $0x9b0] ss:$8 sps:$4 sm:$0xff]  }
 0xf1a   :  { %6992 = vmatprep.subr.bf16.mxu1 %v11228_v26  ;;  %v11314_v26 = vld [vmem:[%s14827_s4 + $0x9c4] ss:$8 sps:$4 sm:$0xff]  }
 0xf1d   :  { %6993 = vmatpush1.bf16.msra.mxu1 %v11226_v27  ;;  %v11312_v27 = vld [vmem:[%s14827_s4 + $0x9c0] ss:$8 sps:$4 sm:$0xff]  }
 0xf1e   :  { %6994 = vmatprep.subr.bf16.mxu1 %v11234_v30  ;;  %v11317_v30 = vld [vmem:[%s14827_s4 + $0x9d4] ss:$8 sps:$4 sm:$0xff]  }
 0xf21   :  { %6995 = vmatpush1.bf16.msra.mxu1 %v11232_v31  ;;  %v11315_v31 = vld [vmem:[%s14827_s4 + $0x9d0] ss:$8 sps:$4 sm:$0xff]  }
 0xf22   :  { %6996 = vmatprep.subr.bf16.mxu1 %v11240_v33 }
 0xf25   :  { %6997 = vmatpush1.bf16.msra.mxu1 %v11238_v17 }
 0xf26   :  { %6998 = vmatprep.subr.bf16.mxu1 %v11246_v18 }
 0xf29   :  { %6999 = vmatpush1.bf16.msra.mxu1 %v11244_v37 }
 0xf2a   :  { %7000 = vmatprep.subr.bf16.mxu1 %v11252_v38  ;;  %v11320_v38 = vld [vmem:[%s14827_s4 + $0x9e4] ss:$8 sps:$4 sm:$0xff]  }
 0xf2d   :  { %7001 = vmatpush1.bf16.msra.mxu1 %v11250_v39  ;;  %v11318_v39 = vld [vmem:[%s14827_s4 + $0x9e0] ss:$8 sps:$4 sm:$0xff]  }
 0xf2e   :  { %7002 = vmatprep.subr.bf16.mxu1 %v11258_v40  ;;  %v11323_v40 = vld [vmem:[%s14827_s4 + $0x9f4] ss:$8 sps:$4 sm:$0xff]  }
 0xf31   :  { %7003 = vmatpush1.bf16.msra.mxu1 %v11256_v41  ;;  %v11321_v41 = vld [vmem:[%s14827_s4 + $0x9f0] ss:$8 sps:$4 sm:$0xff]  }
 0xf32   :  { %7004 = vmatprep.subr.bf16.mxu1 %v11264_v42  ;;  %v11324_v42 = vld [vmem:[%s14831_s6] ss:$8 sps:$4 sm:$0xff]  }
 0xf35   :  { %7005 = vmatpush1.bf16.msra.mxu1 %v11262_v45  ;;  %v11326_v45 = vld [vmem:[%s14831_s6 + $0x4] ss:$8 sps:$4 sm:$0xff]  }
 0xf36   :  { %7006 = vmatprep.subr.bf16.mxu1 %v11270_v28  ;;  %v11332_v28 = vld [vmem:[%s14831_s6 + $0x24] ss:$8 sps:$4 sm:$0xff]  }
 0xf39   :  { %7007 = vmatpush1.bf16.msra.mxu1 %v11268_v29  ;;  %v11330_v29 = vld [vmem:[%s14831_s6 + $0x20] ss:$8 sps:$4 sm:$0xff]  }
 0xf3a   :  { %7493 = vmatprep.subr.bf16.mxu1 %v11326_v45  ;;  %v11395_v45 = vld [vmem:[%s14832_s8 + $0x74] ss:$8 sps:$4 sm:$0xff]  }
 0xf3c   :  { %7009 = vmatmul.mubr.bf16.vlgmr.msra.gmra.mrb[52].mxu1 %v9709_v34  ;;  %v11341_v34 = vld [vmem:[%s14831_s6 + $0x54] ss:$8 sps:$4 sm:$0xff]  }
 0xf3d   :  { %7494 = vmatpush1.bf16.msra.mxu1 %v11324_v42  ;;  %v11390_v42 = vld [vmem:[%s14832_s8 + $0x60] ss:$8 sps:$4 sm:$0xff]  }
 0xf3e   :  { %7495 = vmatprep.subr.bf16.mxu1 %v11329_v46  ;;  %v11393_v46 = vld [vmem:[%s14832_s8 + $0x70] ss:$8 sps:$4 sm:$0xff]  }
 0xf41   :  { %7496 = vmatpush1.bf16.msra.mxu1 %v11327_v47  ;;  %v11398_v47 = vld [vmem:[%s14832_s8 + $0x84] ss:$8 sps:$4 sm:$0xff]  }
 0xf42   :  { %7497 = vmatprep.subr.bf16.mxu1 %v11332_v28  ;;  %v11396_v28 = vld [vmem:[%s14832_s8 + $0x80] ss:$8 sps:$4 sm:$0xff]  }
 0xf45   :  { %7498 = vmatpush1.bf16.msra.mxu1 %v11330_v29  ;;  %v11401_v29 = vld [vmem:[%s14832_s8 + $0x94] ss:$8 sps:$4 sm:$0xff]  }
 0xf46   :  { %7499 = vmatprep.subr.bf16.mxu1 %v11335_v50  ;;  %v11399_v50 = vld [vmem:[%s14832_s8 + $0x90] ss:$8 sps:$4 sm:$0xff]  }
 0xf49   :  { %7500 = vmatpush1.bf16.msra.mxu1 %v11333_v51  ;;  %v11404_v51 = vld [vmem:[%s14832_s8 + $0xa4] ss:$8 sps:$4 sm:$0xff]  }
 0xf4a   :  { %7501 = vmatprep.subr.bf16.mxu1 %v11338_v52  ;;  %v11402_v52 = vld [vmem:[%s14832_s8 + $0xa0] ss:$8 sps:$4 sm:$0xff]  }
 0xf4d   :  { %7502 = vmatpush1.bf16.msra.mxu1 %v11336_v32  ;;  %v11407_v32 = vld [vmem:[%s14832_s8 + $0xb4] ss:$8 sps:$4 sm:$0xff]  }
 0xf4e   :  { %7503 = vmatprep.subr.bf16.mxu1 %v11341_v34  ;;  %v11405_v34 = vld [vmem:[%s14832_s8 + $0xb0] ss:$8 sps:$4 sm:$0xff]  }
 0xf51   :  { %7504 = vmatpush1.bf16.msra.mxu1 %v11339_v53  ;;  %v11410_v53 = vld [vmem:[%s14832_s8 + $0xc4] ss:$8 sps:$4 sm:$0xff]  }
 0xf52   :  { %7505 = vmatprep.subr.bf16.mxu1 %v11344_v56  ;;  %v11408_v56 = vld [vmem:[%s14832_s8 + $0xc0] ss:$8 sps:$4 sm:$0xff]  }
 0xfcf   :  { %v6527_v43 = vpop.f32.mrb[48].mxu1 }
 0xfd0   :  { %v6528_v44 = vadd.f32 %v6527_v43, %v6326_v57  ;;  %v6529_v61 = vpop.f32.mrb[49].mxu1  ;;  %v11342_v57 = vld [vmem:[%s14831_s6 + $0x60] ss:$8 sps:$4 sm:$0xff]   ;;  %v11345_v43 = vld [vmem:[%s14831_s6 + $0x70] ss:$8 sps:$4 sm:$0xff]  }
 0xfd1   :  { %v6530_v62 = vadd.f32 %v6529_v61, %v6330_v58  ;;  %v6531_v63 = vpop.f32.mrb[50].mxu1  ;;  %v11347_v58 = vld [vmem:[%s14831_s6 + $0x74] ss:$8 sps:$4 sm:$0xff]   ;;  %7506 = vmatpush1.bf16.msra.mxu1 %v11342_v57  ;;  %v11348_v61 = vld [vmem:[%s14831_s6 + $0x80] ss:$8 sps:$4 sm:$0xff]  }
 0xfd2   :  { %v6534_v48 = vadd.f32 %v6528_v44, %v14133_v54  ;;  %v6532_v49 = vpop.f32.mrb[51].mxu1  ;;  %v11281_v54 = vld [vmem:[%s14827_s4 + $0x914] ss:$8 sps:$4 sm:$0xff]   ;;  %7507 = vmatprep.subr.bf16.mxu1 %v11347_v58  ;;  %v11350_v44 = vld [vmem:[%s14831_s6 + $0x84] ss:$8 sps:$4 sm:$0xff]  }
 0xfd3   :  { %v6535_v0 = vadd.f32 %v6530_v62, %v14135_v55  ;;  %v11279_v55 = vld [vmem:[%s14827_s4 + $0x910] ss:$8 sps:$4 sm:$0xff]   ;;  %v11353_v62 = vld [vmem:[%s14831_s6 + $0x94] ss:$8 sps:$4 sm:$0xff]   ;;  %v11354_v49 = vld [vmem:[%s14831_s6 + $0xa0] ss:$8 sps:$4 sm:$0xff]  }
 0xfd4   :  { %v14450_v1 = vmax.f32 %v6534_v48, 0.0  ;;  %v11351_v63 = vld [vmem:[%s14831_s6 + $0x90] ss:$8 sps:$4 sm:$0xff]   ;;  %v11356_v48 = vld [vmem:[%s14831_s6 + $0xa4] ss:$8 sps:$4 sm:$0xff]  }
 0xfd5   :  { %v14452_v2 = vmax.f32 %v6535_v0, 0.0  ;;  %7508 = vmatpush1.bf16.msra.mxu1 %v11345_v43  ;;  %v11359_v0 = vld [vmem:[%s14831_s6 + $0xb4] ss:$8 sps:$4 sm:$0xff]   ;;  %v11411_v58 = vld [vmem:[%s14832_s8 + $0xd0] ss:$8 sps:$4 sm:$0xff]  }
 0xfd6   :  { %v6538_v5 = vpack.c.bf16 %v14450_v1, %v14450_v1  ;;  %7509 = vmatprep.subr.bf16.mxu1 %v11350_v44  ;;  %v11413_v57 = vld [vmem:[%s14832_s8 + $0xd4] ss:$8 sps:$4 sm:$0xff]   ;;  %v9776_v43 = vld [vmem:[%s14830_s5 + $0x12] sm:$0x3] }
 0xfd7   :  { %v6539_v3 = vpack.c.bf16 %v14452_v2, %v14452_v2  ;;  %v7075_v44 = vrot.slane %v9776_v43, %v11792_v35 }
 0xfd9   :  { %6800 = vmatprep.mubr.bf16.mxu0 %v6539_v3  ;;  %7510 = vmatpush1.bf16.msra.mxu1 %v11348_v61  ;;  %v11357_v3 = vld [vmem:[%s14831_s6 + $0xb0] ss:$8 sps:$4 sm:$0xff]   ;;  %v7079_v61 = vrot.slane %v9776_v43, %v11794_v36  ;;  %v9873_v43 = vld [vmem:[%s14836_s11] ss:$0 sm:$0xff] }
 0xfda   :  { %6801 = vmatmul.mubr.bf16.vlgmr.msra.gmra.mrb[52].mxu0 %v6538_v5  ;;  %7511 = vmatprep.subr.bf16.mxu1 %v11353_v62  ;;  %v11360_v5 = vld [vmem:[%s14831_s6 + $0xc0] ss:$8 sps:$4 sm:$0xff]  }
 0xfdb   :  { %7243 = vmatpush1.bf16.msra.mxu0 %v11276_v4  ;;  %v11362_v4 = vld [vmem:[%s14831_s6 + $0xc4] ss:$8 sps:$4 sm:$0xff]  }
 0xfdc   :  { %7244 = vmatprep.subr.bf16.mxu0 %v11281_v54  ;;  %v11365_v54 = vld [vmem:[%s14831_s6 + $0xd4] ss:$8 sps:$4 sm:$0xff]  }
 0xfdd   :  { %7512 = vmatpush1.bf16.msra.mxu1 %v11351_v63 }
 0xfde   :  { %7513 = vmatprep.subr.bf16.mxu1 %v11356_v48 }
 0xfdf   :  { %7245 = vmatpush1.bf16.msra.mxu0 %v11279_v55  ;;  %v11363_v55 = vld [vmem:[%s14831_s6 + $0xd0] ss:$8 sps:$4 sm:$0xff]  }
 0xfe0   :  { %7246 = vmatprep.subr.bf16.mxu0 %v11284_v8  ;;  %v9743_v8 = vld [vmem:[%s14829_s3 + $0x12] sm:$0x3] }
 0xfe1   :  { %7514 = vmatpush1.bf16.msra.mxu1 %v11354_v49 }
 0xfe2   :  { %7515 = vmatprep.subr.bf16.mxu1 %v11359_v0 }
 0xfe3   :  { %7247 = vmatpush1.bf16.msra.mxu0 %v11282_v9  ;;  %v7023_v9 = vrot.slane %v9743_v8, %v11792_v35 }
 0xfe4   :  { %7248 = vmatprep.subr.bf16.mxu0 %v11287_v10 }
 0xfe5   :  { %7516 = vmatpush1.bf16.msra.mxu1 %v11357_v3 }
 0xfe6   :  { %7517 = vmatprep.subr.bf16.mxu1 %v11362_v4 }
 0xfe7   :  { %7249 = vmatpush1.bf16.msra.mxu0 %v11285_v59  ;;  %v7027_v59 = vrot.slane %v9743_v8, %v11794_v36 }
 0xfe8   :  { %7250 = vmatprep.subr.bf16.mxu0 %v11290_v60 }
 0xfe9   :  { %7518 = vmatpush1.bf16.msra.mxu1 %v11360_v5 }
 0xfea   :  { %7519 = vmatprep.subr.bf16.mxu1 %v11365_v54 }
 0xfeb   :  { %7251 = vmatpush1.bf16.msra.mxu0 %v11288_v11 }
 0xfec   :  { %7252 = vmatprep.subr.bf16.mxu0 %v11293_v12 }
 0xfed   :  { %7520 = vmatpush1.bf16.msra.mxu1 %v11363_v55 }
 0xfef   :  { %7253 = vmatpush1.bf16.msra.mxu0 %v11291_v13 }
 0xff0   :  { %7254 = vmatprep.subr.bf16.mxu0 %v11296_v14 }
 0xff3   :  { %7255 = vmatpush1.bf16.msra.mxu0 %v11294_v15 }
 0xff4   :  { %7256 = vmatprep.subr.bf16.mxu0 %v11299_v16 }
 0xff7   :  { %7257 = vmatpush1.bf16.msra.mxu0 %v11297_v19 }
 0xff8   :  { %7258 = vmatprep.subr.bf16.mxu0 %v11302_v20 }
 0xffb   :  { %7259 = vmatpush1.bf16.msra.mxu0 %v11300_v21 }
 0xffc   :  { %7260 = vmatprep.subr.bf16.mxu0 %v11305_v6 }
 0xfff   :  { %7261 = vmatpush1.bf16.msra.mxu0 %v11303_v7  ;;  %v11368_v7 = vld [vmem:[%s14831_s6 + $0xe4] ss:$8 sps:$4 sm:$0xff]  }
0x1000   :  { %7262 = vmatprep.subr.bf16.mxu0 %v11308_v22  ;;  %v11366_v22 = vld [vmem:[%s14831_s6 + $0xe0] ss:$8 sps:$4 sm:$0xff]   ;;  %7521 = vmatprep.subr.bf16.mxu1 %v11368_v7 }
0x1001   :  { %7522 = vmatpush1.bf16.msra.mxu1 %v11366_v22  ;;  %v11431_v7 = vld [vmem:[%s14833_s10 + $0x28] sm:$0xff]   ;;  %v7321_v22 = vld [vmem:[%s14834_s7] sm:$0x3] }
0x1003   :  { %7263 = vmatpush1.bf16.msra.mxu0 %v11306_v23  ;;  %v11371_v23 = vld [vmem:[%s14831_s6 + $0xf4] ss:$8 sps:$4 sm:$0xff]  }
0x1004   :  { %7264 = vmatprep.subr.bf16.mxu0 %v11311_v24  ;;  %v11369_v24 = vld [vmem:[%s14831_s6 + $0xf0] ss:$8 sps:$4 sm:$0xff]   ;;  %7523 = vmatprep.subr.bf16.mxu1 %v11371_v23  ;;  %v7326_v23 = vrot.slane %v7321_v22, %v11792_v35 }
0x1005   :  { %7524 = vmatpush1.bf16.msra.mxu1 %v11369_v24  ;;  %v7330_v24 = vrot.slane %v7321_v22, %v11794_v36 }
0x1007   :  { %7265 = vmatpush1.bf16.msra.mxu0 %v11309_v25  ;;  %v11372_v25 = vld [vmem:[%s14832_s8] ss:$8 sps:$4 sm:$0xff]  }
0x1008   :  { %7266 = vmatprep.subr.bf16.mxu0 %v11314_v26  ;;  %v11374_v26 = vld [vmem:[%s14832_s8 + $0x4] ss:$8 sps:$4 sm:$0xff]  }
0x100b   :  { %7267 = vmatpush1.bf16.msra.mxu0 %v11312_v27  ;;  %v11377_v27 = vld [vmem:[%s14832_s8 + $0x14] ss:$8 sps:$4 sm:$0xff]  }
0x100c   :  { %7268 = vmatprep.subr.bf16.mxu0 %v11317_v30  ;;  %v11375_v30 = vld [vmem:[%s14832_s8 + $0x10] ss:$8 sps:$4 sm:$0xff]  }
0x100f   :  { %7269 = vmatpush1.bf16.msra.mxu0 %v11315_v31  ;;  %v14539_v33 = vpop.f32.mrb[52].mxu1  ;;  %v11380_v31 = vld [vmem:[%s14832_s8 + $0x24] ss:$8 sps:$4 sm:$0xff]  }
0x1010   :  { %v14541_v17 = vpop.f32.mrb[53].mxu1  ;;  %7270 = vmatprep.subr.bf16.mxu0 %v11320_v38  ;;  %v11384_v38 = vld [vmem:[%s14832_s8 + $0x40] ss:$8 sps:$4 sm:$0xff]  }
0x1011   :  { %v7014_v18 = vpop.f32.mrb[54].mxu1 }
0x1012   :  { %v7015_v37 = vpop.f32.mrb[55].mxu1  ;;  %v11381_v18 = vld [vmem:[%s14832_s8 + $0x30] ss:$8 sps:$4 sm:$0xff]  }
0x1013   :  { %7271 = vmatpush1.bf16.msra.mxu0 %v11318_v39  ;;  %v11386_v37 = vld [vmem:[%s14832_s8 + $0x44] ss:$8 sps:$4 sm:$0xff]   ;;  %v11389_v39 = vld [vmem:[%s14832_s8 + $0x54] ss:$8 sps:$4 sm:$0xff]  }
0x1014   :  { %7272 = vmatprep.subr.bf16.mxu0 %v11323_v40  ;;  %v11387_v40 = vld [vmem:[%s14832_s8 + $0x50] ss:$8 sps:$4 sm:$0xff]  }
0x1017   :  { %7273 = vmatpush1.bf16.msra.mxu0 %v11321_v41  ;;  %v11392_v41 = vld [vmem:[%s14832_s8 + $0x64] ss:$8 sps:$4 sm:$0xff]  }
0x1018   :  { %7742 = vmatprep.subr.bf16.mxu0 %v11374_v26 }
0x10ad   :  { %v6802_v10 = vpop.f32.mrb[52].mxu0 }
0x10ae   :  { %v7011_v60 = vadd.f32 %v14539_v33, %v6802_v10  ;;  %v6804_v11 = vpop.f32.mrb[53].mxu0  ;;  %v11378_v33 = vld [vmem:[%s14832_s8 + $0x20] ss:$8 sps:$4 sm:$0xff]   ;;  %v11416_v10 = vld [vmem:[%s14832_s8 + $0xe4] ss:$8 sps:$4 sm:$0xff]  }
0x10af   :  { %v7013_v12 = vadd.f32 %v14541_v17, %v6804_v11  ;;  %v6806_v13 = vpop.f32.mrb[54].mxu0  ;;  %v11383_v17 = vld [vmem:[%s14832_s8 + $0x34] ss:$8 sps:$4 sm:$0xff]   ;;  %v11421_v11 = vld [vmem:[%s14833_s10] sm:$0xff]  }
0x10b0   :  { %v7030_v14 = vadd.f32 %v7023_v9, %v7011_v60  ;;  %v6807_v15 = vpop.f32.mrb[55].mxu0  ;;  %v11420_v60 = vld [vmem:[%s14833_s10 + $0x40] sm:$0xff]   ;;  %v11423_v13 = vld [vmem:[%s14833_s10 + $0x8] sm:$0xff]  }
0x10b1   :  { %v7031_v16 = vadd.f32 %v7027_v59, %v7013_v12  ;;  %v11414_v59 = vld [vmem:[%s14832_s8 + $0xe0] ss:$8 sps:$4 sm:$0xff]   ;;  %9890 = vmatprep.subr.bf16.mxu1 %v11420_v60  ;;  %v11425_v15 = vld [vmem:[%s14833_s10 + $0x10] sm:$0xff]  }
0x10b2   :  { %v7032_v19 = vmax.f32 %v7030_v14, 0.0  ;;  %v11422_v12 = vld [vmem:[%s14833_s10 + $0x48] sm:$0xff]   ;;  %v11424_v14 = vld [vmem:[%s14833_s10 + $0x50] sm:$0xff]  }
0x10b3   :  { %v7033_v20 = vmax.f32 %v7031_v16, 0.0  ;;  %v11426_v16 = vld [vmem:[%s14833_s10 + $0x58] sm:$0xff]  }
0x10b4   :  { %v7034_v6 = vpack.c.bf16 %v7032_v19, %v7032_v19  ;;  %v11427_v19 = vld [vmem:[%s14833_s10 + $0x18] sm:$0xff]  }
0x10b5   :  { %v7035_v21 = vpack.c.bf16 %v7033_v20, %v7033_v20  ;;  %v11428_v20 = vld [vmem:[%s14833_s10 + $0x60] sm:$0xff]  }
0x10b7   :  { %7274 = vmatprep.mubr.bf16.mxu0 %v7035_v21  ;;  %v11429_v21 = vld [vmem:[%s14833_s10 + $0x20] sm:$0xff]  }
0x10b8   :  { %7275 = vmatmul.mubr.bf16.vlgmr.msra.gmra.mrb[56].mxu0 %v7034_v6  ;;  %v11430_v6 = vld [vmem:[%s14833_s10 + $0x68] sm:$0xff]  }
0x10b9   :  { %7743 = vmatpush1.bf16.msra.mxu0 %v11372_v25 }
0x10ba   :  { %7744 = vmatprep.subr.bf16.mxu0 %v11377_v27 }
0x10bd   :  { %7745 = vmatpush1.bf16.msra.mxu0 %v11375_v30 }
0x10be   :  { %7746 = vmatprep.subr.bf16.mxu0 %v11380_v31 }
0x10c1   :  { %7747 = vmatpush1.bf16.msra.mxu0 %v11378_v33 }
0x10c2   :  { %7748 = vmatprep.subr.bf16.mxu0 %v11383_v17 }
0x10c5   :  { %7749 = vmatpush1.bf16.msra.mxu0 %v11381_v18 }
0x10c6   :  { %7750 = vmatprep.subr.bf16.mxu0 %v11386_v37 }
0x10c9   :  { %7751 = vmatpush1.bf16.msra.mxu0 %v11384_v38 }
0x10ca   :  { %7752 = vmatprep.subr.bf16.mxu0 %v11389_v39  ;;  %v11432_v39 = vld [vmem:[%s14833_s10 + $0x70] sm:$0xff]  }
0x10cd   :  { %7753 = vmatpush1.bf16.msra.mxu0 %v11387_v40  ;;  %v11433_v40 = vld [vmem:[%s14833_s10 + $0x30] sm:$0xff]  }
0x10ce   :  { %7754 = vmatprep.subr.bf16.mxu0 %v11392_v41  ;;  %v11434_v41 = vld [vmem:[%s14833_s10 + $0x78] sm:$0xff]  }
0x10d1   :  { %7755 = vmatpush1.bf16.msra.mxu0 %v11390_v42  ;;  %v11435_v42 = vld [vmem:[%s14833_s10 + $0x38] sm:$0xff]  }
0x10d2   :  { %7756 = vmatprep.subr.bf16.mxu0 %v11395_v45  ;;  %v7570_v45 = vld [vmem:[%s14835_s9] sm:$0x3] }
0x10d5   :  { %7757 = vmatpush1.bf16.msra.mxu0 %v11393_v46  ;;  %v7575_v46 = vrot.slane %v7570_v45, %v11792_v35 }
0x10d6   :  { %7758 = vmatprep.subr.bf16.mxu0 %v11398_v47  ;;  %v7579_v47 = vrot.slane %v7570_v45, %v11794_v36 }
0x10d9   :  { %7759 = vmatpush1.bf16.msra.mxu0 %v11396_v28 }
0x10da   :  { %7760 = vmatprep.subr.bf16.mxu0 %v11401_v29 }
0x10dd   :  { %7761 = vmatpush1.bf16.msra.mxu0 %v11399_v50 }
0x10de   :  { %7762 = vmatprep.subr.bf16.mxu0 %v11404_v51 }
0x10e1   :  { %7763 = vmatpush1.bf16.msra.mxu0 %v11402_v52 }
0x10e2   :  { %7764 = vmatprep.subr.bf16.mxu0 %v11407_v32 }
0x10e5   :  { %7765 = vmatpush1.bf16.msra.mxu0 %v11405_v34 }
0x10e6   :  { %7766 = vmatprep.subr.bf16.mxu0 %v11410_v53 }
0x10e9   :  { %7767 = vmatpush1.bf16.msra.mxu0 %v11408_v56 }
0x10ea   :  { %7768 = vmatprep.subr.bf16.mxu0 %v11413_v57 }
0x10ed   :  { %7769 = vmatpush1.bf16.msra.mxu0 %v11411_v58 }
0x10ee   :  { %7770 = vmatprep.subr.bf16.mxu0 %v11416_v10 }
0x10f1   :  { %7771 = vmatpush1.bf16.msra.mxu0 %v11414_v59 }
0x118b   :  { %v7276_v62 = vpop.f32.mrb[56].mxu0 }
0x118c   :  { %v7277_v63 = vadd.f32 %v7276_v62, %v7075_v44  ;;  %v7278_v48 = vpop.f32.mrb[57].mxu0 }
0x118d   :  { %v7279_v49 = vadd.f32 %v7278_v48, %v7079_v61  ;;  %v7280_v0 = vpop.f32.mrb[58].mxu0 }
0x118e   :  { %v7283_v3 = vadd.f32 %v7277_v63, %v14450_v1  ;;  %v7281_v4 = vpop.f32.mrb[59].mxu0  ;;  %v11419_v1 = vld [vmem:[%s14832_s8 + $0xf4] ss:$8 sps:$4 sm:$0xff]  }
0x118f   :  { %v7284_v5 = vadd.f32 %v7279_v49, %v14452_v2  ;;  %v11417_v2 = vld [vmem:[%s14832_s8 + $0xf0] ss:$8 sps:$4 sm:$0xff]   ;;  %7772 = vmatprep.subr.bf16.mxu0 %v11419_v1 }
0x1190   :  { %v7285_v54 = vmax.f32 %v7283_v3, 0.0  ;;  %7773 = vmatpush1.bf16.msra.mxu0 %v11417_v2 }
0x1191   :  { %v7286_v55 = vmax.f32 %v7284_v5, 0.0 }
0x1192   :  { %v7287_v9 = vpack.c.bf16 %v7285_v54, %v7285_v54 }
0x1193   :  { %v7288_v8 = vpack.c.bf16 %v7286_v55, %v7286_v55 }
0x1195   :  { %7525 = vmatprep.mubr.bf16.mxu1 %v7288_v8 }
0x1196   :  { %7526 = vmatmul.mubr.bf16.vlgmr.msra.gmra.mrb[56].mxu1 %v7287_v9 }
0x1197   :  { %9891 = vmatpush3.bf16.msra.mxu1 %v11421_v11 }
0x1198   :  { %9892 = vmatprep.subr.bf16.mxu1 %v11422_v12 }
0x119b   :  { %9893 = vmatpush3.bf16.msra.mxu1 %v11423_v13 }
0x119c   :  { %9894 = vmatprep.subr.bf16.mxu1 %v11424_v14 }
0x119f   :  { %9895 = vmatpush3.bf16.msra.mxu1 %v11425_v15 }
0x11a0   :  { %9896 = vmatprep.subr.bf16.mxu1 %v11426_v16 }
0x11a3   :  { %9897 = vmatpush3.bf16.msra.mxu1 %v11427_v19 }
0x11a4   :  { %9898 = vmatprep.subr.bf16.mxu1 %v11428_v20 }
0x11a7   :  { %9899 = vmatpush3.bf16.msra.mxu1 %v11429_v21 }
0x11a8   :  { %9900 = vmatprep.subr.bf16.mxu1 %v11430_v6 }
0x11ab   :  { %9901 = vmatpush3.bf16.msra.mxu1 %v11431_v7 }
0x11ac   :  { %9902 = vmatprep.subr.bf16.mxu1 %v11432_v39 }
0x11af   :  { %9903 = vmatpush3.bf16.msra.mxu1 %v11433_v40 }
0x11b0   :  { %9904 = vmatprep.subr.bf16.mxu1 %v11434_v41 }
0x11b3   :  { %9905 = vmatpush3.bf16.msra.mxu1 %v11435_v42 }
0x1269   :  { %v7527_v25 = vpop.f32.mrb[56].mxu1 }
0x126a   :  { %v7528_v26 = vadd.f32 %v7527_v25, %v7326_v23  ;;  %v7529_v27 = vpop.f32.mrb[57].mxu1 }
0x126b   :  { %v7530_v30 = vadd.f32 %v7529_v27, %v7330_v24  ;;  %v7531_v31 = vpop.f32.mrb[58].mxu1 }
0x126c   :  { %v7534_v33 = vmax.f32 %v7528_v26, 0.0  ;;  %v7532_v17 = vpop.f32.mrb[59].mxu1 }
0x126d   :  { %v7535_v18 = vmax.f32 %v7530_v30, 0.0 }
0x126e   :  { %v7536_v38 = vpack.c.bf16 %v7534_v33, %v7534_v33 }
0x126f   :  { %v7537_v37 = vpack.c.bf16 %v7535_v18, %v7535_v18 }
0x1271   :  { %7774 = vmatprep.mubr.bf16.mxu0 %v7537_v37 }
0x1272   :  { %7775 = vmatmul.mubr.bf16.vlgmr.msra.gmra.mrb[60].mxu0 %v7536_v38 }
0x1345   :  { %v7776_v28 = vpop.f32.mrb[60].mxu0 }
0x1346   :  { %v7777_v29 = vadd.f32 %v7776_v28, %v7575_v46  ;;  %v7778_v50 = vpop.f32.mrb[61].mxu0 }
0x1347   :  { %v7779_v51 = vadd.f32 %v7778_v50, %v7579_v47  ;;  %v7780_v52 = vpop.f32.mrb[62].mxu0 }
0x1348   :  { %v7783_v32 = vmax.f32 %v7777_v29, 0.0  ;;  %v7781_v34 = vpop.f32.mrb[63].mxu0 }
0x1349   :  { %v7784_v53 = vmax.f32 %v7779_v51, 0.0 }
0x134a   :  { %v7785_v57 = vpack.c.bf16 %v7783_v32, %v7783_v32 }
0x134b   :  { %v7786_v56 = vpack.c.bf16 %v7784_v53, %v7784_v53 }
0x134d   :  { %7954 = vmatprep.mubr.bf16.mxu1 %v7786_v56 }
0x134e   :  { %7955 = vmatmul.mubr.bf16.vlgmr.msra.gmra.mrb[60].mxu1 %v7785_v57 }
0x1421   :  { %v9906_v58 = vpop.f32.mrb[60].mxu1 }
0x1422   :  { %v9907_v35 = vpop.f32.mrb[61].mxu1 }
0x1423   :  { %v9908_v44 = vadd.f32 %v9907_v35, %v9906_v58  ;;  %v9909_v36 = vpop.f32.mrb[62].mxu1 }
0x1424   :  { %v9910_v61 = vpop.f32.mrb[63].mxu1 }
0x1425   :  { %v7957_v62 = vadd.f32 %v9908_v44, %v9873_v43 }
0x1427   :  { %vm7962_vm0 = vcmp.ge.f32.partialorder %v7957_v62, 0.0  ;;  %v7963_v63 = vmul.f32 0.01, %v7957_v62 }
0x1429   :  { %v7964_v48 = vsel %vm7962_vm0, %v7957_v62, %v7963_v63 }
0x142a   :  { %7965 = vst [vmem:[%s14837_s12] sm:$0xff] %v7964_v48 }

</bundles_post_ra>
